<compile_context>
chip_gen: v7x
topology: tpu7x:2x2x1
jax: 0.10.0
libtpu: 0.0.40
codegen_flags: <defaults>
</compile_context>

<pallas_src>
import functools

import jax
import jax.numpy as jnp
from jax import lax
from jax.experimental import pallas as pl
from jax.experimental.pallas import tpu as pltpu


# ------------------------------- kernel ------------------------------------ #
def _attn_ln_kernel(x_ref, w_in_ref, b_in_ref, w_out_ref, b_out_ref,
                    gamma_ref, beta_ref, pavg_ref, o_ref,
                    *, heads, head_dim, eps):
    """Fused self-attention + residual + LayerNorm for one batch element.

    All activations are kept channel-major: x_ref block is (1, C, S) with the
    token axis S = H*W on lanes.  Output block is (1, C, S).
    """
    C = heads * head_dim
    S = x_ref.shape[2]

    xT = x_ref[0]                                            # (C, S) f32
    x_bf = xT.astype(jnp.bfloat16)

    # in_proj: qkv^T = W_in @ x^T + b_in      -> (3C, S), f32 accumulation
    qkvT = jnp.dot(w_in_ref[...], x_bf, preferred_element_type=jnp.float32)
    qkvT = qkvT + b_in_ref[...]                              # (3C,1) bcast

    scale = 1.0 / (head_dim ** 0.5)
    qT = (qkvT[0 * C:1 * C, :] * scale).astype(jnp.bfloat16)   # (C, S)
    kT = qkvT[1 * C:2 * C, :].astype(jnp.bfloat16)
    vT = qkvT[2 * C:3 * C, :].astype(jnp.bfloat16)

    # split heads along the sublane (channel) axis: (heads, head_dim, S)
    q_h = qT.reshape(heads, head_dim, S)
    k_h = kT.reshape(heads, head_dim, S)
    v_h = vT.reshape(heads, head_dim, S)

    # scores for ALL heads with one batched contraction (contract head_dim)
    s = jnp.einsum('hdq,hdk->hqk', q_h, k_h,
                   preferred_element_type=jnp.float32)       # (heads, S, S)

    # softmax over keys; reciprocal goes to the (otherwise idle) EUP slot
    m = jnp.max(s, axis=-1, keepdims=True)
    e = jnp.exp(s - m)
    denom = jnp.sum(e, axis=-1, keepdims=True)
    p = (e * pl.reciprocal(denom, approx=True)).astype(jnp.bfloat16)

    # attention output per head, contracting over keys (K = S, MXU-friendly),
    # then merge heads back onto the channel axis: (C, S)
    oT = jnp.einsum('hdk,hqk->hdq', v_h, p,
                    preferred_element_type=jnp.float32)      # (heads, hd, S)
    oT = oT.reshape(C, S).astype(jnp.bfloat16)

    # single out_proj matmul + bias, then residual (f32)
    attnT = jnp.dot(w_out_ref[...], oT, preferred_element_type=jnp.float32)
    y = attnT + b_out_ref[...] + xT                          # (C, S) f32

    # Fused LayerNorm over each W-chunk of the lane axis (== nn.LayerNorm(dim)
    # applied to the NCHW tensor, which normalizes the W axis; requires
    # W == dim).  pavg_ref is the block-diagonal averaging matrix
    # P[s, t] = 1/W if s//W == t//W else 0, so a single matmul both reduces
    # and broadcasts the per-chunk statistic — everything stays lane-dense.
    seg_mean = jnp.dot(y, pavg_ref[...], preferred_element_type=jnp.float32)
    seg_sq = jnp.dot(y * y, pavg_ref[...], preferred_element_type=jnp.float32)
    var = seg_sq - seg_mean * seg_mean
    inv = lax.rsqrt(var + eps)
    out = (y - seg_mean) * inv * gamma_ref[...] + beta_ref[...]
    o_ref[0] = out.astype(o_ref.dtype)


# ------------------------------- wrapper ----------------------------------- #
def attention_block(x, params, heads, *, eps=1e-5):
    B, C, H, W = x.shape
    assert W == C, "nn.LayerNorm(dim) applied to an NCHW tensor requires W == dim"
    assert C % heads == 0
    S = H * W
    head_dim = C // heads

    # NCHW -> (B, C, S) is a pure metadata reshape (no transpose, no copy).
    xT = x.reshape(B, C, S)

    # Weights cast to bf16 in the wrapper so HBM/VMEM traffic is bf16 too.
    w_in = params["in_proj_weight"].astype(jnp.bfloat16)         # (3C, C)
    b_in = params["in_proj_bias"].reshape(3 * C, 1).astype(jnp.float32)
    w_out = params["out_proj_weight"].astype(jnp.bfloat16)       # (C, C)
    b_out = params["out_proj_bias"].reshape(C, 1).astype(jnp.float32)

    # LayerNorm affine params tiled onto the lane axis: gamma_t[h*W + w] = gamma[w]
    gamma_t = jnp.tile(params["ln_weight"], H).reshape(1, S).astype(jnp.float32)
    beta_t = jnp.tile(params["ln_bias"], H).reshape(1, S).astype(jnp.float32)

    # Block-diagonal averaging matrix for the fused, lane-dense LayerNorm.
    seg = jnp.arange(S) // W
    p_avg = (seg[:, None] == seg[None, :]).astype(jnp.float32) / W   # (S, S)

    # TODO(synk): for large S = H*W, tile the (S, S) scores flash-attention
    # style (query-tile x kv-tile grid, online softmax) to bound VMEM on v7x.
    out_flat = pl.pallas_call(
        functools.partial(_attn_ln_kernel, heads=heads, head_dim=head_dim,
                          eps=eps),
        out_shape=jax.ShapeDtypeStruct((B, C, S), x.dtype),
        grid=(B,),
        in_specs=[
            pl.BlockSpec((1, C, S), lambda b: (b, 0, 0)),
            pl.BlockSpec((3 * C, C), lambda b: (0, 0)),
            pl.BlockSpec((3 * C, 1), lambda b: (0, 0)),
            pl.BlockSpec((C, C), lambda b: (0, 0)),
            pl.BlockSpec((C, 1), lambda b: (0, 0)),
            pl.BlockSpec((1, S), lambda b: (0, 0)),
            pl.BlockSpec((1, S), lambda b: (0, 0)),
            pl.BlockSpec((S, S), lambda b: (0, 0)),
        ],
        out_specs=pl.BlockSpec((1, C, S), lambda b: (b, 0, 0)),
        compiler_params=pltpu.CompilerParams(dimension_semantics=("parallel",)),
    )(xT, w_in, b_in, w_out, b_out, gamma_t, beta_t, p_avg)

    # (B, C, S) -> (B, C, H, W) is again a free reshape.
    return out_flat.reshape(B, C, H, W)


# --------------------------- pure-JAX reference ----------------------------- #
def attention_block_ref(x, params, heads, *, eps=1e-5):
    B, C, H, W = x.shape
    S, hd = H * W, C // heads
    x_flat = jnp.transpose(x, (0, 2, 3, 1)).reshape(B, S, C)
    qkv = x_flat @ params["in_proj_weight"].T + params["in_proj_bias"]
    q, k, v = qkv[..., :C], qkv[..., C:2 * C], qkv[..., 2 * C:]
    q = q.reshape(B, S, heads, hd).transpose(0, 2, 1, 3) / jnp.sqrt(hd)
    k = k.reshape(B, S, heads, hd).transpose(0, 2, 1, 3)
    v = v.reshape(B, S, heads, hd).transpose(0, 2, 1, 3)
    att = jax.nn.softmax(q @ jnp.swapaxes(k, -1, -2), axis=-1)
    o = (att @ v).transpose(0, 2, 1, 3).reshape(B, S, C)
    o = o @ params["out_proj_weight"].T + params["out_proj_bias"]
    y = jnp.transpose((o + x_flat).reshape(B, H, W, C), (0, 3, 1, 2))
    mean = y.mean(-1, keepdims=True)
    var = ((y - mean) ** 2).mean(-1, keepdims=True)
    return (y - mean) / jnp.sqrt(var + eps) * params["ln_weight"] \
        + params["ln_bias"]


# ---------------------------------- main ------------------------------------ #
if __name__ == "__main__":
    B, C, H, W, heads = 2, 16, 8, 16, 8   # dim = C = 16; W must equal dim
    key = jax.random.PRNGKey(0)
    kx, k1, k2, k3, k4, k5, k6 = jax.random.split(key, 7)

    x = jax.random.normal(kx, (B, C, H, W), jnp.float32)

    params = {
        "in_proj_weight": 0.1 * jax.random.normal(k1, (3 * C, C), jnp.float32),
        "in_proj_bias": 0.1 * jax.random.normal(k2, (3 * C,), jnp.float32),
        "out_proj_weight": 0.1 * jax.random.normal(k3, (C, C), jnp.float32),
        "out_proj_bias": 0.1 * jax.random.normal(k4, (C,), jnp.float32),
        "ln_weight": 1.0 + 0.1 * jax.random.normal(k5, (C,), jnp.float32),
        "ln_bias": 0.1 * jax.random.normal(k6, (C,), jnp.float32),
    }

    fn = jax.jit(functools.partial(attention_block, heads=heads))
    out = jax.block_until_ready(fn(x, params))

    ref = attention_block_ref(x, params, heads)
    assert out.shape == (B, C, H, W)
    # bf16 matmul operands (f32 accumulation) -> compare at bf16-appropriate tol
    assert jnp.allclose(out, ref, rtol=2e-2, atol=2e-2), "mismatch vs reference"

    print("KERNEL_OK")
</pallas_src>

<mosaic_0001>
module attributes {stable_mosaic.version = 11 : i64} {
  func.func @_attn_ln_kernel(%arg0: i32, %arg1: memref<1x16x128xf32, #tpu.memory_space<vmem>>, %arg2: memref<48x16xbf16, #tpu.memory_space<vmem>>, %arg3: memref<48x1xf32, #tpu.memory_space<vmem>>, %arg4: memref<16x16xbf16, #tpu.memory_space<vmem>>, %arg5: memref<16x1xf32, #tpu.memory_space<vmem>>, %arg6: memref<1x128xf32, #tpu.memory_space<vmem>>, %arg7: memref<1x128xf32, #tpu.memory_space<vmem>>, %arg8: memref<128x128xf32, #tpu.memory_space<vmem>>, %arg9: memref<1x16x128xf32, #tpu.memory_space<vmem>>) attributes {dimension_semantics = [#tpu.dimension_semantics<parallel>], iteration_bounds = array<i64: 2>, scalar_prefetch = 0 : i64, scratch_operands = 0 : i64, tpu.core_type = #tpu.core_type<tc>, window_params = [{transform_indices = @transform_0, window_bounds = array<i64: 1, 16, 128>}, {pipeline_mode = #tpu.pipeline_mode<synchronous>, transform_indices = @transform_1, window_bounds = array<i64: 48, 16>}, {pipeline_mode = #tpu.pipeline_mode<synchronous>, transform_indices = @transform_2, window_bounds = array<i64: 48, 1>}, {pipeline_mode = #tpu.pipeline_mode<synchronous>, transform_indices = @transform_3, window_bounds = array<i64: 16, 16>}, {pipeline_mode = #tpu.pipeline_mode<synchronous>, transform_indices = @transform_4, window_bounds = array<i64: 16, 1>}, {pipeline_mode = #tpu.pipeline_mode<synchronous>, transform_indices = @transform_5, window_bounds = array<i64: 1, 128>}, {pipeline_mode = #tpu.pipeline_mode<synchronous>, transform_indices = @transform_6, window_bounds = array<i64: 1, 128>}, {pipeline_mode = #tpu.pipeline_mode<synchronous>, transform_indices = @transform_7, window_bounds = array<i64: 128, 128>}, {transform_indices = @transform_8, window_bounds = array<i64: 1, 16, 128>}]} {
    %c0 = arith.constant 0 : index
    %c0_0 = arith.constant 0 : index
    %c0_1 = arith.constant 0 : index
    %0 = vector.load %arg1[%c0, %c0_0, %c0_1] : memref<1x16x128xf32, #tpu.memory_space<vmem>>, vector<1x16x128xf32>
    %1 = vector.shape_cast %0 : vector<1x16x128xf32> to vector<16x128xf32>
    %2 = arith.truncf %1 : vector<16x128xf32> to vector<16x128xbf16>
    %c0_2 = arith.constant 0 : index
    %c0_3 = arith.constant 0 : index
    %3 = vector.load %arg2[%c0_2, %c0_3] : memref<48x16xbf16, #tpu.memory_space<vmem>>, vector<48x16xbf16>
    %cst = arith.constant dense<0.000000e+00> : vector<48x128xf32>
    %4 = tpu.matmul %3, %2, %cst {dimension_numbers = #tpu.dot_dimension_numbers<[1], [0], [0], [1], [0, 0, 1, 1], [], []>} : vector<48x16xbf16>, vector<16x128xbf16>, vector<48x128xf32> -> vector<48x128xf32>
    %c0_4 = arith.constant 0 : index
    %c0_5 = arith.constant 0 : index
    %5 = vector.load %arg3[%c0_4, %c0_5] : memref<48x1xf32, #tpu.memory_space<vmem>>, vector<48x1xf32>
    %6 = vector.broadcast %5 : vector<48x1xf32> to vector<48x128xf32>
    %7 = arith.addf %4, %6 : vector<48x128xf32>
    %8 = vector.extract_strided_slice %7 {offsets = [0, 0], sizes = [16, 128], strides = [1, 1]} : vector<48x128xf32> to vector<16x128xf32>
    %cst_6 = arith.constant 0.707106769 : f32
    %9 = vector.broadcast %cst_6 : f32 to vector<16x128xf32>
    %10 = arith.mulf %8, %9 : vector<16x128xf32>
    %11 = arith.truncf %10 : vector<16x128xf32> to vector<16x128xbf16>
    %12 = vector.extract_strided_slice %7 {offsets = [16, 0], sizes = [16, 128], strides = [1, 1]} : vector<48x128xf32> to vector<16x128xf32>
    %13 = arith.truncf %12 : vector<16x128xf32> to vector<16x128xbf16>
    %14 = vector.extract_strided_slice %7 {offsets = [32, 0], sizes = [16, 128], strides = [1, 1]} : vector<48x128xf32> to vector<16x128xf32>
    %15 = arith.truncf %14 : vector<16x128xf32> to vector<16x128xbf16>
    %16 = vector.shape_cast %11 : vector<16x128xbf16> to vector<8x2x128xbf16>
    %17 = vector.shape_cast %13 : vector<16x128xbf16> to vector<8x2x128xbf16>
    %18 = vector.shape_cast %15 : vector<16x128xbf16> to vector<8x2x128xbf16>
    "tpu.trace_start"() <{level = 10 : i32, message = "hdq,hdk->hqk"}> : () -> ()
    %cst_7 = arith.constant dense<0.000000e+00> : vector<8x128x128xf32>
    %19 = tpu.matmul %16, %17, %cst_7 {dimension_numbers = #tpu.dot_dimension_numbers<[1], [1], [2], [2], [0, 0, 0, 2, 1, 2], [0], [0]>} : vector<8x2x128xbf16>, vector<8x2x128xbf16>, vector<8x128x128xf32> -> vector<8x128x128xf32>
    "tpu.trace_stop"() : () -> ()
    %cst_8 = arith.constant dense<0xFF800000> : vector<8x128xf32>
    %20 = vector.multi_reduction <maximumf>, %19, %cst_8 [2] : vector<8x128x128xf32> to vector<8x128xf32>
    %21 = vector.shape_cast %20 : vector<8x128xf32> to vector<8x128x1xf32>
    %22 = vector.broadcast %21 : vector<8x128x1xf32> to vector<8x128x128xf32>
    %23 = arith.subf %19, %22 : vector<8x128x128xf32>
    %24 = math.exp %23 : vector<8x128x128xf32>
    %cst_9 = arith.constant dense<0.000000e+00> : vector<8x128xf32>
    %25 = vector.multi_reduction <add>, %24, %cst_9 [2] : vector<8x128x128xf32> to vector<8x128xf32>
    %26 = vector.shape_cast %25 : vector<8x128xf32> to vector<8x128x1xf32>
    %27 = tpu.reciprocal %26 {approx = true} : vector<8x128x1xf32> -> vector<8x128x1xf32>
    %28 = vector.broadcast %27 : vector<8x128x1xf32> to vector<8x128x128xf32>
    %29 = arith.mulf %24, %28 : vector<8x128x128xf32>
    %30 = arith.truncf %29 : vector<8x128x128xf32> to vector<8x128x128xbf16>
    "tpu.trace_start"() <{level = 10 : i32, message = "hdk,hqk->hdq"}> : () -> ()
    %cst_10 = arith.constant dense<0.000000e+00> : vector<8x2x128xf32>
    %31 = tpu.matmul %18, %30, %cst_10 {dimension_numbers = #tpu.dot_dimension_numbers<[2], [2], [1], [1], [0, 0, 0, 1, 1, 1], [0], [0]>} : vector<8x2x128xbf16>, vector<8x128x128xbf16>, vector<8x2x128xf32> -> vector<8x2x128xf32>
    "tpu.trace_stop"() : () -> ()
    %32 = vector.shape_cast %31 : vector<8x2x128xf32> to vector<16x128xf32>
    %33 = arith.truncf %32 : vector<16x128xf32> to vector<16x128xbf16>
    %c0_11 = arith.constant 0 : index
    %c0_12 = arith.constant 0 : index
    %34 = vector.load %arg4[%c0_11, %c0_12] : memref<16x16xbf16, #tpu.memory_space<vmem>>, vector<16x16xbf16>
    %cst_13 = arith.constant dense<0.000000e+00> : vector<16x128xf32>
    %35 = tpu.matmul %34, %33, %cst_13 {dimension_numbers = #tpu.dot_dimension_numbers<[1], [0], [0], [1], [0, 0, 1, 1], [], []>} : vector<16x16xbf16>, vector<16x128xbf16>, vector<16x128xf32> -> vector<16x128xf32>
    %c0_14 = arith.constant 0 : index
    %c0_15 = arith.constant 0 : index
    %36 = vector.load %arg5[%c0_14, %c0_15] : memref<16x1xf32, #tpu.memory_space<vmem>>, vector<16x1xf32>
    %37 = vector.broadcast %36 : vector<16x1xf32> to vector<16x128xf32>
    %38 = arith.addf %35, %37 : vector<16x128xf32>
    %39 = arith.addf %38, %1 : vector<16x128xf32>
    %c0_16 = arith.constant 0 : index
    %c0_17 = arith.constant 0 : index
    %40 = vector.load %arg8[%c0_16, %c0_17] : memref<128x128xf32, #tpu.memory_space<vmem>>, vector<128x128xf32>
    %cst_18 = arith.constant dense<0.000000e+00> : vector<16x128xf32>
    %41 = tpu.matmul %39, %40, %cst_18 {dimension_numbers = #tpu.dot_dimension_numbers<[1], [0], [0], [1], [0, 0, 1, 1], [], []>} : vector<16x128xf32>, vector<128x128xf32>, vector<16x128xf32> -> vector<16x128xf32>
    %42 = arith.mulf %39, %39 : vector<16x128xf32>
    %c0_19 = arith.constant 0 : index
    %c0_20 = arith.constant 0 : index
    %43 = vector.load %arg8[%c0_19, %c0_20] : memref<128x128xf32, #tpu.memory_space<vmem>>, vector<128x128xf32>
    %cst_21 = arith.constant dense<0.000000e+00> : vector<16x128xf32>
    %44 = tpu.matmul %42, %43, %cst_21 {dimension_numbers = #tpu.dot_dimension_numbers<[1], [0], [0], [1], [0, 0, 1, 1], [], []>} : vector<16x128xf32>, vector<128x128xf32>, vector<16x128xf32> -> vector<16x128xf32>
    %45 = arith.mulf %41, %41 : vector<16x128xf32>
    %46 = arith.subf %44, %45 : vector<16x128xf32>
    %cst_22 = arith.constant 9.99999974E-6 : f32
    %47 = vector.broadcast %cst_22 : f32 to vector<16x128xf32>
    %48 = arith.addf %46, %47 : vector<16x128xf32>
    %49 = math.rsqrt %48 : vector<16x128xf32>
    %50 = arith.subf %39, %41 : vector<16x128xf32>
    %51 = arith.mulf %50, %49 : vector<16x128xf32>
    %c0_23 = arith.constant 0 : index
    %c0_24 = arith.constant 0 : index
    %52 = vector.load %arg6[%c0_23, %c0_24] : memref<1x128xf32, #tpu.memory_space<vmem>>, vector<1x128xf32>
    %53 = vector.broadcast %52 : vector<1x128xf32> to vector<16x128xf32>
    %54 = arith.mulf %51, %53 : vector<16x128xf32>
    %c0_25 = arith.constant 0 : index
    %c0_26 = arith.constant 0 : index
    %55 = vector.load %arg7[%c0_25, %c0_26] : memref<1x128xf32, #tpu.memory_space<vmem>>, vector<1x128xf32>
    %56 = vector.broadcast %55 : vector<1x128xf32> to vector<16x128xf32>
    %57 = arith.addf %54, %56 : vector<16x128xf32>
    %c0_27 = arith.constant 0 : index
    %c0_28 = arith.constant 0 : index
    %c0_29 = arith.constant 0 : index
    %58 = vector.load %arg9[%c0_27, %c0_28, %c0_29] : memref<1x16x128xf32, #tpu.memory_space<vmem>>, vector<1x16x128xf32>
    %59 = vector.shape_cast %58 : vector<1x16x128xf32> to vector<16x128xf32>
    %60 = vector.shape_cast %57 : vector<16x128xf32> to vector<1x16x128xf32>
    tpu.vector_store %arg9[%c0_27, %c0_28, %c0_29], %60 {strides = array<i32>} : memref<1x16x128xf32, #tpu.memory_space<vmem>>, vector<1x16x128xf32>,
    return
  }
  func.func @transform_0(%arg0: i32) -> (i32, i32, i32) {
    %c0_i32 = arith.constant 0 : i32
    %c0_i32_0 = arith.constant 0 : i32
    %c0_i32_1 = arith.constant 0 : i32
    return %arg0, %c0_i32, %c0_i32_0 : i32, i32, i32
  }
  func.func @transform_1(%arg0: i32) -> (i32, i32) {
    %c0_i32 = arith.constant 0 : i32
    %c0_i32_0 = arith.constant 0 : i32
    %c0_i32_1 = arith.constant 0 : i32
    return %c0_i32, %c0_i32_0 : i32, i32
  }
  func.func @transform_2(%arg0: i32) -> (i32, i32) {
    %c0_i32 = arith.constant 0 : i32
    %c0_i32_0 = arith.constant 0 : i32
    %c0_i32_1 = arith.constant 0 : i32
    return %c0_i32, %c0_i32_0 : i32, i32
  }
  func.func @transform_3(%arg0: i32) -> (i32, i32) {
    %c0_i32 = arith.constant 0 : i32
    %c0_i32_0 = arith.constant 0 : i32
    %c0_i32_1 = arith.constant 0 : i32
    return %c0_i32, %c0_i32_0 : i32, i32
  }
  func.func @transform_4(%arg0: i32) -> (i32, i32) {
    %c0_i32 = arith.constant 0 : i32
    %c0_i32_0 = arith.constant 0 : i32
    %c0_i32_1 = arith.constant 0 : i32
    return %c0_i32, %c0_i32_0 : i32, i32
  }
  func.func @transform_5(%arg0: i32) -> (i32, i32) {
    %c0_i32 = arith.constant 0 : i32
    %c0_i32_0 = arith.constant 0 : i32
    %c0_i32_1 = arith.constant 0 : i32
    return %c0_i32, %c0_i32_0 : i32, i32
  }
  func.func @transform_6(%arg0: i32) -> (i32, i32) {
    %c0_i32 = arith.constant 0 : i32
    %c0_i32_0 = arith.constant 0 : i32
    %c0_i32_1 = arith.constant 0 : i32
    return %c0_i32, %c0_i32_0 : i32, i32
  }
  func.func @transform_7(%arg0: i32) -> (i32, i32) {
    %c0_i32 = arith.constant 0 : i32
    %c0_i32_0 = arith.constant 0 : i32
    %c0_i32_1 = arith.constant 0 : i32
    return %c0_i32, %c0_i32_0 : i32, i32
  }
  func.func @transform_8(%arg0: i32) -> (i32, i32, i32) {
    %c0_i32 = arith.constant 0 : i32
    %c0_i32_0 = arith.constant 0 : i32
    %c0_i32_1 = arith.constant 0 : i32
    return %arg0, %c0_i32, %c0_i32_0 : i32, i32, i32
  }
}

</mosaic_0001>

<bundles_post_ra>
// kernel: tile.18
= control target key start
LH: loop header
LB: loop body
LE: loop exit
PB: predicated region body
PF: predicated region fallthrough
CT: control target
= control target key end

     0   :  { %s22_s0 = inlined_call_operand.vmem [shape: f32[16], index: 0, kind: input, shape index: {}]   ;;  %s23_s1 = inlined_call_operand.vmem [shape: f32[8,16], index: 1, kind: output, shape index: {}]  }
   0x1   :  { %v4_v0 = vld [vmem:[%s22_s0] ss:$0 sm:$0xff] }
   0x2   :  { %5 = vst [vmem:[%s23_s1] sm:$0xff] %v4_v0 }

// kernel: tile.19
= control target key start
LH: loop header
LB: loop body
LE: loop exit
PB: predicated region body
PF: predicated region fallthrough
CT: control target
= control target key end

     0   :  { %s67_s10 = smov 112   ;;  %s68_s11 = smov 80   ;;  %vm3_vm0 = vcmask 130048   ;;  %vm9_vm1 = vcmask 1048448   ;;  %vm15_vm2 = vcmask 917248   ;;  %vm21_vm3 = vcmask 786048   ;;  %s111_s0 = inlined_call_operand.vmem [shape: f32[8,16], index: 0, kind: input, shape index: {}]   ;;  %s112_s1 = inlined_call_operand.vmem [shape: f32[1,128], index: 1, kind: output, shape index: {}]  }
   0x1   :  { %v53_v0 = vld [vmem:[%s111_s0 + $0x7] sm:$0x1]   ;;  %v55_v1 = vld [vmem:[%s111_s0 + $0x5] sm:$0x1]   ;;  %v54_v2 = vld [vmem:[%s111_s0 + $0x6] sm:$0x1]  }
   0x2   :  { %7 = vrot.lane.b32.xlu0 %v53_v0, %s67_s10  ;;  %19 = vrot.lane.b32.xlu1 %v55_v1, %s68_s11  ;;  %v56_v3 = vld [vmem:[%s111_s0 + $0x4] sm:$0x1]   ;;  %v2_v4 = vld [vmem:[%s111_s0] sm:$0x1]   ;;  %s69_s18 = smov 96   ;;  %s70_s19 = smov 64  }
   0x3   :  { %4 = vst.msk [vmem:[#allocation0] sm:$0x1] %vm3_vm0, %v2_v4   ;;  %v57_v5 = vld [vmem:[%s111_s0 + $0x3] sm:$0x1]   ;;  %v58_v6 = vld [vmem:[%s111_s0 + $0x2] sm:$0x1]  }
   0x4   :  { %s71_s24 = smov 48   ;;  %s72_s25 = smov 32   ;;  %v59_v7 = vld [vmem:[%s111_s0 + $0x1] sm:$0x1]   ;;  %vm27_vm4 = vcmask 654848   ;;  %vm33_vm5 = vcmask 523648  }
   0x5   :  { %s73_s0 = smov 16   ;;  %vm39_vm6 = vcmask 392448   ;;  %vm45_vm7 = vcmask 261248  }
   0x6   :  { %13 = vrot.lane.b32.xlu0 %v54_v2, %s69_s18  ;;  %25 = vrot.lane.b32.xlu1 %v56_v3, %s70_s19 }
   0xa   :  { %31 = vrot.lane.b32.xlu0 %v57_v5, %s71_s24  ;;  %37 = vrot.lane.b32.xlu1 %v58_v6, %s72_s25 }
   0xe   :  { %43 = vrot.lane.b32.xlu0 %v59_v7, %s73_s0 }
  0x74   :  { %v8_v8 = vpop.permute.xlu0 %7   ;;  %v20_v9 = vpop.permute.xlu1 %19  }
  0x75   :  { %10 = vst.msk [vmem:[#allocation0] sm:$0x1] %vm9_vm1, %v8_v8  }
  0x78   :  { %v14_v10 = vpop.permute.xlu0 %13   ;;  %v26_v11 = vpop.permute.xlu1 %25  }
  0x79   :  { %16 = vst.msk [vmem:[#allocation0] sm:$0x1] %vm15_vm2, %v14_v10  }
  0x7a   :  { %22 = vst.msk [vmem:[#allocation0] sm:$0x1] %vm21_vm3, %v20_v9  }
  0x7b   :  { %28 = vst.msk [vmem:[#allocation0] sm:$0x1] %vm27_vm4, %v26_v11  }
  0x7c   :  { %v32_v12 = vpop.permute.xlu0 %31   ;;  %v38_v13 = vpop.permute.xlu1 %37  }
  0x7d   :  { %34 = vst.msk [vmem:[#allocation0] sm:$0x1] %vm33_vm5, %v32_v12  }
  0x7e   :  { %40 = vst.msk [vmem:[#allocation0] sm:$0x1] %vm39_vm6, %v38_v13  }
  0x80   :  { %v44_v14 = vpop.permute.xlu0 %43  }
  0x81   :  { %46 = vst.msk [vmem:[#allocation0] sm:$0x1] %vm45_vm7, %v44_v14  }
  0x88   :  { %v50_v15 = vld [vmem:[#allocation0] sm:$0x1] }
  0x89   :  { %52 = vst [vmem:[%s112_s1] sm:$0x1] %v50_v15 }

// kernel: attention_block.1
= control target key start
LH: loop header
LB: loop body
LE: loop exit
PB: predicated region body
PF: predicated region fallthrough
CT: control target
= control target key end

     0   :  { %s4967_s27 = smov 0   ;;  %s7108_s0 = inlined_call_operand.vmem [shape: f32[2,16,128], index: 0, kind: input, shape index: {}]   ;;  %s7109_s1 = inlined_call_operand.vmem [shape: bf16[48,16], index: 1, kind: input, shape index: {}]   ;;  %s7110_s2 = inlined_call_operand.vmem [shape: f32[48,1], index: 2, kind: input, shape index: {}]   ;;  %s7111_s3 = inlined_call_operand.vmem [shape: bf16[16,16], index: 3, kind: input, shape index: {}]   ;;  %s7112_s4 = inlined_call_operand.vmem [shape: f32[16,1], index: 4, kind: input, shape index: {}]   ;;  %s7113_s5 = inlined_call_operand.vmem [shape: f32[1,128], index: 5, kind: input, shape index: {}]   ;;  %s7114_s6 = inlined_call_operand.vmem [shape: f32[1,128], index: 6, kind: input, shape index: {}]   ;;  %s7115_s7 = inlined_call_operand.vmem [shape: f32[128,128], index: 7, kind: input, shape index: {}]   ;;  %s7116_s8 = inlined_call_operand.vmem [shape: f32[2,16,128], index: 8, kind: output, shape index: {}]  }
   0x1 LB: > { %s3628_s28 = sadd.s32 4294967295, %s4915_s27   ;;  %p3632_p0 = scmp.ge.s32.totalorder %s4915_s27, 1  ;;  %s4915_s27 = sphi %s4967_s27, %s18_s27  }
   0x2   : > { %p262_p1 = scmp.lt.s32.totalorder %s4915_s27, 3 }
   0x4   : > { %p263_p2 = pnand %p3632_p0, %p262_p1 }
   0x6   : > { %266 = sbr.rel (%p263_p2) target bundleno = 1984 (0x7c0), region = 52 }
   0xd   : > { %p296_p3 = scmp.lt.s32.totalorder %s3628_s28, 1  ;;  %v7117_v0 = vmov 0.0   ;;  %vm4918_vm0 = vmmov 0   ;;  %v316_v1 = vld [vmem:[%s7110_s2] sm:$0xff]  ;;  %v318_v2 = vld [vmem:[%s7110_s2 + $0x10] sm:$0xff]  ;;  %v4919_v3 = vmov 0   ;;  %v444_v20 = vlaneseq }
   0xe   : > { %3904 = vmatprep.subr.bf16.mxu0 %v7117_v0  ;;  %4362 = vmatprep.subr.bf16.mxu1 %v7117_v0  ;;  %v317_v4 = vld [vmem:[%s7110_s2 + $0x8] sm:$0xff]  ;;  %v319_v5 = vld [vmem:[%s7110_s2 + $0x18] sm:$0xff]  ;;  %v4387_v9 = vld [vmem:[%s7109_s1] sm:$0xff]   ;;  %vm367_vm1 = vcmask 130048   ;;  %v4920_v18 = vmov 1966171168  }
   0xf   : > { %s8203_s28 = smov (!%p296_p3, %s3628_s28), 1  ;;  %3906 = vmatprep.mubr.msk.bf16.mxu0 %vm4918_vm0, %v7117_v0  ;;  %3914 = vmatprep.mubr.msk.bf16.mxu1 %vm4918_vm0, %v7117_v0  ;;  %v4388_v10 = vld [vmem:[%s7109_s1 + $0x10] sm:$0xff]   ;;  %v321_v11 = vld [vmem:[%s7110_s2 + $0x28] sm:$0xff]  ;;  %v320_v12 = vld [vmem:[%s7110_s2 + $0x20] sm:$0xff]  ;;  %v442_v19 = vunpack.c.l.s4 %v4920_v18  ;;  %v5025_v24 = vshrl.u32 %v444_v20, 7  ;;  %vm646_vm2 = vcmask 1040384  }
  0x10   : > { %4385 = vset.pattern.permute.xlu0 %v4919_v3  ;;  %4386 = vset.pattern.permute.xlu1 %v4919_v3  ;;  %s3716_s11 = sshll.u32 %s8203_s28, 4  ;;  %v4389_v13 = vld [vmem:[%s7109_s1 + $0x8] sm:$0xff]   ;;  %vm621_vm3 = vcmask 15360  }
  0x11   : > { %324 = vperm.xlu0 %4385, %v316_v1   ;;  %334 = vperm.xlu1 %4386, %v318_v2   ;;  %s4998_s16 = scalar_lea.vmem %s7108_s0, %s3716_s11  ;;  %v443_v23 = vunpack.c.0.s8 %v442_v19  ;;  %7478 = vst [vmem:[#allocation2_spill] sm:$0xff] %v5025_v24  ;;  %s305_s18 = scalar_lea.vmem %s7116_s8, %s3716_s11 }
  0x12   : > { %v307_v6 = vld [vmem:[%s4998_s16] sm:$0xff]  ;;  %v308_v7 = vld [vmem:[%s4998_s16 + $0x8] sm:$0xff] }
  0x13   : > { %v309_v8 = vpack.c.bf16 %v308_v7, %v307_v6  ;;  %v446_v34 = vsub.s32 %v443_v23, %v5025_v24 }
  0x15   : > { %329 = vperm.xlu0 %4385, %v317_v4   ;;  %339 = vperm.xlu1 %4386, %v319_v5  }
  0x16   : > { %3905 = vmatpush3.bf16.msra.mxu0 %v309_v8  ;;  %4363 = vmatpush3.bf16.msra.mxu1 %v309_v8 }
  0x19   : > { %3907 = vmatmul.mubr.msk.bf16.vlgmr.msra.gmra.mrb[0].mxu0 %vm367_vm1, %v4387_v9  ;;  %3915 = vmatmul.mubr.msk.bf16.vlgmr.msra.gmra.mrb[0].mxu1 %vm367_vm1, %v4388_v10 }
  0x1a   : > { %349 = vperm.xlu0 %4385, %v321_v11   ;;  %344 = vperm.xlu1 %4386, %v320_v12  }
  0x1b   : > { %3910 = vmatprep.mubr.msk.bf16.mxu0 %vm4918_vm0, %v7117_v0 }
  0x21   : > { %3911 = vmatmul.mubr.msk.bf16.gmra.mrb[4].mxu0 %vm367_vm1, %v4389_v13 }
  0x90   : > { %v335_v14 = vpop.permute.xlu1 %334  ;;  %v325_v15 = vpop.permute.xlu0 %324 }
  0x94   : > { %v340_v16 = vpop.permute.xlu1 %339  ;;  %v330_v17 = vpop.permute.xlu0 %329 }
  0x99   : > { %v345_v21 = vpop.permute.xlu1 %344  ;;  %v350_v22 = vpop.permute.xlu0 %349 }
  0xec   : > { %v411_v25 = vpop.f32.mrb[0].mxu0  ;;  %v427_v26 = vpop.f32.mrb[0].mxu1 }
  0xed   : > { %v412_v27 = vadd.f32 %v411_v25, %v325_v15  ;;  %v3908_v28 = vpop.f32.mrb[1].mxu0  ;;  %v3916_v29 = vpop.f32.mrb[1].mxu1  ;;  %v428_v30 = vadd.f32 %v427_v26, %v345_v21 }
  0xee   : > { %v414_v31 = vpop.f32.mrb[2].mxu0  ;;  %v430_v32 = vpop.f32.mrb[2].mxu1 }
  0xef   : > { %v415_v33 = vadd.f32 %v414_v31, %v330_v17  ;;  %v431_v35 = vadd.f32 %v430_v32, %v350_v22  ;;  %v3909_v36 = vpop.f32.mrb[3].mxu0  ;;  %v3917_v37 = vpop.f32.mrb[3].mxu1  ;;  %v434_v38 = vmul.f32 0.70710677, %v412_v27 }
  0xf1   : > { %v435_v39 = vmul.f32 0.70710677, %v415_v33  ;;  %v438_v40 = vpack.c.bf16 %v431_v35, %v428_v30  ;;  %v3645_v41 = vpack.c.bf16 %v431_v35, %v431_v35 }
  0xf3   : > { %v436_v42 = vpack.c.bf16 %v435_v39, %v434_v38  ;;  %v555_v43 = vrot.slane %v438_v40, %v446_v34  ;;  %v562_v44 = vrot.slane %v3645_v41, %v446_v34  ;;  %v3643_v12 = vpack.c.bf16 %v435_v39, %v435_v39 }
  0xf4   : > { %v419_v45 = vpop.f32.mrb[4].mxu0 }
  0xf5   : > { %v447_v46 = vrot.slane %v436_v42, %v446_v34  ;;  %v563_v47 = vcombine.high %v555_v43, %v555_v43  ;;  %v564_v48 = vcombine.high %v562_v44, %v562_v44  ;;  %v3912_v49 = vpop.f32.mrb[5].mxu0  ;;  %v5028_v50 = vrot.slane %v555_v43, %v446_v34 }
  0xf6   : > { %v5030_v51 = vrot.slane %v562_v44, %v446_v34  ;;  %v420_v52 = vadd.f32 %v419_v45, %v335_v14  ;;  %v422_v53 = vpop.f32.mrb[6].mxu0  ;;  %v454_v13 = vrot.slane %v3643_v12, %v446_v34 }
  0xf7   : > { %7479 = vst [vmem:[#allocation3_spill] sm:$0xff] %v5028_v50  ;;  %v5032_v54 = vrot.slane %v563_v47, %v446_v34  ;;  %v463_v55 = vrot.slane %v447_v46, %v446_v34  ;;  %v455_v56 = vcombine.high %v447_v46, %v447_v46  ;;  %v3913_v57 = vpop.f32.mrb[7].mxu0  ;;  %v423_v58 = vadd.f32 %v422_v53, %v340_v16 }
  0xf8   : > { %7480 = vst [vmem:[#allocation4_spill] sm:$0xff] %v5030_v51  ;;  %v5034_v59 = vrot.slane %v564_v48, %v446_v34  ;;  %v456_v14 = vcombine.high %v454_v13, %v454_v13  ;;  %v470_v15 = vrot.slane %v454_v13, %v446_v34 }
  0xf9   : > { %7481 = vst [vmem:[#allocation5_spill] sm:$0xff] %v5032_v54  ;;  %605 = vxpose.xlu0.c.b16.start.end [1/1] (short) %v463_v55, 128  ;;  %v477_v60 = vrot.slane %v455_v56, %v446_v34  ;;  %v437_v61 = vpack.c.bf16 %v423_v58, %v420_v52  ;;  %v3644_v62 = vpack.c.bf16 %v423_v58, %v423_v58 }
  0xfa   : > { %7482 = vst [vmem:[#allocation6_spill] sm:$0xff] %v5034_v59  ;;  %v484_v16 = vrot.slane %v456_v14, %v446_v34  ;;  %v485_v17 = vcombine.high %v463_v55, %v463_v55  ;;  %v486_v19 = vcombine.high %v470_v15, %v470_v15 }
  0xfb   : > { %747 = vxpose.xlu1.c.b16.start.end [1/1] (short) %v477_v60, 128  ;;  %v505_v63 = vrot.slane %v437_v61, %v446_v34  ;;  %v512_v1 = vrot.slane %v3644_v62, %v446_v34  ;;  %v487_v18 = vcombine.high %v477_v60, %v477_v60 }
  0xfc   : > { %v488_v20 = vcombine.high %v484_v16, %v484_v16 }
  0xfd   : > { %v513_v2 = vcombine.high %v505_v63, %v505_v63  ;;  %v514_v3 = vcombine.high %v512_v1, %v512_v1  ;;  %v521_v4 = vrot.slane %v505_v63, %v446_v34  ;;  %v5036_v5 = vrot.slane %v512_v1, %v446_v34 }
  0xff   : > { %4364 = vmatprep.subr.msk.bf16.mxu1 %vm646_vm2, %v521_v4  ;;  %v648_v6 = vsel %vm646_vm2, %v521_v4, 0  ;;  %v535_v7 = vrot.slane %v513_v2, %v446_v34  ;;  %v543_v8 = vcombine.high %v521_v4, %v521_v4  ;;  %v5040_v9 = vrot.slane %v514_v3, %v446_v34 }
 0x100   : > { %3919 = vmatpush3.bf16.msra.mxu1 %v648_v6  ;;  %v1208_v63 = vsel %vm646_vm2, %v5036_v5, 0  ;;  %v544_v1 = vcombine.high %v5036_v5, %v5036_v5 }
 0x101   : > { %4365 = vmatprep.subr.msk.bf16.mxu0 %vm646_vm2, %v535_v7  ;;  %4366 = vmatprep.subr.msk.bf16.mxu1 %vm646_vm2, %v543_v8  ;;  %v788_v10 = vsel %vm646_vm2, %v535_v7, 0  ;;  %v545_v11 = vcombine.high %v535_v7, %v535_v7  ;;  %v928_v25 = vsel %vm646_vm2, %v543_v8, 0  ;;  %v1348_v3 = vsel %vm646_vm2, %v5040_v9, 0 }
 0x102   : > { %3937 = vmatpush3.bf16.msra.mxu0 %v788_v10  ;;  %v546_v4 = vcombine.high %v5040_v9, %v5040_v9 }
 0x103   : > { %4367 = vmatprep.subr.msk.bf16.mxu0 %vm646_vm2, %v545_v11  ;;  %v1068_v27 = vsel %vm646_vm2, %v545_v11, 0 }
 0x116   : > { %1167 = vxpose.xlu0.c.b16.start.end [1/1] (short) %v470_v15, 128 }
 0x118   : > { %1307 = vxpose.xlu1.c.b16.start.end [1/1] (short) %v484_v16, 128 }
 0x133   : > { %887 = vxpose.xlu0.c.b16.start.end [1/1] (short) %v485_v17, 128  ;;  %v1488_v17 = vsel %vm646_vm2, %v544_v1, 0 }
 0x135   : > { %1027 = vxpose.xlu1.c.b16.start.end [1/1] (short) %v487_v18, 128  ;;  %v1628_v18 = vsel %vm646_vm2, %v546_v4, 0 }
 0x150   : > { %1447 = vxpose.xlu0.c.b16.start.end [1/1] (short) %v486_v19, 128 }
 0x152   : > { %1587 = vxpose.xlu1.c.b16.start.end [1/1] (short) %v488_v20, 128 }
 0x15f   : > { %v613_v21 = vpop.trf.xlu0 }
 0x160   : > { %3920 = vmatprep.mubr.msk.bf16.mxu1 %vm621_vm3, %v613_v21 }
 0x161   : > { %v755_v22 = vpop.trf.xlu1 }
 0x162   : > { %3938 = vmatprep.mubr.msk.bf16.mxu0 %vm621_vm3, %v755_v22 }
 0x163   : > { %v614_v23 = vpop.trf.xlu0 }
 0x164   : > { %3921 = vmatmul.mubr.msk.bf16.vlgmr.msra.gmra.mrb[4].mxu1 %vm621_vm3, %v614_v23 }
 0x165   : > { %3955 = vmatpush3.bf16.msra.mxu1 %v928_v25  ;;  %v756_v26 = vpop.trf.xlu1 }
 0x166   : > { %4368 = vmatprep.subr.msk.bf16.mxu1 %vm646_vm2, %v5036_v5  ;;  %3939 = vmatmul.mubr.msk.bf16.vlgmr.msra.gmra.mrb[8].mxu0 %vm621_vm3, %v756_v26 }
 0x167   : > { %3973 = vmatpush3.bf16.msra.mxu0 %v1068_v27  ;;  %v615_v28 = vpop.trf.xlu0 }
 0x168   : > { %4369 = vmatprep.subr.msk.bf16.mxu0 %vm646_vm2, %v5040_v9  ;;  %3924 = vmatprep.mubr.msk.bf16.mxu1 %vm621_vm3, %v615_v28 }
 0x169   : > { %v757_v29 = vpop.trf.xlu1 }
 0x16a   : > { %3942 = vmatprep.mubr.msk.bf16.mxu0 %vm621_vm3, %v757_v29 }
 0x16b   : > { %v616_v30 = vpop.trf.xlu0 }
 0x16c   : > { %3925 = vmatmul.mubr.msk.bf16.gmra.mrb[8].mxu1 %vm621_vm3, %v616_v30 }
 0x16d   : > { %v758_v31 = vpop.trf.xlu1 }
 0x16e   : > { %3943 = vmatmul.mubr.msk.bf16.gmra.mrb[12].mxu0 %vm621_vm3, %v758_v31 }
 0x16f   : > { %v617_v32 = vpop.trf.xlu0 }
 0x170   : > { %3928 = vmatprep.mubr.msk.bf16.mxu1 %vm621_vm3, %v617_v32 }
 0x171   : > { %v759_v33 = vpop.trf.xlu1 }
 0x172   : > { %3946 = vmatprep.mubr.msk.bf16.mxu0 %vm621_vm3, %v759_v33 }
 0x173   : > { %v618_v34 = vpop.trf.xlu0 }
 0x174   : > { %3929 = vmatmul.mubr.msk.bf16.gmra.mrb[12].mxu1 %vm621_vm3, %v618_v34 }
 0x175   : > { %v760_v35 = vpop.trf.xlu1 }
 0x176   : > { %3947 = vmatmul.mubr.msk.bf16.gmra.mrb[16].mxu0 %vm621_vm3, %v760_v35 }
 0x177   : > { %v619_v36 = vpop.trf.xlu0 }
 0x178   : > { %3932 = vmatprep.mubr.msk.bf16.mxu1 %vm621_vm3, %v619_v36 }
 0x179   : > { %v761_v37 = vpop.trf.xlu1 }
 0x17a   : > { %3950 = vmatprep.mubr.msk.bf16.mxu0 %vm621_vm3, %v761_v37 }
 0x17b   : > { %v620_v38 = vpop.trf.xlu0 }
 0x17c   : > { %3933 = vmatmul.mubr.msk.bf16.gmra.mrb[16].mxu1 %vm621_vm3, %v620_v38 }
 0x17d   : > { %v762_v39 = vpop.trf.xlu1 }
 0x17e   : > { %3951 = vmatmul.mubr.msk.bf16.gmra.mrb[20].mxu0 %vm621_vm3, %v762_v39 }
 0x17f   : > { %v1175_v40 = vpop.trf.xlu0 }
 0x181   : > { %v1315_v41 = vpop.trf.xlu1 }
 0x183   : > { %v1176_v42 = vpop.trf.xlu0 }
 0x185   : > { %v1316_v43 = vpop.trf.xlu1 }
 0x187   : > { %v1177_v44 = vpop.trf.xlu0 }
 0x189   : > { %v1317_v45 = vpop.trf.xlu1 }
 0x18b   : > { %v1178_v46 = vpop.trf.xlu0 }
 0x18d   : > { %v5068_v47 = vpop.trf.xlu1 }
 0x18f   : > { %v1179_v48 = vpop.trf.xlu0 }
 0x191   : > { %v1319_v49 = vpop.trf.xlu1 }
 0x193   : > { %v1180_v52 = vpop.trf.xlu0 }
 0x195   : > { %v5070_v53 = vpop.trf.xlu1 }
 0x197   : > { %v1181_v55 = vpop.trf.xlu0 }
 0x199   : > { %v5072_v56 = vpop.trf.xlu1 }
 0x19b   : > { %v5074_v57 = vpop.trf.xlu0 }
 0x19d   : > { %v5076_v58 = vpop.trf.xlu1 }
 0x19f   : > { %v895_v60 = vpop.trf.xlu0 }
 0x1a0   : > { %3956 = vmatprep.mubr.msk.bf16.mxu1 %vm621_vm3, %v895_v60 }
 0x1a1   : > { %v1035_v61 = vpop.trf.xlu1 }
 0x1a2   : > { %3974 = vmatprep.mubr.msk.bf16.mxu0 %vm621_vm3, %v1035_v61 }
 0x1a3   : > { %v896_v62 = vpop.trf.xlu0 }
 0x1a4   : > { %3957 = vmatmul.mubr.msk.bf16.vlgmr.msra.gmra.mrb[20].mxu1 %vm621_vm3, %v896_v62 }
 0x1a5   : > { %3991 = vmatpush3.bf16.msra.mxu1 %v1208_v63  ;;  %v1036_v2 = vpop.trf.xlu1 }
 0x1a6   : > { %4370 = vmatprep.subr.msk.bf16.mxu1 %vm646_vm2, %v544_v1  ;;  %3975 = vmatmul.mubr.msk.bf16.vlgmr.msra.gmra.mrb[24].mxu0 %vm621_vm3, %v1036_v2 }
 0x1a7   : > { %4009 = vmatpush3.bf16.msra.mxu0 %v1348_v3  ;;  %v897_v6 = vpop.trf.xlu0 }
 0x1a8   : > { %4371 = vmatprep.subr.msk.bf16.mxu0 %vm646_vm2, %v546_v4  ;;  %3960 = vmatprep.mubr.msk.bf16.mxu1 %vm621_vm3, %v897_v6 }
 0x1a9   : > { %v1037_v7 = vpop.trf.xlu1 }
 0x1aa   : > { %3978 = vmatprep.mubr.msk.bf16.mxu0 %vm621_vm3, %v1037_v7 }
 0x1ab   : > { %v898_v5 = vpop.trf.xlu0 }
 0x1ac   : > { %3961 = vmatmul.mubr.msk.bf16.gmra.mrb[24].mxu1 %vm621_vm3, %v898_v5 }
 0x1ad   : > { %v1038_v8 = vpop.trf.xlu1 }
 0x1ae   : > { %3979 = vmatmul.mubr.msk.bf16.gmra.mrb[28].mxu0 %vm621_vm3, %v1038_v8 }
 0x1af   : > { %v899_v10 = vpop.trf.xlu0 }
 0x1b0   : > { %3964 = vmatprep.mubr.msk.bf16.mxu1 %vm621_vm3, %v899_v10 }
 0x1b1   : > { %v1039_v11 = vpop.trf.xlu1 }
 0x1b2   : > { %3982 = vmatprep.mubr.msk.bf16.mxu0 %vm621_vm3, %v1039_v11 }
 0x1b3   : > { %v900_v9 = vpop.trf.xlu0 }
 0x1b4   : > { %3965 = vmatmul.mubr.msk.bf16.gmra.mrb[28].mxu1 %vm621_vm3, %v900_v9 }
 0x1b5   : > { %v1040_v12 = vpop.trf.xlu1 }
 0x1b6   : > { %3983 = vmatmul.mubr.msk.bf16.gmra.mrb[32].mxu0 %vm621_vm3, %v1040_v12 }
 0x1b7   : > { %v901_v13 = vpop.trf.xlu0 }
 0x1b8   : > { %3968 = vmatprep.mubr.msk.bf16.mxu1 %vm621_vm3, %v901_v13 }
 0x1b9   : > { %v1041_v14 = vpop.trf.xlu1 }
 0x1ba   : > { %3986 = vmatprep.mubr.msk.bf16.mxu0 %vm621_vm3, %v1041_v14 }
 0x1bb   : > { %v902_v15 = vpop.trf.xlu0 }
 0x1bc   : > { %3969 = vmatmul.mubr.msk.bf16.gmra.mrb[32].mxu1 %vm621_vm3, %v902_v15 }
 0x1bd   : > { %v1042_v16 = vpop.trf.xlu1  ;;  %3992 = vmatprep.mubr.msk.bf16.mxu1 %vm621_vm3, %v1175_v40 }
 0x1be   : > { %3987 = vmatmul.mubr.msk.bf16.gmra.mrb[36].mxu0 %vm621_vm3, %v1042_v16 }
 0x1bf   : > { %4010 = vmatprep.mubr.msk.bf16.mxu0 %vm621_vm3, %v1315_v41  ;;  %v1455_v19 = vpop.trf.xlu0 }
 0x1c1   : > { %v1595_v20 = vpop.trf.xlu1 }
 0x1c3   : > { %v1456_v21 = vpop.trf.xlu0 }
 0x1c4   : > { %3993 = vmatmul.mubr.msk.bf16.vlgmr.msra.gmra.mrb[36].mxu1 %vm621_vm3, %v1176_v42 }
 0x1c5   : > { %4027 = vmatpush3.bf16.msra.mxu1 %v1488_v17  ;;  %3996 = vmatprep.mubr.msk.bf16.mxu1 %vm621_vm3, %v1177_v44  ;;  %v1596_v22 = vpop.trf.xlu1 }
 0x1c6   : > { %4011 = vmatmul.mubr.msk.bf16.vlgmr.msra.gmra.mrb[40].mxu0 %vm621_vm3, %v1316_v43  ;;  %4062 = vmatprep.subr.bf16.mxu1 %v7117_v0 }
 0x1c7   : > { %4045 = vmatpush3.bf16.msra.mxu0 %v1628_v18  ;;  %4014 = vmatprep.mubr.msk.bf16.mxu0 %vm621_vm3, %v1317_v45  ;;  %v1457_v23 = vpop.trf.xlu0 }
 0x1c8   : > { %4082 = vmatprep.subr.bf16.mxu0 %v7117_v0 }
 0x1c9   : > { %v1597_v25 = vpop.trf.xlu1 }
 0x1cb   : > { %v1458_v26 = vpop.trf.xlu0 }
 0x1cc   : > { %3997 = vmatmul.mubr.msk.bf16.gmra.mrb[40].mxu1 %vm621_vm3, %v1178_v46 }
 0x1cd   : > { %4000 = vmatprep.mubr.msk.bf16.mxu1 %vm621_vm3, %v1179_v48  ;;  %v1598_v27 = vpop.trf.xlu1 }
 0x1ce   : > { %4015 = vmatmul.mubr.msk.bf16.gmra.mrb[44].mxu0 %vm621_vm3, %v5068_v47 }
 0x1cf   : > { %4018 = vmatprep.mubr.msk.bf16.mxu0 %vm621_vm3, %v1319_v49  ;;  %v1459_v28 = vpop.trf.xlu0 }
 0x1d1   : > { %v1599_v29 = vpop.trf.xlu1 }
 0x1d3   : > { %v1460_v30 = vpop.trf.xlu0 }
 0x1d4   : > { %4001 = vmatmul.mubr.msk.bf16.gmra.mrb[44].mxu1 %vm621_vm3, %v1180_v52 }
 0x1d5   : > { %4004 = vmatprep.mubr.msk.bf16.mxu1 %vm621_vm3, %v1181_v55  ;;  %v1600_v31 = vpop.trf.xlu1 }
 0x1d6   : > { %4019 = vmatmul.mubr.msk.bf16.gmra.mrb[48].mxu0 %vm621_vm3, %v5070_v53 }
 0x1d7   : > { %4022 = vmatprep.mubr.msk.bf16.mxu0 %vm621_vm3, %v5072_v56  ;;  %v1461_v32 = vpop.trf.xlu0 }
 0x1d9   : > { %v1601_v33 = vpop.trf.xlu1 }
 0x1db   : > { %v1462_v34 = vpop.trf.xlu0 }
 0x1dc   : > { %4005 = vmatmul.mubr.msk.bf16.gmra.mrb[48].mxu1 %vm621_vm3, %v5074_v57 }
 0x1dd   : > { %4028 = vmatprep.mubr.msk.bf16.mxu1 %vm621_vm3, %v1455_v19  ;;  %v1602_v35 = vpop.trf.xlu1 }
 0x1de   : > { %4023 = vmatmul.mubr.msk.bf16.gmra.mrb[52].mxu0 %vm621_vm3, %v5076_v58 }
 0x1df   : > { %4046 = vmatprep.mubr.msk.bf16.mxu0 %vm621_vm3, %v1595_v20 }
 0x1e4   : > { %4029 = vmatmul.mubr.msk.bf16.vlgmr.msra.gmra.mrb[52].mxu1 %vm621_vm3, %v1456_v21 }
 0x1e5   : > { %4032 = vmatprep.mubr.msk.bf16.mxu1 %vm621_vm3, %v1457_v23 }
 0x1e6   : > { %4047 = vmatmul.mubr.msk.bf16.vlgmr.msra.gmra.mrb[56].mxu0 %vm621_vm3, %v1596_v22 }
 0x1e7   : > { %4050 = vmatprep.mubr.msk.bf16.mxu0 %vm621_vm3, %v1597_v25 }
 0x1ec   : > { %4033 = vmatmul.mubr.msk.bf16.gmra.mrb[56].mxu1 %vm621_vm3, %v1458_v26 }
 0x1ed   : > { %4036 = vmatprep.mubr.msk.bf16.mxu1 %vm621_vm3, %v1459_v28 }
 0x1ee   : > { %4051 = vmatmul.mubr.msk.bf16.gmra.mrb[60].mxu0 %vm621_vm3, %v1598_v27 }
 0x1ef   : > { %4054 = vmatprep.mubr.msk.bf16.mxu0 %vm621_vm3, %v1599_v29 }
 0x1f4   : > { %4037 = vmatmul.mubr.msk.bf16.gmra.mrb[60].mxu1 %vm621_vm3, %v1460_v30 }
 0x1f5   : > { %4040 = vmatprep.mubr.msk.bf16.mxu1 %vm621_vm3, %v1461_v32 }
 0x1f6   : > { %4055 = vmatmul.mubr.msk.bf16.gmra.mrb[64].mxu0 %vm621_vm3, %v1600_v31 }
 0x1f7   : > { %4058 = vmatprep.mubr.msk.bf16.mxu0 %vm621_vm3, %v1601_v33 }
 0x1fc   : > { %4041 = vmatmul.mubr.msk.bf16.gmra.mrb[64].mxu1 %vm621_vm3, %v1462_v34 }
 0x1fd   : > { %4078 = vmatprep.mubr.msk.bf16.mxu1 %vm4918_vm0, %v7117_v0 }
 0x1fe   : > { %4059 = vmatmul.mubr.msk.bf16.gmra.mrb[68].mxu0 %vm621_vm3, %v1602_v35 }
 0x1ff   : > { %4098 = vmatprep.mubr.msk.bf16.mxu0 %vm4918_vm0, %v7117_v0 }
 0x237   : > { %v5149_v36 = vpop.f32.mrb[4].mxu1 }
 0x238   : > { %1731 = vmax.xlane.f32.xlu1 %v5149_v36  ;;  %v5152_v37 = vpop.f32.mrb[5].mxu1 }
 0x239   : > { %7483 = vst [vmem:[#allocation7_spill] sm:$0xff] %v5152_v37  ;;  %1727 = vmax.xlane.f32.xlu0 %v5152_v37  ;;  %v5155_v38 = vpop.f32.mrb[6].mxu1  ;;  %v5157_v39 = vpop.f32.mrb[8].mxu0 }
 0x23a   : > { %7484 = vst [vmem:[#allocation8_spill] sm:$0xff] %v5155_v38  ;;  %7485 = vst [vmem:[#allocation9_spill] sm:$0xff] %v5157_v39  ;;  %v5159_v40 = vpop.f32.mrb[7].mxu1  ;;  %v5161_v41 = vpop.f32.mrb[9].mxu0 }
 0x23b   : > { %7486 = vst [vmem:[#allocation10_spill] sm:$0xff] %v5159_v40  ;;  %v5163_v42 = vpop.f32.mrb[10].mxu0 }
 0x23c   : > { %1763 = vmax.xlane.f32.xlu1 %v5157_v39  ;;  %v5166_v43 = vpop.f32.mrb[11].mxu0 }
 0x23d   : > { %1733 = vmax.xlane.f32.xlu0 %v5155_v38 }
 0x23f   : > { %v5169_v44 = vpop.f32.mrb[8].mxu1 }
 0x240   : > { %v5171_v45 = vpop.f32.mrb[9].mxu1  ;;  %1729 = vmax.xlane.f32.xlu1 %v5159_v40 }
 0x241   : > { %v5174_v46 = vpop.f32.mrb[10].mxu1  ;;  %1759 = vmax.xlane.f32.xlu0 %v5161_v41  ;;  %v5177_v47 = vpop.f32.mrb[12].mxu0 }
 0x242   : > { %v5179_v48 = vpop.f32.mrb[11].mxu1  ;;  %v5181_v49 = vpop.f32.mrb[13].mxu0 }
 0x243   : > { %v5183_v52 = vpop.f32.mrb[14].mxu0 }
 0x244   : > { %1739 = vmax.xlane.f32.xlu1 %v5169_v44  ;;  %v5186_v53 = vpop.f32.mrb[15].mxu0 }
 0x245   : > { %1765 = vmax.xlane.f32.xlu0 %v5163_v42 }
 0x247   : > { %v5189_v55 = vpop.f32.mrb[12].mxu1 }
 0x248   : > { %v5191_v56 = vpop.f32.mrb[13].mxu1  ;;  %1735 = vmax.xlane.f32.xlu1 %v5171_v45 }
 0x249   : > { %v5194_v57 = vpop.f32.mrb[14].mxu1  ;;  %1761 = vmax.xlane.f32.xlu0 %v5166_v43  ;;  %v5197_v58 = vpop.f32.mrb[16].mxu0 }
 0x24a   : > { %v5199_v60 = vpop.f32.mrb[15].mxu1  ;;  %v5201_v61 = vpop.f32.mrb[17].mxu0 }
 0x24b   : > { %7487 = vst [vmem:[#allocation11_spill] sm:$0xff] %v5201_v61  ;;  %v5203_v62 = vpop.f32.mrb[18].mxu0 }
 0x24c   : > { %1771 = vmax.xlane.f32.xlu1 %v5177_v47  ;;  %v5206_v63 = vpop.f32.mrb[19].mxu0 }
 0x24d   : > { %7488 = vst [vmem:[#allocation12_spill] sm:$0xff] %v5206_v63  ;;  %1741 = vmax.xlane.f32.xlu0 %v5174_v46 }
 0x24f   : > { %v5209_v1 = vpop.f32.mrb[16].mxu1 }
 0x250   : > { %7489 = vst [vmem:[#allocation13_spill] sm:$0xff] %v5209_v1  ;;  %v5211_v2 = vpop.f32.mrb[17].mxu1  ;;  %1767 = vmax.xlane.f32.xlu1 %v5181_v49 }
 0x251   : > { %7490 = vst [vmem:[#allocation14_spill] sm:$0xff] %v5211_v2  ;;  %v5214_v3 = vpop.f32.mrb[18].mxu1  ;;  %1737 = vmax.xlane.f32.xlu0 %v5179_v48  ;;  %v5217_v4 = vpop.f32.mrb[20].mxu0 }
 0x252   : > { %7491 = vst [vmem:[#allocation15_spill] sm:$0xff] %v5214_v3  ;;  %7492 = vst [vmem:[#allocation16_spill] sm:$0xff] %v5217_v4  ;;  %v5219_v6 = vpop.f32.mrb[19].mxu1  ;;  %v5221_v7 = vpop.f32.mrb[21].mxu0 }
 0x253   : > { %7493 = vst [vmem:[#allocation17_spill] sm:$0xff] %v5219_v6  ;;  %7494 = vst [vmem:[#allocation18_spill] sm:$0xff] %v5221_v7  ;;  %v5223_v5 = vpop.f32.mrb[22].mxu0 }
 0x254   : > { %7495 = vst [vmem:[#allocation19_spill] sm:$0xff] %v5223_v5  ;;  %1747 = vmax.xlane.f32.xlu1 %v5189_v55  ;;  %v5226_v8 = vpop.f32.mrb[23].mxu0 }
 0x255   : > { %7496 = vst [vmem:[#allocation20_spill] sm:$0xff] %v5226_v8  ;;  %1773 = vmax.xlane.f32.xlu0 %v5183_v52 }
 0x258   : > { %1743 = vmax.xlane.f32.xlu1 %v5191_v56 }
 0x259   : > { %1769 = vmax.xlane.f32.xlu0 %v5186_v53 }
 0x25c   : > { %1779 = vmax.xlane.f32.xlu1 %v5197_v58 }
 0x25d   : > { %1749 = vmax.xlane.f32.xlu0 %v5194_v57 }
 0x260   : > { %1775 = vmax.xlane.f32.xlu1 %v5201_v61 }
 0x261   : > { %1745 = vmax.xlane.f32.xlu0 %v5199_v60 }
 0x264   : > { %1755 = vmax.xlane.f32.xlu1 %v5209_v1 }
 0x265   : > { %1781 = vmax.xlane.f32.xlu0 %v5203_v62 }
 0x268   : > { %1751 = vmax.xlane.f32.xlu1 %v5211_v2 }
 0x269   : > { %1777 = vmax.xlane.f32.xlu0 %v5206_v63 }
 0x26c   : > { %1787 = vmax.xlane.f32.xlu1 %v5217_v4 }
 0x26d   : > { %1757 = vmax.xlane.f32.xlu0 %v5214_v3 }
 0x270   : > { %1783 = vmax.xlane.f32.xlu1 %v5221_v7 }
 0x271   : > { %1753 = vmax.xlane.f32.xlu0 %v5219_v6 }
 0x275   : > { %1789 = vmax.xlane.f32.xlu0 %v5223_v5 }
 0x277   : > { %v5244_v10 = vpop.f32.mrb[20].mxu1 }
 0x278   : > { %7497 = vst [vmem:[#allocation21_spill] sm:$0xff] %v5244_v10  ;;  %v5246_v11 = vpop.f32.mrb[21].mxu1  ;;  %1795 = vmax.xlane.f32.xlu1 %v5244_v10 }
 0x279   : > { %7498 = vst [vmem:[#allocation22_spill] sm:$0xff] %v5246_v11  ;;  %v5249_v9 = vpop.f32.mrb[22].mxu1  ;;  %1785 = vmax.xlane.f32.xlu0 %v5226_v8  ;;  %v5252_v12 = vpop.f32.mrb[24].mxu0 }
 0x27a   : > { %7499 = vst [vmem:[#allocation23_spill] sm:$0xff] %v5249_v9  ;;  %7500 = vst [vmem:[#allocation24_spill] sm:$0xff] %v5252_v12  ;;  %v5254_v13 = vpop.f32.mrb[23].mxu1  ;;  %v5256_v14 = vpop.f32.mrb[25].mxu0 }
 0x27b   : > { %7501 = vst [vmem:[#allocation25_spill] sm:$0xff] %v5254_v13  ;;  %7502 = vst [vmem:[#allocation26_spill] sm:$0xff] %v5256_v14  ;;  %v5258_v15 = vpop.f32.mrb[26].mxu0 }
 0x27c   : > { %7503 = vst [vmem:[#allocation27_spill] sm:$0xff] %v5258_v15  ;;  %1791 = vmax.xlane.f32.xlu1 %v5246_v11  ;;  %v5261_v16 = vpop.f32.mrb[27].mxu0 }
 0x27d   : > { %7504 = vst [vmem:[#allocation28_spill] sm:$0xff] %v5261_v16  ;;  %1797 = vmax.xlane.f32.xlu0 %v5249_v9 }
 0x27f   : > { %v5264_v17 = vpop.f32.mrb[24].mxu1 }
 0x280   : > { %7505 = vst [vmem:[#allocation29_spill] sm:$0xff] %v5264_v17  ;;  %1827 = vmax.xlane.f32.xlu1 %v5252_v12  ;;  %v5267_v18 = vpop.f32.mrb[25].mxu1 }
 0x281   : > { %7506 = vst [vmem:[#allocation30_spill] sm:$0xff] %v5267_v18  ;;  %1793 = vmax.xlane.f32.xlu0 %v5254_v13  ;;  %v5270_v19 = vpop.f32.mrb[26].mxu1  ;;  %v5272_v20 = vpop.f32.mrb[28].mxu0 }
 0x282   : > { %7507 = vst [vmem:[#allocation31_spill] sm:$0xff] %v5270_v19  ;;  %7508 = vst [vmem:[#allocation32_spill] sm:$0xff] %v5272_v20  ;;  %v5274_v21 = vpop.f32.mrb[27].mxu1  ;;  %v5276_v22 = vpop.f32.mrb[29].mxu0  ;;  %v7636_v1 = vld [vmem:[#allocation26_spill] sm:$0xff] }
 0x283   : > { %7509 = vst [vmem:[#allocation33_spill] sm:$0xff] %v5274_v21  ;;  %7510 = vst [vmem:[#allocation34_spill] sm:$0xff] %v5276_v22  ;;  %v5278_v23 = vpop.f32.mrb[30].mxu0 }
 0x284   : > { %7511 = vst [vmem:[#allocation35_spill] sm:$0xff] %v5278_v23  ;;  %1823 = vmax.xlane.f32.xlu1 %v5256_v14  ;;  %v5281_v25 = vpop.f32.mrb[31].mxu0 }
 0x285   : > { %7512 = vst [vmem:[#allocation36_spill] sm:$0xff] %v5281_v25  ;;  %1829 = vmax.xlane.f32.xlu0 %v5258_v15 }
 0x287   : > { %v5284_v26 = vpop.f32.mrb[28].mxu1 }
 0x288   : > { %7513 = vst [vmem:[#allocation37_spill] sm:$0xff] %v5284_v26  ;;  %1803 = vmax.xlane.f32.xlu1 %v5264_v17  ;;  %v5287_v27 = vpop.f32.mrb[29].mxu1 }
 0x289   : > { %7514 = vst [vmem:[#allocation38_spill] sm:$0xff] %v5287_v27  ;;  %1825 = vmax.xlane.f32.xlu0 %v5261_v16  ;;  %v5290_v28 = vpop.f32.mrb[30].mxu1  ;;  %v5292_v29 = vpop.f32.mrb[32].mxu0 }
 0x28a   : > { %7515 = vst [vmem:[#allocation39_spill] sm:$0xff] %v5290_v28  ;;  %7516 = vst [vmem:[#allocation40_spill] sm:$0xff] %v5292_v29  ;;  %v5294_v30 = vpop.f32.mrb[31].mxu1  ;;  %v5296_v31 = vpop.f32.mrb[33].mxu0 }
 0x28b   : > { %7517 = vst [vmem:[#allocation41_spill] sm:$0xff] %v5294_v30  ;;  %7518 = vst [vmem:[#allocation42_spill] sm:$0xff] %v5296_v31  ;;  %v5298_v32 = vpop.f32.mrb[34].mxu0 }
 0x28c   : > { %7519 = vst [vmem:[#allocation43_spill] sm:$0xff] %v5298_v32  ;;  %1799 = vmax.xlane.f32.xlu1 %v5267_v18  ;;  %v5301_v33 = vpop.f32.mrb[35].mxu0 }
 0x28d   : > { %7520 = vst [vmem:[#allocation44_spill] sm:$0xff] %v5301_v33  ;;  %1805 = vmax.xlane.f32.xlu0 %v5270_v19 }
 0x28f   : > { %v5304_v34 = vpop.f32.mrb[32].mxu1 }
 0x290   : > { %7521 = vst [vmem:[#allocation45_spill] sm:$0xff] %v5304_v34  ;;  %1835 = vmax.xlane.f32.xlu1 %v5272_v20  ;;  %v5307_v35 = vpop.f32.mrb[33].mxu1 }
 0x291   : > { %7522 = vst [vmem:[#allocation46_spill] sm:$0xff] %v5307_v35  ;;  %1801 = vmax.xlane.f32.xlu0 %v5274_v21  ;;  %v5310_v0 = vpop.f32.mrb[34].mxu1  ;;  %v5312_v24 = vpop.f32.mrb[36].mxu0 }
 0x292   : > { %7523 = vst [vmem:[#allocation47_spill] sm:$0xff] %v5310_v0  ;;  %7524 = vst [vmem:[#allocation48_spill] sm:$0xff] %v5312_v24  ;;  %v5314_v59 = vpop.f32.mrb[35].mxu1  ;;  %v5316_v51 = vpop.f32.mrb[37].mxu0 }
 0x293   : > { %7525 = vst [vmem:[#allocation49_spill] sm:$0xff] %v5314_v59  ;;  %7526 = vst [vmem:[#allocation50_spill] sm:$0xff] %v5316_v51  ;;  %v5318_v54 = vpop.f32.mrb[38].mxu0 }
 0x294   : > { %7527 = vst [vmem:[#allocation51_spill] sm:$0xff] %v5318_v54  ;;  %1831 = vmax.xlane.f32.xlu1 %v5276_v22  ;;  %v5321_v50 = vpop.f32.mrb[39].mxu0 }
 0x295   : > { %7528 = vst [vmem:[#allocation52_spill] sm:$0xff] %v5321_v50  ;;  %1837 = vmax.xlane.f32.xlu0 %v5278_v23 }
 0x297   : > { %v5324_v20 = vpop.f32.mrb[36].mxu1 }
 0x298   : > { %7529 = vst [vmem:[#allocation53_spill] sm:$0xff] %v5324_v20  ;;  %v5326_v19 = vpop.f32.mrb[37].mxu1  ;;  %1811 = vmax.xlane.f32.xlu1 %v5284_v26 }
 0x299   : > { %7530 = vst [vmem:[#allocation54_spill] sm:$0xff] %v5326_v19  ;;  %v5329_v21 = vpop.f32.mrb[38].mxu1  ;;  %1833 = vmax.xlane.f32.xlu0 %v5281_v25  ;;  %v5332_v18 = vpop.f32.mrb[40].mxu0 }
 0x29a   : > { %7531 = vst [vmem:[#allocation55_spill] sm:$0xff] %v5329_v21  ;;  %7532 = vst [vmem:[#allocation56_spill] sm:$0xff] %v5332_v18  ;;  %v5334_v16 = vpop.f32.mrb[39].mxu1  ;;  %v5336_v17 = vpop.f32.mrb[41].mxu0 }
 0x29b   : > { %7533 = vst [vmem:[#allocation57_spill] sm:$0xff] %v5334_v16  ;;  %7534 = vst [vmem:[#allocation58_spill] sm:$0xff] %v5336_v17  ;;  %v5338_v22 = vpop.f32.mrb[42].mxu0 }
 0x29c   : > { %7535 = vst [vmem:[#allocation59_spill] sm:$0xff] %v5338_v22  ;;  %1807 = vmax.xlane.f32.xlu1 %v5287_v27  ;;  %v5341_v23 = vpop.f32.mrb[43].mxu0 }
 0x29d   : > { %7536 = vst [vmem:[#allocation60_spill] sm:$0xff] %v5341_v23  ;;  %1813 = vmax.xlane.f32.xlu0 %v5290_v28 }
 0x29f   : > { %v5344_v15 = vpop.f32.mrb[40].mxu1 }
 0x2a0   : > { %7537 = vst [vmem:[#allocation61_spill] sm:$0xff] %v5344_v15  ;;  %v5346_v26 = vpop.f32.mrb[41].mxu1  ;;  %1843 = vmax.xlane.f32.xlu1 %v5292_v29 }
 0x2a1   : > { %7538 = vst [vmem:[#allocation62_spill] sm:$0xff] %v5346_v26  ;;  %v5349_v25 = vpop.f32.mrb[42].mxu1  ;;  %1809 = vmax.xlane.f32.xlu0 %v5294_v30  ;;  %v5352_v14 = vpop.f32.mrb[44].mxu0 }
 0x2a2   : > { %7539 = vst [vmem:[#allocation63_spill] sm:$0xff] %v5349_v25  ;;  %7540 = vst [vmem:[#allocation64_spill] sm:$0xff] %v5352_v14  ;;  %v5354_v13 = vpop.f32.mrb[43].mxu1  ;;  %v5356_v12 = vpop.f32.mrb[45].mxu0 }
 0x2a3   : > { %7541 = vst [vmem:[#allocation65_spill] sm:$0xff] %v5354_v13  ;;  %7542 = vst [vmem:[#allocation66_spill] sm:$0xff] %v5356_v12  ;;  %v5358_v27 = vpop.f32.mrb[46].mxu0 }
 0x2a4   : > { %7543 = vst [vmem:[#allocation67_spill] sm:$0xff] %v5358_v27  ;;  %1839 = vmax.xlane.f32.xlu1 %v5296_v31  ;;  %v5361_v28 = vpop.f32.mrb[47].mxu0 }
 0x2a5   : > { %7544 = vst [vmem:[#allocation68_spill] sm:$0xff] %v5361_v28  ;;  %1845 = vmax.xlane.f32.xlu0 %v5298_v32 }
 0x2a7   : > { %v5364_v9 = vpop.f32.mrb[44].mxu1 }
 0x2a8   : > { %7545 = vst [vmem:[#allocation69_spill] sm:$0xff] %v5364_v9  ;;  %v5366_v29 = vpop.f32.mrb[45].mxu1  ;;  %1819 = vmax.xlane.f32.xlu1 %v5304_v34 }
 0x2a9   : > { %7546 = vst [vmem:[#allocation70_spill] sm:$0xff] %v5366_v29  ;;  %v5369_v30 = vpop.f32.mrb[46].mxu1  ;;  %1841 = vmax.xlane.f32.xlu0 %v5301_v33  ;;  %v5372_v11 = vpop.f32.mrb[48].mxu0 }
 0x2aa   : > { %7547 = vst [vmem:[#allocation71_spill] sm:$0xff] %v5369_v30  ;;  %7548 = vst [vmem:[#allocation72_spill] sm:$0xff] %v5372_v11  ;;  %v5374_v8 = vpop.f32.mrb[47].mxu1  ;;  %v5376_v10 = vpop.f32.mrb[49].mxu0 }
 0x2ab   : > { %7549 = vst [vmem:[#allocation73_spill] sm:$0xff] %v5374_v8  ;;  %7550 = vst [vmem:[#allocation74_spill] sm:$0xff] %v5376_v10  ;;  %v5378_v31 = vpop.f32.mrb[50].mxu0 }
 0x2ac   : > { %7551 = vst [vmem:[#allocation75_spill] sm:$0xff] %v5378_v31  ;;  %1815 = vmax.xlane.f32.xlu1 %v5307_v35  ;;  %v5381_v32 = vpop.f32.mrb[51].mxu0 }
 0x2ad   : > { %7552 = vst [vmem:[#allocation76_spill] sm:$0xff] %v5381_v32  ;;  %1821 = vmax.xlane.f32.xlu0 %v5310_v0 }
 0x2af   : > { %v5384_v5 = vpop.f32.mrb[48].mxu1 }
 0x2b0   : > { %7553 = vst [vmem:[#allocation77_spill] sm:$0xff] %v5384_v5  ;;  %v5386_v34 = vpop.f32.mrb[49].mxu1  ;;  %1851 = vmax.xlane.f32.xlu1 %v5312_v24 }
 0x2b1   : > { %7554 = vst [vmem:[#allocation78_spill] sm:$0xff] %v5386_v34  ;;  %v5389_v33 = vpop.f32.mrb[50].mxu1  ;;  %1817 = vmax.xlane.f32.xlu0 %v5314_v59  ;;  %v5392_v6 = vpop.f32.mrb[52].mxu0 }
 0x2b2   : > { %7555 = vst [vmem:[#allocation79_spill] sm:$0xff] %v5389_v33  ;;  %7556 = vst [vmem:[#allocation80_spill] sm:$0xff] %v5392_v6  ;;  %v5394_v7 = vpop.f32.mrb[51].mxu1  ;;  %v5396_v3 = vpop.f32.mrb[53].mxu0 }
 0x2b3   : > { %7557 = vst [vmem:[#allocation81_spill] sm:$0xff] %v5394_v7  ;;  %7558 = vst [vmem:[#allocation82_spill] sm:$0xff] %v5396_v3  ;;  %v5398_v35 = vpop.f32.mrb[54].mxu0 }
 0x2b4   : > { %7559 = vst [vmem:[#allocation83_spill] sm:$0xff] %v5398_v35  ;;  %1847 = vmax.xlane.f32.xlu1 %v5316_v51  ;;  %v5401_v0 = vpop.f32.mrb[55].mxu0 }
 0x2b5   : > { %7560 = vst [vmem:[#allocation84_spill] sm:$0xff] %v5401_v0  ;;  %1853 = vmax.xlane.f32.xlu0 %v5318_v54 }
 0x2b7   : > { %v5404_v4 = vpop.f32.mrb[52].mxu1 }
 0x2b8   : > { %7561 = vst [vmem:[#allocation85_spill] sm:$0xff] %v5404_v4  ;;  %1859 = vmax.xlane.f32.xlu1 %v5324_v20  ;;  %v5407_v24 = vpop.f32.mrb[53].mxu1 }
 0x2b9   : > { %7562 = vst [vmem:[#allocation86_spill] sm:$0xff] %v5407_v24  ;;  %1849 = vmax.xlane.f32.xlu0 %v5321_v50  ;;  %v5410_v59 = vpop.f32.mrb[54].mxu1  ;;  %v5412_v63 = vpop.f32.mrb[56].mxu0 }
 0x2ba   : > { %7563 = vst [vmem:[#allocation87_spill] sm:$0xff] %v5410_v59  ;;  %7564 = vst [vmem:[#allocation88_spill] sm:$0xff] %v5412_v63  ;;  %v5414_v2 = vpop.f32.mrb[55].mxu1  ;;  %v5416_v35 = vpop.f32.mrb[57].mxu0 }
 0x2bb   : > { %7565 = vst [vmem:[#allocation89_spill] sm:$0xff] %v5414_v2  ;;  %7566 = vst [vmem:[#allocation90_spill] sm:$0xff] %v5416_v35  ;;  %v5418_v51 = vpop.f32.mrb[58].mxu0 }
 0x2bc   : > { %7567 = vst [vmem:[#allocation91_spill] sm:$0xff] %v5418_v51  ;;  %1855 = vmax.xlane.f32.xlu1 %v5326_v19  ;;  %v5421_v54 = vpop.f32.mrb[59].mxu0 }
 0x2bd   : > { %7568 = vst [vmem:[#allocation92_spill] sm:$0xff] %v5421_v54  ;;  %1861 = vmax.xlane.f32.xlu0 %v5329_v21 }
 0x2bf   : > { %v5424_v20 = vpop.f32.mrb[56].mxu1 }
 0x2c0   : > { %7569 = vst [vmem:[#allocation93_spill] sm:$0xff] %v5424_v20  ;;  %1891 = vmax.xlane.f32.xlu1 %v5332_v18  ;;  %v5427_v50 = vpop.f32.mrb[57].mxu1 }
 0x2c1   : > { %7570 = vst [vmem:[#allocation94_spill] sm:$0xff] %v5427_v50  ;;  %1857 = vmax.xlane.f32.xlu0 %v5334_v16  ;;  %v5430_v63 = vpop.f32.mrb[58].mxu1  ;;  %v5432_v2 = vpop.f32.mrb[60].mxu0 }
 0x2c2   : > { %7571 = vst [vmem:[#allocation95_spill] sm:$0xff] %v5430_v63  ;;  %7572 = vst [vmem:[#allocation96_spill] sm:$0xff] %v5432_v2  ;;  %v5434_v35 = vpop.f32.mrb[59].mxu1  ;;  %v5436_v51 = vpop.f32.mrb[61].mxu0 }
 0x2c3   : > { %7573 = vst [vmem:[#allocation97_spill] sm:$0xff] %v5434_v35  ;;  %7574 = vst [vmem:[#allocation98_spill] sm:$0xff] %v5436_v51  ;;  %v5438_v19 = vpop.f32.mrb[62].mxu0 }
 0x2c4   : > { %7575 = vst [vmem:[#allocation99_spill] sm:$0xff] %v5438_v19  ;;  %1887 = vmax.xlane.f32.xlu1 %v5336_v17  ;;  %v5441_v21 = vpop.f32.mrb[63].mxu0 }
 0x2c5   : > { %7576 = vst [vmem:[#allocation100_spill] sm:$0xff] %v5441_v21  ;;  %v5443_v54 = vpop.xlane.xlu1 %1731  ;;  %1893 = vmax.xlane.f32.xlu0 %v5338_v22 }
 0x2c6   : > { %7577 = vst [vmem:[#allocation101_spill] sm:$0xff] %v5443_v54  ;;  %v5448_v18 = vpop.xlane.xlu0 %1727 }
 0x2c7   : > { %7578 = vst [vmem:[#allocation102_spill] sm:$0xff] %v5448_v18  ;;  %v5452_v2 = vpop.f32.mrb[60].mxu1 }
 0x2c8   : > { %7579 = vst [vmem:[#allocation103_spill] sm:$0xff] %v5452_v2  ;;  %1867 = vmax.xlane.f32.xlu1 %v5344_v15  ;;  %v5455_v19 = vpop.f32.mrb[61].mxu1 }
 0x2c9   : > { %7580 = vst [vmem:[#allocation104_spill] sm:$0xff] %v5455_v19  ;;  %v5457_v17 = vpop.xlane.xlu1 %1763  ;;  %1889 = vmax.xlane.f32.xlu0 %v5341_v23  ;;  %v5460_v21 = vpop.f32.mrb[62].mxu1 }
 0x2ca   : > { %7581 = vst [vmem:[#allocation105_spill] sm:$0xff] %v5457_v17  ;;  %7582 = vst [vmem:[#allocation106_spill] sm:$0xff] %v5460_v21  ;;  %v5464_v22 = vpop.xlane.xlu0 %1733  ;;  %v5466_v54 = vpop.f32.mrb[63].mxu1 }
 0x2cb   : > { %7583 = vst [vmem:[#allocation107_spill] sm:$0xff] %v5464_v22  ;;  %7584 = vst [vmem:[#allocation108_spill] sm:$0xff] %v5466_v54  ;;  %v5470_v18 = vpop.f32.mrb[64].mxu0 }
 0x2cc   : > { %7585 = vst [vmem:[#allocation109_spill] sm:$0xff] %v5470_v18  ;;  %1863 = vmax.xlane.f32.xlu1 %v5346_v26  ;;  %v5473_v15 = vpop.f32.mrb[65].mxu0 }
 0x2cd   : > { %7586 = vst [vmem:[#allocation110_spill] sm:$0xff] %v5473_v15  ;;  %v5475_v37 = vpop.xlane.xlu1 %1729  ;;  %1869 = vmax.xlane.f32.xlu0 %v5349_v25  ;;  %v5478_v23 = vpop.f32.mrb[66].mxu0 }
 0x2ce   : > { %7587 = vst [vmem:[#allocation111_spill] sm:$0xff] %v5475_v37  ;;  %7588 = vst [vmem:[#allocation112_spill] sm:$0xff] %v5478_v23  ;;  %v5482_v17 = vpop.xlane.xlu0 %1759  ;;  %v5484_v39 = vpop.f32.mrb[67].mxu0 }
 0x2cf   : > { %7589 = vst [vmem:[#allocation113_spill] sm:$0xff] %v5482_v17  ;;  %7590 = vst [vmem:[#allocation114_spill] sm:$0xff] %v5484_v39  ;;  %v5488_v22 = vpop.f32.mrb[64].mxu1 }
 0x2d0   : > { %7591 = vst [vmem:[#allocation115_spill] sm:$0xff] %v5488_v22  ;;  %1899 = vmax.xlane.f32.xlu1 %v5352_v14  ;;  %v5491_v26 = vpop.f32.mrb[65].mxu1 }
 0x2d1   : > { %7592 = vst [vmem:[#allocation116_spill] sm:$0xff] %v5491_v26  ;;  %v5493_v38 = vpop.xlane.xlu1 %1739  ;;  %1865 = vmax.xlane.f32.xlu0 %v5354_v13  ;;  %v5496_v25 = vpop.f32.mrb[66].mxu1 }
 0x2d2   : > { %7593 = vst [vmem:[#allocation117_spill] sm:$0xff] %v5493_v38  ;;  %7594 = vst [vmem:[#allocation118_spill] sm:$0xff] %v5496_v25  ;;  %v5500_v37 = vpop.xlane.xlu0 %1765  ;;  %v5502_v40 = vpop.f32.mrb[67].mxu1 }
 0x2d3   : > { %7595 = vst [vmem:[#allocation119_spill] sm:$0xff] %v5502_v40  ;;  %v5506_v22 = vpop.f32.mrb[68].mxu0 }
 0x2d4   : > { %7596 = vst [vmem:[#allocation120_spill] sm:$0xff] %v5506_v22  ;;  %1895 = vmax.xlane.f32.xlu1 %v5356_v12  ;;  %v5509_v14 = vpop.f32.mrb[69].mxu0 }
 0x2d5   : > { %7597 = vst [vmem:[#allocation121_spill] sm:$0xff] %v5509_v14  ;;  %v5511_v17 = vpop.xlane.xlu1 %1735  ;;  %1901 = vmax.xlane.f32.xlu0 %v5358_v27  ;;  %v5514_v25 = vpop.f32.mrb[70].mxu0 }
 0x2d6   : > { %7598 = vst [vmem:[#allocation122_spill] sm:$0xff] %v5514_v25  ;;  %v5518_v13 = vpop.xlane.xlu0 %1761  ;;  %v5520_v38 = vpop.f32.mrb[71].mxu0 }
 0x2d7   : > { %7599 = vst [vmem:[#allocation123_spill] sm:$0xff] %v5520_v38 }
 0x2d8   : > { %1875 = vmax.xlane.f32.xlu1 %v5364_v9 }
 0x2d9   : > { %v5525_v22 = vpop.xlane.xlu1 %1771  ;;  %1897 = vmax.xlane.f32.xlu0 %v5361_v28 }
 0x2da   : > { %v5530_v25 = vpop.xlane.xlu0 %1741 }
 0x2dc   : > { %1871 = vmax.xlane.f32.xlu1 %v5366_v29 }
 0x2dd   : > { %v5535_v12 = vpop.xlane.xlu1 %1767  ;;  %1877 = vmax.xlane.f32.xlu0 %v5369_v30 }
 0x2de   : > { %v5540_v9 = vpop.xlane.xlu0 %1737 }
 0x2e0   : > { %1907 = vmax.xlane.f32.xlu1 %v5372_v11 }
 0x2e1   : > { %v5545_v27 = vpop.xlane.xlu1 %1747  ;;  %1873 = vmax.xlane.f32.xlu0 %v5374_v8 }
 0x2e2   : > { %v5550_v29 = vpop.xlane.xlu0 %1773 }
 0x2e4   : > { %1903 = vmax.xlane.f32.xlu1 %v5376_v10 }
 0x2e5   : > { %v5555_v35 = vpop.xlane.xlu1 %1743  ;;  %1909 = vmax.xlane.f32.xlu0 %v5378_v31 }
 0x2e6   : > { %v5560_v11 = vpop.xlane.xlu0 %1769 }
 0x2e8   : > { %1883 = vmax.xlane.f32.xlu1 %v5384_v5 }
 0x2e9   : > { %v5565_v16 = vpop.xlane.xlu1 %1779  ;;  %1905 = vmax.xlane.f32.xlu0 %v5381_v32  ;;  %v7640_v32 = vld [vmem:[#allocation29_spill] sm:$0xff] }
 0x2ea   : > { %v5570_v10 = vpop.xlane.xlu0 %1749 }
 0x2ec   : > { %1879 = vmax.xlane.f32.xlu1 %v5386_v34 }
 0x2ed   : > { %v5575_v28 = vpop.xlane.xlu1 %1775  ;;  %1885 = vmax.xlane.f32.xlu0 %v5389_v33 }
 0x2ee   : > { %7600 = vst [vmem:[#allocation124_spill] sm:$0xff] %v5575_v28  ;;  %v5580_v5 = vpop.xlane.xlu0 %1745  ;;  %v7604_v28 = vld [vmem:[#allocation83_spill] sm:$0xff] }
 0x2ef   : > { %7601 = vst [vmem:[#allocation125_spill] sm:$0xff] %v5580_v5 }
 0x2f0   : > { %1915 = vmax.xlane.f32.xlu1 %v5392_v6 }
 0x2f1   : > { %v5585_v30 = vpop.xlane.xlu1 %1755  ;;  %1881 = vmax.xlane.f32.xlu0 %v5394_v7  ;;  %v7606_v7 = vld [vmem:[#allocation12_spill] sm:$0xff] }
 0x2f2   : > { %7602 = vst [vmem:[#allocation126_spill] sm:$0xff] %v5585_v30  ;;  %v5590_v34 = vpop.xlane.xlu0 %1781 }
 0x2f4   : > { %1911 = vmax.xlane.f32.xlu1 %v5396_v3  ;;  %v7615_v3 = vld [vmem:[#allocation88_spill] sm:$0xff] }
 0x2f5   : > { %v5595_v8 = vpop.xlane.xlu1 %1751  ;;  %1917 = vmax.xlane.f32.xlu0 %v7604_v28  ;;  %v7620_v28 = vld [vmem:[#allocation91_spill] sm:$0xff] }
 0x2f6   : > { %7603 = vst [vmem:[#allocation127_spill] sm:$0xff] %v5595_v8  ;;  %v5600_v61 = vpop.xlane.xlu0 %1777 }
 0x2f8   : > { %1923 = vmax.xlane.f32.xlu1 %v5404_v4  ;;  %v7621_v4 = vld [vmem:[#allocation21_spill] sm:$0xff] }
 0x2f9   : > { %v5605_v31 = vpop.xlane.xlu1 %1787  ;;  %1913 = vmax.xlane.f32.xlu0 %v5401_v0  ;;  %v7614_v0 = vld [vmem:[#allocation17_spill] sm:$0xff] }
 0x2fa   : > { %7607 = vst [vmem:[#allocation12_spill] sm:$0xff] %v5605_v31  ;;  %v5610_v30 = vpop.xlane.xlu0 %1757  ;;  %v7616_v31 = vld [vmem:[#allocation89_spill] sm:$0xff] }
 0x2fb   : > { %7609 = vst [vmem:[#allocation128_spill] sm:$0xff] %v5610_v30  ;;  %v7619_v30 = vld [vmem:[#allocation90_spill] sm:$0xff] }
 0x2fc   : > { %1919 = vmax.xlane.f32.xlu1 %v5407_v24  ;;  %v7635_v24 = vld [vmem:[#allocation97_spill] sm:$0xff] }
 0x2fd   : > { %v5615_v6 = vpop.xlane.xlu1 %1783  ;;  %1925 = vmax.xlane.f32.xlu0 %v5410_v59 }
 0x2fe   : > { %7611 = vst [vmem:[#allocation129_spill] sm:$0xff] %v5615_v6  ;;  %v5620_v8 = vpop.xlane.xlu0 %1753 }
 0x2ff   : > { %7613 = vst [vmem:[#allocation130_spill] sm:$0xff] %v5620_v8  ;;  %v7625_v8 = vld [vmem:[#allocation92_spill] sm:$0xff] }
 0x300   : > { %1955 = vmax.xlane.f32.xlu1 %v7615_v3  ;;  %v7630_v3 = vld [vmem:[#allocation24_spill] sm:$0xff] }
 0x301   : > { %1921 = vmax.xlane.f32.xlu0 %v7616_v31 }
 0x302   : > { %v5626_v33 = vpop.xlane.xlu0 %1789 }
 0x303   : > { %7617 = vst [vmem:[#allocation17_spill] sm:$0xff] %v5626_v33 }
 0x304   : > { %1951 = vmax.xlane.f32.xlu1 %v7619_v30  ;;  %v7633_v30 = vld [vmem:[#allocation96_spill] sm:$0xff] }
 0x305   : > { %v5631_v59 = vpop.xlane.xlu1 %1795  ;;  %1957 = vmax.xlane.f32.xlu0 %v7620_v28  ;;  %v7645_v28 = vld [vmem:[#allocation30_spill] sm:$0xff] }
 0x306   : > { %v5636_v5 = vpop.xlane.xlu0 %1785 }
 0x307   : > { %7622 = vst [vmem:[#allocation21_spill] sm:$0xff] %v5636_v5 }
 0x308   : > { %1931 = vmax.xlane.f32.xlu1 %v5424_v20 }
 0x309   : > { %v5641_v31 = vpop.xlane.xlu1 %1791  ;;  %1953 = vmax.xlane.f32.xlu0 %v7625_v8 }
 0x30a   : > { %7624 = vst [vmem:[#allocation131_spill] sm:$0xff] %v5641_v31  ;;  %v5646_v33 = vpop.xlane.xlu0 %1797 }
 0x30b   : > { %7627 = vst [vmem:[#allocation132_spill] sm:$0xff] %v5646_v33 }
 0x30c   : > { %1927 = vmax.xlane.f32.xlu1 %v5427_v50 }
 0x30d   : > { %v5651_v6 = vpop.xlane.xlu1 %1827  ;;  %1933 = vmax.xlane.f32.xlu0 %v5430_v63 }
 0x30e   : > { %7629 = vst [vmem:[#allocation133_spill] sm:$0xff] %v5651_v6  ;;  %v5656_v5 = vpop.xlane.xlu0 %1793  ;;  %v7639_v6 = vld [vmem:[#allocation99_spill] sm:$0xff] }
 0x30f   : > { %7631 = vst [vmem:[#allocation24_spill] sm:$0xff] %v5656_v5 }
 0x310   : > { %1963 = vmax.xlane.f32.xlu1 %v7633_v30 }
 0x311   : > { %v5661_v31 = vpop.xlane.xlu1 %1823  ;;  %1929 = vmax.xlane.f32.xlu0 %v7635_v24  ;;  %v7657_v24 = vld [vmem:[#allocation7_spill] sm:$0xff] }
 0x312   : > { %7634 = vst [vmem:[#allocation134_spill] sm:$0xff] %v5661_v31  ;;  %v5666_v33 = vpop.xlane.xlu0 %1829  ;;  %v7644_v31 = vld [vmem:[#allocation100_spill] sm:$0xff] }
 0x313   : > { %7637 = vst [vmem:[#allocation26_spill] sm:$0xff] %v5666_v33 }
 0x314   : > { %1959 = vmax.xlane.f32.xlu1 %v5436_v51  ;;  %v7652_v51 = vld [vmem:[#allocation101_spill] sm:$0xff] }
 0x315   : > { %v5671_v20 = vpop.xlane.xlu1 %1803  ;;  %1965 = vmax.xlane.f32.xlu0 %v7639_v6 }
 0x316   : > { %v5676_v5 = vpop.xlane.xlu0 %1825 }
 0x317   : > { %7641 = vst [vmem:[#allocation29_spill] sm:$0xff] %v5676_v5 }
 0x318   : > { %1939 = vmax.xlane.f32.xlu1 %v5452_v2  ;;  %v7656_v2 = vld [vmem:[#allocation35_spill] sm:$0xff] }
 0x319   : > { %v5681_v50 = vpop.xlane.xlu1 %1799  ;;  %1961 = vmax.xlane.f32.xlu0 %v7644_v31 }
 0x31a   : > { %7643 = vst [vmem:[#allocation135_spill] sm:$0xff] %v5681_v50  ;;  %v5686_v33 = vpop.xlane.xlu0 %1805  ;;  %v7653_v50 = vsub.f32 %v5149_v36, %v7652_v51  ;;  %v7661_v36 = vld [vmem:[#allocation8_spill] sm:$0xff] }
 0x31b   : > { %7646 = vst [vmem:[#allocation30_spill] sm:$0xff] %v5686_v33 }
 0x31c   : > { %1935 = vmax.xlane.f32.xlu1 %v5455_v19  ;;  %v2115_v63 = vmul.f32 1.442695, %v7653_v50 }
 0x31d   : > { %v5691_v30 = vpop.xlane.xlu1 %1835  ;;  %1941 = vmax.xlane.f32.xlu0 %v5460_v21 }
 0x31e   : > { %7648 = vst [vmem:[#allocation136_spill] sm:$0xff] %v5691_v30  ;;  %v5696_v5 = vpop.xlane.xlu0 %1801  ;;  %4391 = vpow2.f32 %v2115_v63  ;;  %v7665_v30 = vld [vmem:[#allocation36_spill] sm:$0xff] }
 0x31f   : > { %7650 = vst [vmem:[#allocation137_spill] sm:$0xff] %v5696_v5 }
 0x320   : > { %1971 = vmax.xlane.f32.xlu1 %v5470_v18  ;;  %v7658_v18 = vld [vmem:[#allocation102_spill] sm:$0xff] }
 0x321   : > { %v5704_v33 = vpop.xlane.xlu1 %1831  ;;  %1937 = vmax.xlane.f32.xlu0 %v5466_v54  ;;  %v7659_v5 = vsub.f32 %v7657_v24, %v7658_v18  ;;  %v7662_v54 = vld [vmem:[#allocation107_spill] sm:$0xff]  ;;  %v7666_v24 = vld [vmem:[#allocation9_spill] sm:$0xff] }
 0x322   : > { %7654 = vst [vmem:[#allocation101_spill] sm:$0xff] %v5704_v33  ;;  %v5709_v6 = vpop.xlane.xlu0 %1837  ;;  %v7663_v31 = vsub.f32 %v7661_v36, %v7662_v54  ;;  %v7669_v54 = vld [vmem:[#allocation10_spill] sm:$0xff] }
 0x323   : > { %v2111_v51 = vmul.f32 1.442695, %v7659_v5  ;;  %v7667_v5 = vld [vmem:[#allocation105_spill] sm:$0xff] }
 0x324   : > { %1967 = vmax.xlane.f32.xlu1 %v5473_v15  ;;  %v2117_v19 = vmul.f32 1.442695, %v7663_v31  ;;  %v7668_v18 = vsub.f32 %v7666_v24, %v7667_v5  ;;  %v7670_v31 = vld [vmem:[#allocation111_spill] sm:$0xff]  ;;  %v7674_v24 = vld [vmem:[#allocation113_spill] sm:$0xff] }
 0x325   : > { %v5717_v50 = vpop.xlane.xlu1 %1811  ;;  %1973 = vmax.xlane.f32.xlu0 %v5478_v23  ;;  %4393 = vpow2.f32 %v2111_v51  ;;  %v7671_v36 = vsub.f32 %v7669_v54, %v7670_v31  ;;  %v7673_v51 = vld [vmem:[#allocation39_spill] sm:$0xff]  ;;  %v7675_v5 = vsub.f32 %v5161_v41, %v7674_v24  ;;  %v7676_v54 = vsub.f32 %v5163_v42, %v5500_v37  ;;  %v7680_v24 = vld [vmem:[#allocation117_spill] sm:$0xff] }
 0x326   : > { %7660 = vst [vmem:[#allocation35_spill] sm:$0xff] %v5717_v50  ;;  %v5725_v8 = vpop.xlane.xlu0 %1833  ;;  %v2147_v15 = vmul.f32 1.442695, %v7668_v18  ;;  %4395 = vpow2.f32 %v2117_v19  ;;  %v7672_v50 = vld [vmem:[#allocation38_spill] sm:$0xff]  ;;  %v7682_v37 = vsub.f32 %v5166_v43, %v5518_v13 }
 0x327   : > { %v2113_v21 = vmul.f32 1.442695, %v7671_v36  ;;  %v2143_v18 = vmul.f32 1.442695, %v7675_v5  ;;  %v2149_v31 = vmul.f32 1.442695, %v7676_v54 }
 0x328   : > { %1943 = vmax.xlane.f32.xlu1 %v5491_v26  ;;  %4397 = vpow2.f32 %v2147_v15  ;;  %v7677_v36 = vld [vmem:[#allocation40_spill] sm:$0xff]  ;;  %v7679_v15 = vld [vmem:[#allocation41_spill] sm:$0xff]  ;;  %v2145_v42 = vmul.f32 1.442695, %v7682_v37  ;;  %v7683_v54 = vld [vmem:[#allocation42_spill] sm:$0xff] }
 0x329   : > { %v5733_v23 = vpop.xlane.xlu1 %1807  ;;  %1969 = vmax.xlane.f32.xlu0 %v5484_v39  ;;  %4399 = vpow2.f32 %v2113_v21  ;;  %v7681_v21 = vsub.f32 %v5169_v44, %v7680_v24  ;;  %v7689_v44 = vld [vmem:[#allocation45_spill] sm:$0xff] }
 0x32a   : > { %v5741_v63 = vpop.xlane.xlu0 %1813  ;;  %4401 = vpow2.f32 %v2143_v18  ;;  %v7685_v18 = vld [vmem:[#allocation43_spill] sm:$0xff] }
 0x32b   : > { %v2123_v5 = vmul.f32 1.442695, %v7681_v21  ;;  %4403 = vpow2.f32 %v2149_v31  ;;  %v7687_v31 = vsub.f32 %v5171_v45, %v5511_v17  ;;  %v7688_v21 = vsub.f32 %v5174_v46, %v5530_v25  ;;  %v7695_v45 = vld [vmem:[#allocation46_spill] sm:$0xff] }
 0x32c   : > { %1975 = vmax.xlane.f32.xlu1 %v5509_v14  ;;  %v5759_v14 = vpop.eup %4391 }
 0x32d   : > { %v5749_v19 = vpop.xlane.xlu1 %1843  ;;  %1945 = vmax.xlane.f32.xlu0 %v5502_v40  ;;  %7678 = vst [vmem:[#allocation7_spill] sm:$0xff] %v5759_v14  ;;  %4405 = vpow2.f32 %v2123_v5  ;;  %v2119_v43 = vmul.f32 1.442695, %v7687_v31  ;;  %v2125_v37 = vmul.f32 1.442695, %v7688_v21  ;;  %v7691_v5 = vld [vmem:[#allocation44_spill] sm:$0xff]  ;;  %v7694_v31 = vsub.f32 %v5179_v48, %v5540_v9 }
 0x32e   : > { %v5757_v26 = vpop.xlane.xlu0 %1809  ;;  %4407 = vpow2.f32 %v2145_v42  ;;  %v7693_v42 = vsub.f32 %v5177_v47, %v5525_v22  ;;  %v7701_v47 = vld [vmem:[#allocation48_spill] sm:$0xff] }
 0x32f   : > { %4409 = vpow2.f32 %v2119_v43  ;;  %v2121_v21 = vmul.f32 1.442695, %v7694_v31  ;;  %v7697_v43 = vld [vmem:[#allocation47_spill] sm:$0xff] }
 0x330   : > { %2371 = vadd.xlane.f32.xlu1 %v5759_v14  ;;  %v5777_v14 = vpop.eup %4393  ;;  %v2155_v46 = vmul.f32 1.442695, %v7693_v42  ;;  %4411 = vpow2.f32 %v2125_v37  ;;  %v7699_v37 = vsub.f32 %v5181_v49, %v5535_v12  ;;  %v7700_v42 = vsub.f32 %v5183_v52, %v5550_v29  ;;  %v7707_v49 = vld [vmem:[#allocation50_spill] sm:$0xff] }
 0x331   : > { %v5767_v40 = vpop.xlane.xlu1 %1839  ;;  %1977 = vmax.xlane.f32.xlu0 %v5520_v38  ;;  %7684 = vst [vmem:[#allocation102_spill] sm:$0xff] %v5777_v14  ;;  %v5781_v24 = vpop.eup %4395 }
 0x332   : > { %v5775_v41 = vpop.xlane.xlu0 %1845  ;;  %7686 = vst [vmem:[#allocation8_spill] sm:$0xff] %v5781_v24  ;;  %4413 = vpow2.f32 %v2155_v46  ;;  %v2151_v48 = vmul.f32 1.442695, %v7699_v37  ;;  %v2157_v31 = vmul.f32 1.442695, %v7700_v42  ;;  %v7703_v46 = vld [vmem:[#allocation49_spill] sm:$0xff]  ;;  %v7706_v37 = vsub.f32 %v5186_v53, %v5560_v11 }
 0x333   : > { %4415 = vpow2.f32 %v2121_v21  ;;  %v7705_v21 = vsub.f32 %v5189_v55, %v5545_v27  ;;  %v7713_v55 = vld [vmem:[#allocation53_spill] sm:$0xff] }
 0x334   : > { %2367 = vadd.xlane.f32.xlu1 %v5777_v14  ;;  %v5797_v14 = vpop.eup %4397  ;;  %4417 = vpow2.f32 %v2151_v48  ;;  %v2153_v42 = vmul.f32 1.442695, %v7706_v37  ;;  %v7709_v48 = vld [vmem:[#allocation51_spill] sm:$0xff] }
 0x335   : > { %v5787_v13 = vpop.xlane.xlu1 %1819  ;;  %2373 = vadd.xlane.f32.xlu0 %v5781_v24  ;;  %7690 = vst [vmem:[#allocation107_spill] sm:$0xff] %v5797_v14  ;;  %v5801_v17 = vpop.eup %4399  ;;  %v2131_v52 = vmul.f32 1.442695, %v7705_v21  ;;  %4419 = vpow2.f32 %v2157_v31  ;;  %v7711_v31 = vsub.f32 %v5191_v56, %v5555_v35  ;;  %v7712_v21 = vsub.f32 %v5194_v57, %v5570_v10  ;;  %v7720_v56 = vld [vmem:[#allocation54_spill] sm:$0xff] }
 0x336   : > { %v5795_v38 = vpop.xlane.xlu0 %1841  ;;  %7692 = vst [vmem:[#allocation36_spill] sm:$0xff] %v5801_v17 }
 0x337   : > { %4421 = vpow2.f32 %v2131_v52  ;;  %v2127_v53 = vmul.f32 1.442695, %v7711_v31  ;;  %v2133_v37 = vmul.f32 1.442695, %v7712_v21  ;;  %v7715_v52 = vld [vmem:[#allocation52_spill] sm:$0xff]  ;;  %v7718_v31 = vld [vmem:[#allocation125_spill] sm:$0xff] }
 0x338   : > { %2403 = vadd.xlane.f32.xlu1 %v5797_v14  ;;  %v5817_v14 = vpop.eup %4401  ;;  %4423 = vpow2.f32 %v2153_v42  ;;  %v7717_v42 = vsub.f32 %v5197_v58, %v5565_v16  ;;  %v7719_v21 = vsub.f32 %v5199_v60, %v7718_v31  ;;  %v7729_v58 = vld [vmem:[#allocation56_spill] sm:$0xff] }
 0x339   : > { %v5807_v25 = vpop.xlane.xlu1 %1815  ;;  %2369 = vadd.xlane.f32.xlu0 %v5801_v17  ;;  %7696 = vst [vmem:[#allocation9_spill] sm:$0xff] %v5817_v14  ;;  %v5821_v22 = vpop.eup %4403  ;;  %4425 = vpow2.f32 %v2127_v53 }
 0x33a   : > { %v5815_v24 = vpop.xlane.xlu0 %1821  ;;  %7698 = vst [vmem:[#allocation105_spill] sm:$0xff] %v5821_v22  ;;  %v2163_v57 = vmul.f32 1.442695, %v7717_v42  ;;  %4427 = vpow2.f32 %v2133_v37  ;;  %v2129_v33 = vmul.f32 1.442695, %v7719_v21  ;;  %v7725_v37 = vld [vmem:[#allocation11_spill] sm:$0xff]  ;;  %v7728_v21 = vsub.f32 %v5203_v62, %v5590_v34 }
 0x33b   : > { %v7726_v42 = vld [vmem:[#allocation124_spill] sm:$0xff] }
 0x33c   : > { %2399 = vadd.xlane.f32.xlu1 %v5817_v14  ;;  %v5837_v14 = vpop.eup %4405  ;;  %4429 = vpow2.f32 %v2163_v57 }
 0x33d   : > { %v5827_v9 = vpop.xlane.xlu1 %1851  ;;  %2405 = vadd.xlane.f32.xlu0 %v5821_v22  ;;  %7702 = vst [vmem:[#allocation10_spill] sm:$0xff] %v5837_v14  ;;  %v5841_v12 = vpop.eup %4407  ;;  %4431 = vpow2.f32 %v2129_v33  ;;  %v7734_v33 = vld [vmem:[#allocation13_spill] sm:$0xff] }
 0x33e   : > { %v5835_v17 = vpop.xlane.xlu0 %1817  ;;  %7704 = vst [vmem:[#allocation111_spill] sm:$0xff] %v5841_v12 }
 0x340   : > { %2379 = vadd.xlane.f32.xlu1 %v5837_v14  ;;  %v5857_v14 = vpop.eup %4409 }
 0x341   : > { %v5847_v29 = vpop.xlane.xlu1 %1847  ;;  %2401 = vadd.xlane.f32.xlu0 %v5841_v12  ;;  %7708 = vst [vmem:[#allocation38_spill] sm:$0xff] %v5857_v14  ;;  %v5861_v27 = vpop.eup %4411 }
 0x342   : > { %v5855_v22 = vpop.xlane.xlu0 %1853  ;;  %7710 = vst [vmem:[#allocation39_spill] sm:$0xff] %v5861_v27 }
 0x344   : > { %2375 = vadd.xlane.f32.xlu1 %v5857_v14  ;;  %v5877_v14 = vpop.eup %4413 }
 0x345   : > { %v5867_v11 = vpop.xlane.xlu1 %1859  ;;  %2381 = vadd.xlane.f32.xlu0 %v5861_v27  ;;  %7714 = vst [vmem:[#allocation113_spill] sm:$0xff] %v5877_v14  ;;  %v5881_v35 = vpop.eup %4415  ;;  %v2165_v27 = vmul.f32 1.442695, %v7728_v21  ;;  %v7738_v21 = vsub.f32 %v7606_v7, %v5600_v61 }
 0x346   : > { %v5875_v12 = vpop.xlane.xlu0 %1849  ;;  %7716 = vst [vmem:[#allocation40_spill] sm:$0xff] %v5881_v35 }
 0x348   : > { %2411 = vadd.xlane.f32.xlu1 %v5877_v14  ;;  %v5897_v14 = vpop.eup %4417 }
 0x349   : > { %v5887_v10 = vpop.xlane.xlu1 %1855  ;;  %2377 = vadd.xlane.f32.xlu0 %v5881_v35  ;;  %7722 = vst [vmem:[#allocation117_spill] sm:$0xff] %v5897_v14  ;;  %v5901_v16 = vpop.eup %4419  ;;  %v7727_v35 = vsub.f32 %v7725_v37, %v7726_v42  ;;  %v7735_v42 = vld [vmem:[#allocation126_spill] sm:$0xff] }
 0x34a   : > { %v5895_v39 = vpop.xlane.xlu0 %1861  ;;  %7724 = vst [vmem:[#allocation42_spill] sm:$0xff] %v5901_v16 }
 0x34b   : > { %7721 = vst [vmem:[#allocation41_spill] sm:$0xff] %v5895_v39  ;;  %v2159_v60 = vmul.f32 1.442695, %v7727_v35  ;;  %v2161_v39 = vmul.f32 1.442695, %v7738_v21  ;;  %v7748_v21 = vld [vmem:[#allocation15_spill] sm:$0xff] }
 0x34c   : > { %2407 = vadd.xlane.f32.xlu1 %v5897_v14  ;;  %v5917_v14 = vpop.eup %4421 }
 0x34d   : > { %v5907_v31 = vpop.xlane.xlu1 %1891  ;;  %2413 = vadd.xlane.f32.xlu0 %v5901_v16  ;;  %7731 = vst [vmem:[#allocation45_spill] sm:$0xff] %v5917_v14  ;;  %v5921_v35 = vpop.eup %4423  ;;  %4433 = vpow2.f32 %v2159_v60  ;;  %v7736_v16 = vsub.f32 %v7734_v33, %v7735_v42  ;;  %v7745_v42 = vld [vmem:[#allocation127_spill] sm:$0xff]  ;;  %v7751_v33 = vld [vmem:[#allocation61_spill] sm:$0xff] }
 0x34e   : > { %v5915_v53 = vpop.xlane.xlu0 %1857  ;;  %7733 = vst [vmem:[#allocation44_spill] sm:$0xff] %v5921_v35  ;;  %4435 = vpow2.f32 %v2165_v27  ;;  %v7744_v27 = vld [vmem:[#allocation14_spill] sm:$0xff] }
 0x34f   : > { %7730 = vst [vmem:[#allocation43_spill] sm:$0xff] %v5915_v53  ;;  %v2139_v62 = vmul.f32 1.442695, %v7736_v16  ;;  %v7749_v53 = vld [vmem:[#allocation128_spill] sm:$0xff] }
 0x350   : > { %2387 = vadd.xlane.f32.xlu1 %v5917_v14  ;;  %v5937_v14 = vpop.eup %4425 }
 0x351   : > { %v5927_v34 = vpop.xlane.xlu1 %1887  ;;  %2409 = vadd.xlane.f32.xlu0 %v5921_v35  ;;  %7741 = vst [vmem:[#allocation48_spill] sm:$0xff] %v5937_v14  ;;  %v5941_v16 = vpop.eup %4427  ;;  %4437 = vpow2.f32 %v2139_v62  ;;  %v7746_v35 = vsub.f32 %v7744_v27, %v7745_v42  ;;  %v7757_v42 = vld [vmem:[#allocation12_spill] sm:$0xff] }
 0x352   : > { %7737 = vst [vmem:[#allocation46_spill] sm:$0xff] %v5927_v34  ;;  %v5935_v57 = vpop.xlane.xlu0 %1893  ;;  %7743 = vst [vmem:[#allocation49_spill] sm:$0xff] %v5941_v16  ;;  %4439 = vpow2.f32 %v2161_v39  ;;  %v7750_v34 = vsub.f32 %v7748_v21, %v7749_v53  ;;  %v7756_v39 = vld [vmem:[#allocation16_spill] sm:$0xff]  ;;  %v7760_v21 = vld [vmem:[#allocation130_spill] sm:$0xff] }
 0x353   : > { %7740 = vst [vmem:[#allocation47_spill] sm:$0xff] %v5935_v57  ;;  %v2135_v61 = vmul.f32 1.442695, %v7746_v35  ;;  %v7761_v57 = vsub.f32 %v7614_v0, %v7760_v21  ;;  %v7770_v21 = vld [vmem:[#allocation19_spill] sm:$0xff] }
 0x354   : > { %2383 = vadd.xlane.f32.xlu1 %v5937_v14  ;;  %v2141_v37 = vmul.f32 1.442695, %v7750_v34  ;;  %v5957_v14 = vpop.eup %4429 }
 0x355   : > { %v5947_v7 = vpop.xlane.xlu1 %1867  ;;  %2389 = vadd.xlane.f32.xlu0 %v5941_v16  ;;  %7753 = vst [vmem:[#allocation53_spill] sm:$0xff] %v5957_v14  ;;  %v5961_v35 = vpop.eup %4431  ;;  %4441 = vpow2.f32 %v2135_v61  ;;  %v7758_v16 = vsub.f32 %v7756_v39, %v7757_v42  ;;  %v7768_v42 = vld [vmem:[#allocation129_spill] sm:$0xff]  ;;  %v7773_v39 = vld [vmem:[#allocation64_spill] sm:$0xff] }
 0x356   : > { %7747 = vst [vmem:[#allocation50_spill] sm:$0xff] %v5947_v7  ;;  %v5955_v60 = vpop.xlane.xlu0 %1889  ;;  %7755 = vst [vmem:[#allocation52_spill] sm:$0xff] %v5961_v35  ;;  %4443 = vpow2.f32 %v2141_v37  ;;  %v2137_v7 = vmul.f32 1.442695, %v7761_v57  ;;  %v7767_v37 = vld [vmem:[#allocation18_spill] sm:$0xff] }
 0x357   : > { %7752 = vst [vmem:[#allocation51_spill] sm:$0xff] %v5955_v60  ;;  %v2171_v53 = vmul.f32 1.442695, %v7758_v16  ;;  %v7771_v60 = vld [vmem:[#allocation17_spill] sm:$0xff] }
 0x358   : > { %2419 = vadd.xlane.f32.xlu1 %v5957_v14  ;;  %v5977_v14 = vpop.eup %4433 }
 0x359   : > { %v5967_v34 = vpop.xlane.xlu1 %1863  ;;  %2385 = vadd.xlane.f32.xlu0 %v5961_v35  ;;  %7764 = vst [vmem:[#allocation11_spill] sm:$0xff] %v5977_v14  ;;  %v5981_v16 = vpop.eup %4435  ;;  %4445 = vpow2.f32 %v2171_v53  ;;  %v7769_v35 = vsub.f32 %v7767_v37, %v7768_v42  ;;  %v7780_v42 = vld [vmem:[#allocation20_spill] sm:$0xff] }
 0x35a   : > { %7759 = vst [vmem:[#allocation125_spill] sm:$0xff] %v5967_v34  ;;  %v5975_v62 = vpop.xlane.xlu0 %1869  ;;  %7766 = vst [vmem:[#allocation124_spill] sm:$0xff] %v5981_v16  ;;  %4447 = vpow2.f32 %v2137_v7  ;;  %v7772_v34 = vsub.f32 %v7770_v21, %v7771_v60  ;;  %v7778_v7 = vsub.f32 %v7621_v4, %v5631_v59  ;;  %v7781_v21 = vld [vmem:[#allocation21_spill] sm:$0xff] }
 0x35b   : > { %7763 = vst [vmem:[#allocation54_spill] sm:$0xff] %v5975_v62  ;;  %v2167_v0 = vmul.f32 1.442695, %v7769_v35  ;;  %v7782_v62 = vsub.f32 %v7780_v42, %v7781_v21  ;;  %v7792_v21 = vld [vmem:[#allocation23_spill] sm:$0xff]  ;;  %v7795_v59 = vld [vmem:[#allocation69_spill] sm:$0xff] }
 0x35c   : > { %2415 = vadd.xlane.f32.xlu1 %v5977_v14  ;;  %v2173_v27 = vmul.f32 1.442695, %v7772_v34  ;;  %v5997_v14 = vpop.eup %4437  ;;  %v2179_v60 = vmul.f32 1.442695, %v7778_v7  ;;  %v7789_v7 = vld [vmem:[#allocation131_spill] sm:$0xff] }
 0x35d   : > { %v5987_v57 = vpop.xlane.xlu1 %1899  ;;  %2421 = vadd.xlane.f32.xlu0 %v5981_v16  ;;  %7775 = vst [vmem:[#allocation13_spill] sm:$0xff] %v5997_v14  ;;  %v6001_v35 = vpop.eup %4439  ;;  %4449 = vpow2.f32 %v2167_v0  ;;  %v2169_v16 = vmul.f32 1.442695, %v7782_v62 }
 0x35e   : > { %v5995_v61 = vpop.xlane.xlu0 %1865  ;;  %7777 = vst [vmem:[#allocation126_spill] sm:$0xff] %v6001_v35  ;;  %4451 = vpow2.f32 %v2173_v27  ;;  %v7788_v27 = vld [vmem:[#allocation22_spill] sm:$0xff] }
 0x35f   : > { %7774 = vst [vmem:[#allocation56_spill] sm:$0xff] %v5995_v61  ;;  %4453 = vpow2.f32 %v2179_v60  ;;  %v7793_v61 = vld [vmem:[#allocation132_spill] sm:$0xff] }
 0x360   : > { %2395 = vadd.xlane.f32.xlu1 %v5997_v14  ;;  %v6017_v14 = vpop.eup %4441  ;;  %4455 = vpow2.f32 %v2169_v16  ;;  %v7800_v16 = vld [vmem:[#allocation133_spill] sm:$0xff] }
 0x361   : > { %v6007_v34 = vpop.xlane.xlu1 %1895  ;;  %2417 = vadd.xlane.f32.xlu0 %v6001_v35  ;;  %7785 = vst [vmem:[#allocation15_spill] sm:$0xff] %v6017_v14  ;;  %v6021_v4 = vpop.eup %4443  ;;  %v7790_v35 = vsub.f32 %v7788_v27, %v7789_v7  ;;  %v7801_v7 = vsub.f32 %v7630_v3, %v7800_v16  ;;  %v7806_v27 = vld [vmem:[#allocation70_spill] sm:$0xff]  ;;  %v7816_v3 = vld [vmem:[#allocation72_spill] sm:$0xff] }
 0x362   : > { %7779 = vst [vmem:[#allocation14_spill] sm:$0xff] %v6007_v34  ;;  %v6015_v53 = vpop.xlane.xlu0 %1901  ;;  %7787 = vst [vmem:[#allocation128_spill] sm:$0xff] %v6021_v4  ;;  %v7794_v34 = vsub.f32 %v7792_v21, %v7793_v61  ;;  %v7803_v21 = vld [vmem:[#allocation25_spill] sm:$0xff] }
 0x363   : > { %7784 = vst [vmem:[#allocation127_spill] sm:$0xff] %v6015_v53  ;;  %v2175_v42 = vmul.f32 1.442695, %v7790_v35  ;;  %v2211_v61 = vmul.f32 1.442695, %v7801_v7  ;;  %v7804_v53 = vld [vmem:[#allocation24_spill] sm:$0xff] }
 0x364   : > { %2391 = vadd.xlane.f32.xlu1 %v6017_v14  ;;  %v2181_v37 = vmul.f32 1.442695, %v7794_v34  ;;  %v6037_v14 = vpop.eup %4445 }
 0x365   : > { %v6027_v62 = vpop.xlane.xlu1 %1875  ;;  %2397 = vadd.xlane.f32.xlu0 %v6021_v4  ;;  %7797 = vst [vmem:[#allocation12_spill] sm:$0xff] %v6037_v14  ;;  %v6041_v35 = vpop.eup %4447  ;;  %4457 = vpow2.f32 %v2175_v42  ;;  %v7805_v4 = vsub.f32 %v7803_v21, %v7804_v53  ;;  %v7813_v21 = vld [vmem:[#allocation27_spill] sm:$0xff] }
 0x366   : > { %7791 = vst [vmem:[#allocation61_spill] sm:$0xff] %v6027_v62  ;;  %v6035_v0 = vpop.xlane.xlu0 %1897  ;;  %7799 = vst [vmem:[#allocation130_spill] sm:$0xff] %v6041_v35  ;;  %4459 = vpow2.f32 %v2181_v37  ;;  %v7811_v37 = vld [vmem:[#allocation134_spill] sm:$0xff] }
 0x367   : > { %7796 = vst [vmem:[#allocation16_spill] sm:$0xff] %v6035_v0  ;;  %v2177_v62 = vmul.f32 1.442695, %v7805_v4  ;;  %4461 = vpow2.f32 %v2211_v61  ;;  %v7812_v7 = vsub.f32 %v7636_v1, %v7811_v37  ;;  %v7814_v0 = vld [vmem:[#allocation26_spill] sm:$0xff] }
 0x368   : > { %2427 = vadd.xlane.f32.xlu1 %v6037_v14  ;;  %v6057_v14 = vpop.eup %4449  ;;  %v7826_v1 = vld [vmem:[#allocation74_spill] sm:$0xff] }
 0x369   : > { %v6047_v34 = vpop.xlane.xlu1 %1871  ;;  %2393 = vadd.xlane.f32.xlu0 %v6041_v35  ;;  %7808 = vst [vmem:[#allocation19_spill] sm:$0xff] %v6057_v14  ;;  %v6061_v16 = vpop.eup %4451  ;;  %v2207_v53 = vmul.f32 1.442695, %v7812_v7  ;;  %4463 = vpow2.f32 %v2177_v62  ;;  %v7815_v35 = vsub.f32 %v7813_v21, %v7814_v0  ;;  %v7821_v62 = vsub.f32 %v7640_v32, %v5671_v20  ;;  %v7823_v7 = vld [vmem:[#allocation28_spill] sm:$0xff]  ;;  %v7824_v21 = vld [vmem:[#allocation29_spill] sm:$0xff] }
 0x36a   : > { %7802 = vst [vmem:[#allocation18_spill] sm:$0xff] %v6047_v34  ;;  %v6055_v60 = vpop.xlane.xlu0 %1877  ;;  %7810 = vst [vmem:[#allocation17_spill] sm:$0xff] %v6061_v16 }
 0x36b   : > { %7807 = vst [vmem:[#allocation129_spill] sm:$0xff] %v6055_v60  ;;  %v2213_v34 = vmul.f32 1.442695, %v7815_v35  ;;  %4465 = vpow2.f32 %v2207_v53  ;;  %v2187_v0 = vmul.f32 1.442695, %v7821_v62  ;;  %v7825_v60 = vsub.f32 %v7823_v7, %v7824_v21  ;;  %v7834_v21 = vld [vmem:[#allocation31_spill] sm:$0xff] }
 0x36c   : > { %2423 = vadd.xlane.f32.xlu1 %v6057_v14  ;;  %v6077_v14 = vpop.eup %4453 }
 0x36d   : > { %v6067_v4 = vpop.xlane.xlu1 %1907  ;;  %2429 = vadd.xlane.f32.xlu0 %v6061_v16  ;;  %7818 = vst [vmem:[#allocation20_spill] sm:$0xff] %v6077_v14  ;;  %v6081_v37 = vpop.eup %4455  ;;  %4467 = vpow2.f32 %v2213_v34  ;;  %v2209_v16 = vmul.f32 1.442695, %v7825_v60  ;;  %v7831_v34 = vld [vmem:[#allocation135_spill] sm:$0xff] }
 0x36e   : > { %v6075_v42 = vpop.xlane.xlu0 %1873  ;;  %7820 = vst [vmem:[#allocation21_spill] sm:$0xff] %v6081_v37  ;;  %4469 = vpow2.f32 %v2187_v0  ;;  %v7832_v62 = vsub.f32 %v7645_v28, %v7831_v34  ;;  %v7848_v28 = vld [vmem:[#allocation78_spill] sm:$0xff] }
 0x36f   : > { %7817 = vst [vmem:[#allocation64_spill] sm:$0xff] %v6075_v42  ;;  %4471 = vpow2.f32 %v2209_v16  ;;  %v7835_v42 = vld [vmem:[#allocation30_spill] sm:$0xff]  ;;  %v7842_v16 = vld [vmem:[#allocation32_spill] sm:$0xff] }
 0x370   : > { %2435 = vadd.xlane.f32.xlu1 %v6077_v14  ;;  %v6097_v14 = vpop.eup %4457  ;;  %v2183_v7 = vmul.f32 1.442695, %v7832_v62  ;;  %v7843_v62 = vld [vmem:[#allocation136_spill] sm:$0xff] }
 0x371   : > { %v6087_v35 = vpop.xlane.xlu1 %1903  ;;  %2425 = vadd.xlane.f32.xlu0 %v6081_v37  ;;  %7828 = vst [vmem:[#allocation23_spill] sm:$0xff] %v6097_v14  ;;  %v6101_v32 = vpop.eup %4459  ;;  %v7836_v37 = vsub.f32 %v7834_v21, %v7835_v42  ;;  %v7845_v21 = vld [vmem:[#allocation33_spill] sm:$0xff] }
 0x372   : > { %7822 = vst [vmem:[#allocation22_spill] sm:$0xff] %v6087_v35  ;;  %v6095_v61 = vpop.xlane.xlu0 %1909  ;;  %7830 = vst [vmem:[#allocation132_spill] sm:$0xff] %v6101_v32  ;;  %4473 = vpow2.f32 %v2183_v7 }
 0x373   : > { %7827 = vst [vmem:[#allocation131_spill] sm:$0xff] %v6095_v61  ;;  %v2189_v35 = vmul.f32 1.442695, %v7836_v37  ;;  %v7846_v61 = vld [vmem:[#allocation137_spill] sm:$0xff] }
 0x374   : > { %2431 = vadd.xlane.f32.xlu1 %v6097_v14  ;;  %v6117_v14 = vpop.eup %4461 }
 0x375   : > { %v6107_v60 = vpop.xlane.xlu1 %1883  ;;  %2437 = vadd.xlane.f32.xlu0 %v6101_v32  ;;  %7839 = vst [vmem:[#allocation25_spill] sm:$0xff] %v6117_v14  ;;  %v6121_v34 = vpop.eup %4463  ;;  %v7844_v32 = vsub.f32 %v7842_v16, %v7843_v62  ;;  %4475 = vpow2.f32 %v2189_v35  ;;  %v7853_v35 = vld [vmem:[#allocation34_spill] sm:$0xff]  ;;  %v7854_v62 = vld [vmem:[#allocation101_spill] sm:$0xff]  ;;  %v7857_v16 = vld [vmem:[#allocation80_spill] sm:$0xff] }
 0x376   : > { %7833 = vst [vmem:[#allocation69_spill] sm:$0xff] %v6107_v60  ;;  %v6115_v53 = vpop.xlane.xlu0 %1905  ;;  %7841 = vst [vmem:[#allocation24_spill] sm:$0xff] %v6121_v34  ;;  %v7847_v60 = vsub.f32 %v7845_v21, %v7846_v61  ;;  %v7856_v21 = vsub.f32 %v7656_v2, %v5709_v6 }
 0x377   : > { %7838 = vst [vmem:[#allocation133_spill] sm:$0xff] %v6115_v53  ;;  %v2219_v42 = vmul.f32 1.442695, %v7844_v32 }
 0x378   : > { %2467 = vadd.xlane.f32.xlu1 %v6117_v14  ;;  %v2185_v20 = vmul.f32 1.442695, %v7847_v60  ;;  %v6137_v14 = vpop.eup %4465  ;;  %v2221_v53 = vmul.f32 1.442695, %v7856_v21  ;;  %v7865_v21 = vsub.f32 %v7665_v30, %v5725_v8 }
 0x379   : > { %v6127_v37 = vpop.xlane.xlu1 %1879  ;;  %2433 = vadd.xlane.f32.xlu0 %v6121_v34  ;;  %7850 = vst [vmem:[#allocation134_spill] sm:$0xff] %v6137_v14  ;;  %v6141_v32 = vpop.eup %4467  ;;  %4477 = vpow2.f32 %v2219_v42  ;;  %v7855_v34 = vsub.f32 %v7853_v35, %v7854_v62  ;;  %v7863_v62 = vld [vmem:[#allocation35_spill] sm:$0xff]  ;;  %v7866_v35 = vld [vmem:[#allocation82_spill] sm:$0xff] }
 0x37a   : > { %v6135_v0 = vpop.xlane.xlu0 %1885  ;;  %7852 = vst [vmem:[#allocation27_spill] sm:$0xff] %v6141_v32  ;;  %4479 = vpow2.f32 %v2185_v20  ;;  %v7862_v20 = vld [vmem:[#allocation37_spill] sm:$0xff] }
 0x37b   : > { %7849 = vst [vmem:[#allocation70_spill] sm:$0xff] %v6135_v0  ;;  %v2215_v61 = vmul.f32 1.442695, %v7855_v34  ;;  %v2217_v0 = vmul.f32 1.442695, %v7865_v21 }
 0x37c   : > { %2463 = vadd.xlane.f32.xlu1 %v6137_v14  ;;  %v6157_v14 = vpop.eup %4469 }
 0x37d   : > { %v6147_v60 = vpop.xlane.xlu1 %1915  ;;  %2469 = vadd.xlane.f32.xlu0 %v6141_v32  ;;  %7859 = vst [vmem:[#allocation72_spill] sm:$0xff] %v6157_v14  ;;  %v6161_v34 = vpop.eup %4471  ;;  %4481 = vpow2.f32 %v2215_v61  ;;  %v7864_v32 = vsub.f32 %v7862_v20, %v7863_v62  ;;  %v7868_v61 = vld [vmem:[#allocation83_spill] sm:$0xff]  ;;  %v7871_v62 = vsub.f32 %v7673_v51, %v5741_v63  ;;  %v7872_v20 = vld [vmem:[#allocation85_spill] sm:$0xff] }
 0x37e   : > { %v6155_v7 = vpop.xlane.xlu0 %1881  ;;  %7861 = vst [vmem:[#allocation28_spill] sm:$0xff] %v6161_v34  ;;  %4483 = vpow2.f32 %v2221_v53  ;;  %v7870_v53 = vsub.f32 %v7672_v50, %v5733_v23  ;;  %v7878_v23 = vld [vmem:[#allocation86_spill] sm:$0xff] }
 0x37f   : > { %7858 = vst [vmem:[#allocation26_spill] sm:$0xff] %v6155_v7  ;;  %v2195_v2 = vmul.f32 1.442695, %v7864_v32  ;;  %v2197_v21 = vmul.f32 1.442695, %v7871_v62  ;;  %v7902_v7 = vld [vmem:[#allocation94_spill] sm:$0xff] }
 0x380   : > { %2443 = vadd.xlane.f32.xlu1 %v6157_v14  ;;  %v6177_v14 = vpop.eup %4473  ;;  %v2191_v8 = vmul.f32 1.442695, %v7870_v53  ;;  %v7877_v53 = vsub.f32 %v7679_v15, %v5757_v26 }
 0x381   : > { %v6167_v6 = vpop.xlane.xlu1 %1911  ;;  %2465 = vadd.xlane.f32.xlu0 %v6161_v34  ;;  %7867 = vst [vmem:[#allocation29_spill] sm:$0xff] %v6177_v14  ;;  %v6181_v32 = vpop.eup %4475  ;;  %4485 = vpow2.f32 %v2195_v2  ;;  %v7874_v2 = vld [vmem:[#allocation84_spill] sm:$0xff] }
 0x382   : > { %v6175_v42 = vpop.xlane.xlu0 %1917  ;;  %7869 = vst [vmem:[#allocation74_spill] sm:$0xff] %v6181_v32  ;;  %4487 = vpow2.f32 %v2217_v0  ;;  %v7876_v0 = vsub.f32 %v7677_v36, %v5749_v19  ;;  %v2193_v62 = vmul.f32 1.442695, %v7877_v53  ;;  %v7884_v19 = vld [vmem:[#allocation88_spill] sm:$0xff] }
 0x383   : > { %4489 = vpow2.f32 %v2191_v8  ;;  %v7880_v8 = vld [vmem:[#allocation87_spill] sm:$0xff] }
 0x384   : > { %2439 = vadd.xlane.f32.xlu1 %v6177_v14  ;;  %v6197_v14 = vpop.eup %4477  ;;  %v2227_v63 = vmul.f32 1.442695, %v7876_v0  ;;  %4491 = vpow2.f32 %v2197_v21  ;;  %v7882_v21 = vsub.f32 %v7683_v54, %v5767_v40  ;;  %v7883_v0 = vsub.f32 %v7685_v18, %v5775_v41  ;;  %v7890_v40 = vld [vmem:[#allocation90_spill] sm:$0xff] }
 0x385   : > { %v6187_v30 = vpop.xlane.xlu1 %1923  ;;  %2445 = vadd.xlane.f32.xlu0 %v6181_v32  ;;  %7873 = vst [vmem:[#allocation135_spill] sm:$0xff] %v6197_v14  ;;  %v6201_v50 = vpop.eup %4479 }
 0x386   : > { %v6195_v34 = vpop.xlane.xlu0 %1913  ;;  %7875 = vst [vmem:[#allocation31_spill] sm:$0xff] %v6201_v50  ;;  %4493 = vpow2.f32 %v2227_v63  ;;  %v2223_v26 = vmul.f32 1.442695, %v7882_v21  ;;  %v2229_v53 = vmul.f32 1.442695, %v7883_v0  ;;  %v7886_v63 = vld [vmem:[#allocation89_spill] sm:$0xff]  ;;  %v7889_v21 = vsub.f32 %v7691_v5, %v5795_v38 }
 0x387   : > { %4495 = vpow2.f32 %v2193_v62  ;;  %v7888_v62 = vsub.f32 %v7689_v44, %v5787_v13  ;;  %v7896_v44 = vld [vmem:[#allocation93_spill] sm:$0xff] }
 0x388   : > { %2475 = vadd.xlane.f32.xlu1 %v6197_v14  ;;  %v6217_v14 = vpop.eup %4481  ;;  %4497 = vpow2.f32 %v2223_v26  ;;  %v2225_v0 = vmul.f32 1.442695, %v7889_v21  ;;  %v7892_v26 = vld [vmem:[#allocation91_spill] sm:$0xff] }
 0x389   : > { %v6207_v51 = vpop.xlane.xlu1 %1919  ;;  %2441 = vadd.xlane.f32.xlu0 %v6201_v50  ;;  %7879 = vst [vmem:[#allocation30_spill] sm:$0xff] %v6217_v14  ;;  %v6221_v36 = vpop.eup %4483  ;;  %v2203_v41 = vmul.f32 1.442695, %v7888_v62  ;;  %4499 = vpow2.f32 %v2229_v53  ;;  %v7894_v53 = vsub.f32 %v7695_v45, %v5807_v25  ;;  %v7895_v62 = vsub.f32 %v7697_v43, %v5815_v24  ;;  %v7915_v45 = vld [vmem:[#allocation98_spill] sm:$0xff] }
 0x38a   : > { %v6215_v32 = vpop.xlane.xlu0 %1925  ;;  %7881 = vst [vmem:[#allocation32_spill] sm:$0xff] %v6221_v36 }
 0x38b   : > { %4501 = vpow2.f32 %v2203_v41  ;;  %v2199_v38 = vmul.f32 1.442695, %v7894_v53  ;;  %v2205_v21 = vmul.f32 1.442695, %v7895_v62  ;;  %v7898_v41 = vld [vmem:[#allocation92_spill] sm:$0xff]  ;;  %v7901_v53 = vsub.f32 %v7703_v46, %v5835_v17 }
 0x38c   : > { %2471 = vadd.xlane.f32.xlu1 %v6217_v14  ;;  %v6237_v14 = vpop.eup %4485  ;;  %4503 = vpow2.f32 %v2225_v0  ;;  %v7900_v0 = vsub.f32 %v7701_v47, %v5827_v9 }
 0x38d   : > { %v6227_v15 = vpop.xlane.xlu1 %1955  ;;  %2477 = vadd.xlane.f32.xlu0 %v6221_v36  ;;  %7885 = vst [vmem:[#allocation136_spill] sm:$0xff] %v6237_v14  ;;  %v6241_v54 = vpop.eup %4487  ;;  %4505 = vpow2.f32 %v2199_v38  ;;  %v2201_v62 = vmul.f32 1.442695, %v7901_v53  ;;  %v7904_v38 = vld [vmem:[#allocation95_spill] sm:$0xff] }
 0x38e   : > { %v6235_v50 = vpop.xlane.xlu0 %1921  ;;  %7887 = vst [vmem:[#allocation33_spill] sm:$0xff] %v6241_v54  ;;  %v2235_v24 = vmul.f32 1.442695, %v7900_v0  ;;  %4507 = vpow2.f32 %v2205_v21  ;;  %v7906_v21 = vsub.f32 %v7707_v49, %v5847_v29  ;;  %v7908_v0 = vsub.f32 %v7709_v48, %v5855_v22 }
 0x390   : > { %2451 = vadd.xlane.f32.xlu1 %v6237_v14  ;;  %v6257_v14 = vpop.eup %4489  ;;  %4509 = vpow2.f32 %v2235_v24  ;;  %v2231_v17 = vmul.f32 1.442695, %v7906_v21  ;;  %v2237_v53 = vmul.f32 1.442695, %v7908_v0  ;;  %v7911_v24 = vld [vmem:[#allocation97_spill] sm:$0xff]  ;;  %v7914_v21 = vsub.f32 %v7715_v52, %v5875_v12 }
 0x391   : > { %v6247_v18 = vpop.xlane.xlu1 %1951  ;;  %2473 = vadd.xlane.f32.xlu0 %v6241_v54  ;;  %7891 = vst [vmem:[#allocation137_spill] sm:$0xff] %v6257_v14  ;;  %v6261_v13 = vpop.eup %4491  ;;  %4511 = vpow2.f32 %v2201_v62  ;;  %v7913_v62 = vsub.f32 %v7713_v55, %v5867_v11 }
 0x392   : > { %v6255_v36 = vpop.xlane.xlu0 %1957  ;;  %7893 = vst [vmem:[#allocation78_spill] sm:$0xff] %v6261_v13  ;;  %4513 = vpow2.f32 %v2231_v17  ;;  %v2233_v0 = vmul.f32 1.442695, %v7914_v21  ;;  %v7923_v21 = vld [vmem:[#allocation41_spill] sm:$0xff] }
 0x393   : > { %v2243_v22 = vmul.f32 1.442695, %v7913_v62  ;;  %4515 = vpow2.f32 %v2237_v53  ;;  %v7920_v53 = vsub.f32 %v7720_v56, %v5887_v10  ;;  %v7922_v62 = vld [vmem:[#allocation55_spill] sm:$0xff] }
 0x394   : > { %2447 = vadd.xlane.f32.xlu1 %v6257_v14  ;;  %v6277_v14 = vpop.eup %4493  ;;  %v7924_v49 = vsub.f32 %v7922_v62, %v7923_v21  ;;  %v7931_v62 = vld [vmem:[#allocation57_spill] sm:$0xff]  ;;  %v7932_v21 = vld [vmem:[#allocation43_spill] sm:$0xff] }
 0x395   : > { %v6267_v5 = vpop.xlane.xlu1 %1931  ;;  %2453 = vadd.xlane.f32.xlu0 %v6261_v13  ;;  %7897 = vst [vmem:[#allocation34_spill] sm:$0xff] %v6277_v14  ;;  %v6281_v25 = vpop.eup %4495  ;;  %4517 = vpow2.f32 %v2243_v22  ;;  %v2239_v12 = vmul.f32 1.442695, %v7920_v53  ;;  %v7927_v22 = vld [vmem:[#allocation100_spill] sm:$0xff] }
 0x396   : > { %v6275_v54 = vpop.xlane.xlu0 %1953  ;;  %7899 = vst [vmem:[#allocation101_spill] sm:$0xff] %v6281_v25  ;;  %4519 = vpow2.f32 %v2233_v0  ;;  %v7929_v0 = vsub.f32 %v7729_v58, %v5907_v31  ;;  %v7967_v58 = vld [vmem:[#allocation54_spill] sm:$0xff] }
 0x397   : > { %4521 = vpow2.f32 %v2239_v12 }
 0x398   : > { %2483 = vadd.xlane.f32.xlu1 %v6277_v14  ;;  %v6297_v14 = vpop.eup %4497  ;;  %v2275_v53 = vmul.f32 1.442695, %v7929_v0  ;;  %v7940_v0 = vld [vmem:[#allocation46_spill] sm:$0xff] }
 0x399   : > { %v6287_v43 = vpop.xlane.xlu1 %1927  ;;  %2449 = vadd.xlane.f32.xlu0 %v6281_v25  ;;  %7903 = vst [vmem:[#allocation80_spill] sm:$0xff] %v6297_v14  ;;  %v6301_v9 = vpop.eup %4499 }
 0x39a   : > { %v6295_v13 = vpop.xlane.xlu0 %1933  ;;  %7905 = vst [vmem:[#allocation37_spill] sm:$0xff] %v6301_v9 }
 0x39c   : > { %2479 = vadd.xlane.f32.xlu1 %v6297_v14  ;;  %v6317_v14 = vpop.eup %4501 }
 0x39d   : > { %v6307_v46 = vpop.xlane.xlu1 %1963  ;;  %2485 = vadd.xlane.f32.xlu0 %v6301_v9  ;;  %7910 = vst [vmem:[#allocation82_spill] sm:$0xff] %v6317_v14  ;;  %v6321_v29 = vpop.eup %4503 }
 0x39e   : > { %7907 = vst [vmem:[#allocation35_spill] sm:$0xff] %v6307_v46  ;;  %v6315_v25 = vpop.xlane.xlu0 %1929  ;;  %7912 = vst [vmem:[#allocation83_spill] sm:$0xff] %v6321_v29 }
 0x3a0   : > { %2459 = vadd.xlane.f32.xlu1 %v6317_v14  ;;  %v6337_v14 = vpop.eup %4505 }
 0x3a1   : > { %v6327_v48 = vpop.xlane.xlu1 %1959  ;;  %2481 = vadd.xlane.f32.xlu0 %v6321_v29  ;;  %7917 = vst [vmem:[#allocation84_spill] sm:$0xff] %v6337_v14  ;;  %v6341_v11 = vpop.eup %4507  ;;  %v2245_v29 = vmul.f32 1.442695, %v7924_v49 }
 0x3a2   : > { %v6335_v9 = vpop.xlane.xlu0 %1965  ;;  %7919 = vst [vmem:[#allocation86_spill] sm:$0xff] %v6341_v11 }
 0x3a3   : > { %7916 = vst [vmem:[#allocation85_spill] sm:$0xff] %v6335_v9  ;;  %4523 = vpow2.f32 %v2245_v29  ;;  %v7933_v9 = vsub.f32 %v7931_v62, %v7932_v21  ;;  %v7939_v29 = vld [vmem:[#allocation58_spill] sm:$0xff]  ;;  %v7943_v21 = vld [vmem:[#allocation59_spill] sm:$0xff] }
 0x3a4   : > { %2455 = vadd.xlane.f32.xlu1 %v6337_v14  ;;  %v6357_v14 = vpop.eup %4509  ;;  %4525 = vpow2.f32 %v2275_v53 }
 0x3a5   : > { %v6347_v52 = vpop.xlane.xlu1 %1939  ;;  %2461 = vadd.xlane.f32.xlu0 %v6341_v11  ;;  %7926 = vst [vmem:[#allocation88_spill] sm:$0xff] %v6357_v14  ;;  %v6361_v10 = vpop.eup %4511  ;;  %v2241_v11 = vmul.f32 1.442695, %v7933_v9 }
 0x3a6   : > { %7921 = vst [vmem:[#allocation87_spill] sm:$0xff] %v6347_v52  ;;  %v6355_v17 = vpop.xlane.xlu0 %1961  ;;  %7928 = vst [vmem:[#allocation89_spill] sm:$0xff] %v6361_v10  ;;  %v7944_v52 = vld [vmem:[#allocation47_spill] sm:$0xff] }
 0x3a7   : > { %4527 = vpow2.f32 %v2241_v11  ;;  %v7951_v11 = vld [vmem:[#allocation50_spill] sm:$0xff] }
 0x3a8   : > { %2491 = vadd.xlane.f32.xlu1 %v6357_v14  ;;  %v6377_v14 = vpop.eup %4513 }
 0x3a9   : > { %v6367_v49 = vpop.xlane.xlu1 %1935  ;;  %2457 = vadd.xlane.f32.xlu0 %v6361_v10  ;;  %7936 = vst [vmem:[#allocation93_spill] sm:$0xff] %v6377_v14  ;;  %v6381_v31 = vpop.eup %4515  ;;  %v7941_v10 = vsub.f32 %v7939_v29, %v7940_v0  ;;  %v7952_v0 = vsub.f32 %v7751_v33, %v7951_v11 }
 0x3aa   : > { %7930 = vst [vmem:[#allocation90_spill] sm:$0xff] %v6367_v49  ;;  %v6375_v55 = vpop.xlane.xlu0 %1941  ;;  %7938 = vst [vmem:[#allocation92_spill] sm:$0xff] %v6381_v31  ;;  %v7945_v49 = vsub.f32 %v7943_v21, %v7944_v52  ;;  %v7954_v21 = vld [vmem:[#allocation60_spill] sm:$0xff] }
 0x3ab   : > { %7935 = vst [vmem:[#allocation91_spill] sm:$0xff] %v6375_v55  ;;  %v2271_v62 = vmul.f32 1.442695, %v7941_v10  ;;  %v2251_v52 = vmul.f32 1.442695, %v7952_v0  ;;  %v7955_v55 = vld [vmem:[#allocation51_spill] sm:$0xff] }
 0x3ac   : > { %2487 = vadd.xlane.f32.xlu1 %v6377_v14  ;;  %v2277_v56 = vmul.f32 1.442695, %v7945_v49  ;;  %v6397_v14 = vpop.eup %4517  ;;  %v7963_v0 = vld [vmem:[#allocation125_spill] sm:$0xff] }
 0x3ad   : > { %v6387_v9 = vpop.xlane.xlu1 %1971  ;;  %2493 = vadd.xlane.f32.xlu0 %v6381_v31  ;;  %7948 = vst [vmem:[#allocation97_spill] sm:$0xff] %v6397_v14  ;;  %v6401_v10 = vpop.eup %4519  ;;  %4529 = vpow2.f32 %v2271_v62  ;;  %v7956_v31 = vsub.f32 %v7954_v21, %v7955_v55  ;;  %v7966_v21 = vld [vmem:[#allocation63_spill] sm:$0xff] }
 0x3ae   : > { %7942 = vst [vmem:[#allocation94_spill] sm:$0xff] %v6387_v9  ;;  %v6395_v12 = vpop.xlane.xlu0 %1937  ;;  %7950 = vst [vmem:[#allocation98_spill] sm:$0xff] %v6401_v10  ;;  %4531 = vpow2.f32 %v2277_v56  ;;  %v7962_v56 = vld [vmem:[#allocation62_spill] sm:$0xff] }
 0x3af   : > { %7947 = vst [vmem:[#allocation95_spill] sm:$0xff] %v6395_v12  ;;  %v2273_v9 = vmul.f32 1.442695, %v7956_v31  ;;  %4533 = vpow2.f32 %v2251_v52 }
 0x3b0   : > { %2499 = vadd.xlane.f32.xlu1 %v6397_v14  ;;  %v6417_v14 = vpop.eup %4521 }
 0x3b1   : > { %v6407_v49 = vpop.xlane.xlu1 %1967  ;;  %2489 = vadd.xlane.f32.xlu0 %v6401_v10  ;;  %7959 = vst [vmem:[#allocation100_spill] sm:$0xff] %v6417_v14  ;;  %v6421_v11 = vpop.eup %4523  ;;  %v7964_v10 = vsub.f32 %v7962_v56, %v7963_v0  ;;  %4535 = vpow2.f32 %v2273_v9  ;;  %v7974_v9 = vsub.f32 %v7773_v39, %v5987_v57  ;;  %v7976_v0 = vld [vmem:[#allocation65_spill] sm:$0xff] }
 0x3b2   : > { %7953 = vst [vmem:[#allocation55_spill] sm:$0xff] %v6407_v49  ;;  %v6415_v12 = vpop.xlane.xlu0 %1973  ;;  %7961 = vst [vmem:[#allocation57_spill] sm:$0xff] %v6421_v11  ;;  %v7968_v49 = vsub.f32 %v7966_v21, %v7967_v58  ;;  %v7977_v21 = vld [vmem:[#allocation56_spill] sm:$0xff] }
 0x3b3   : > { %7958 = vst [vmem:[#allocation41_spill] sm:$0xff] %v6415_v12  ;;  %v2247_v55 = vmul.f32 1.442695, %v7964_v10  ;;  %v2283_v58 = vmul.f32 1.442695, %v7974_v9  ;;  %v7978_v12 = vsub.f32 %v7976_v0, %v7977_v21  ;;  %v7985_v9 = vld [vmem:[#allocation14_spill] sm:$0xff] }
 0x3b4   : > { %2495 = vadd.xlane.f32.xlu1 %v6417_v14  ;;  %v2253_v29 = vmul.f32 1.442695, %v7968_v49  ;;  %v6437_v14 = vpop.eup %4525  ;;  %v7987_v21 = vld [vmem:[#allocation67_spill] sm:$0xff] }
 0x3b5   : > { %v6427_v31 = vpop.xlane.xlu1 %1943  ;;  %2501 = vadd.xlane.f32.xlu0 %v6421_v11  ;;  %7971 = vst [vmem:[#allocation46_spill] sm:$0xff] %v6437_v14  ;;  %v6441_v10 = vpop.eup %4527  ;;  %4537 = vpow2.f32 %v2247_v55  ;;  %v2249_v11 = vmul.f32 1.442695, %v7978_v12 }
 0x3b6   : > { %7965 = vst [vmem:[#allocation43_spill] sm:$0xff] %v6427_v31  ;;  %v6435_v62 = vpop.xlane.xlu0 %1969  ;;  %7973 = vst [vmem:[#allocation59_spill] sm:$0xff] %v6441_v10  ;;  %4539 = vpow2.f32 %v2253_v29  ;;  %v7984_v29 = vld [vmem:[#allocation66_spill] sm:$0xff]  ;;  %v7988_v31 = vld [vmem:[#allocation127_spill] sm:$0xff] }
 0x3b7   : > { %7970 = vst [vmem:[#allocation58_spill] sm:$0xff] %v6435_v62  ;;  %4541 = vpow2.f32 %v2283_v58 }
 0x3b8   : > { %2531 = vadd.xlane.f32.xlu1 %v6437_v14  ;;  %v6457_v14 = vpop.eup %4529  ;;  %4543 = vpow2.f32 %v2249_v11 }
 0x3b9   : > { %v6447_v49 = vpop.xlane.xlu1 %1975  ;;  %2497 = vadd.xlane.f32.xlu0 %v6441_v10  ;;  %7981 = vst [vmem:[#allocation60_spill] sm:$0xff] %v6457_v14  ;;  %v6461_v57 = vpop.eup %4531  ;;  %v7986_v10 = vsub.f32 %v7984_v29, %v7985_v9  ;;  %v7994_v29 = vld [vmem:[#allocation61_spill] sm:$0xff] }
 0x3ba   : > { %7975 = vst [vmem:[#allocation47_spill] sm:$0xff] %v6447_v49  ;;  %v6455_v33 = vpop.xlane.xlu0 %1945  ;;  %7983 = vst [vmem:[#allocation51_spill] sm:$0xff] %v6461_v57  ;;  %v7989_v49 = vsub.f32 %v7987_v21, %v7988_v31  ;;  %v6473_v39 = vpop.eup %4533  ;;  %v7996_v31 = vld [vmem:[#allocation68_spill] sm:$0xff] }
 0x3bb   : > { %7980 = vst [vmem:[#allocation50_spill] sm:$0xff] %v6455_v33  ;;  %v2279_v0 = vmul.f32 1.442695, %v7986_v10  ;;  %7991 = vst [vmem:[#allocation125_spill] sm:$0xff] %v6473_v39  ;;  %v6477_v58 = vpop.eup %4535  ;;  %v7995_v10 = vsub.f32 %v7795_v59, %v7994_v29  ;;  %v8001_v59 = vld [vmem:[#allocation18_spill] sm:$0xff] }
 0x3bc   : > { %2527 = vadd.xlane.f32.xlu1 %v6457_v14  ;;  %v2285_v56 = vmul.f32 1.442695, %v7989_v49  ;;  %7993 = vst [vmem:[#allocation63_spill] sm:$0xff] %v6477_v58  ;;  %v7997_v49 = vld [vmem:[#allocation16_spill] sm:$0xff]  ;;  %v8002_v29 = vsub.f32 %v7806_v27, %v8001_v59 }
 0x3bd   : > { %v2372_v12 = vpop.xlane.xlu1 %2371  ;;  %2533 = vadd.xlane.f32.xlu0 %v6461_v57  ;;  %v2259_v9 = vmul.f32 1.442695, %v7995_v10  ;;  %4545 = vpow2.f32 %v2279_v0  ;;  %v7998_v21 = vsub.f32 %v7996_v31, %v7997_v49  ;;  %v8003_v0 = vld [vmem:[#allocation71_spill] sm:$0xff]  ;;  %v8006_v31 = vsub.f32 %v7816_v3, %v6067_v4 }
 0x3be   : > { %v6471_v62 = vpop.xlane.xlu0 %1977  ;;  %4547 = vpow2.f32 %v2285_v56  ;;  %v2255_v10 = vmul.f32 1.442695, %v8002_v29 }
 0x3bf   : > { %7990 = vst [vmem:[#allocation62_spill] sm:$0xff] %v6471_v62  ;;  %v2281_v57 = vmul.f32 1.442695, %v7998_v21  ;;  %v6487_v52 = vpop.eup %4537  ;;  %4549 = vpow2.f32 %v2259_v9  ;;  %v2291_v49 = vmul.f32 1.442695, %v8006_v31 }
 0x3c0   : > { %2507 = vadd.xlane.f32.xlu1 %v6473_v39  ;;  %7999 = vst [vmem:[#allocation54_spill] sm:$0xff] %v6487_v52  ;;  %v6489_v14 = vpop.eup %4539  ;;  %v8004_v39 = vld [vmem:[#allocation129_spill] sm:$0xff] }
 0x3c1   : > { %v2368_v11 = vpop.xlane.xlu1 %2367  ;;  %2529 = vadd.xlane.f32.xlu0 %v6477_v58  ;;  %8000 = vst [vmem:[#allocation65_spill] sm:$0xff] %v6489_v14  ;;  %v8005_v58 = vsub.f32 %v8003_v0, %v8004_v39  ;;  %v6502_v21 = vpop.eup %4541  ;;  %v8014_v0 = vld [vmem:[#allocation22_spill] sm:$0xff] }
 0x3c2   : > { %v2374_v55 = vpop.xlane.xlu0 %2373  ;;  %4551 = vrcp.f32 %v2368_v11  ;;  %8007 = vst [vmem:[#allocation56_spill] sm:$0xff] %v6502_v21  ;;  %v6504_v27 = vpop.eup %4543 }
 0x3c3   : > { %v2261_v56 = vmul.f32 1.442695, %v8005_v58  ;;  %4553 = vpow2.f32 %v2281_v57  ;;  %8008 = vst [vmem:[#allocation66_spill] sm:$0xff] %v6504_v27  ;;  %v8009_v58 = vld [vmem:[#allocation73_spill] sm:$0xff]  ;;  %v8010_v57 = vld [vmem:[#allocation64_spill] sm:$0xff] }
 0x3c4   : > { %2503 = vadd.xlane.f32.xlu1 %v6487_v52  ;;  %v8011_v11 = vsub.f32 %v8009_v58, %v8010_v57 }
 0x3c5   : > { %v2404_v62 = vpop.xlane.xlu1 %2403  ;;  %2509 = vadd.xlane.f32.xlu0 %v6489_v14 }
 0x3c6   : > { %v2370_v9 = vpop.xlane.xlu0 %2369  ;;  %v2257_v59 = vmul.f32 1.442695, %v8011_v11  ;;  %v8020_v11 = vld [vmem:[#allocation69_spill] sm:$0xff] }
 0x3c7   : > { %4555 = vrcp.f32 %v2370_v9  ;;  %v6511_v4 = vpop.eup %4545  ;;  %v8017_v9 = vld [vmem:[#allocation131_spill] sm:$0xff] }
 0x3c8   : > { %4557 = vpow2.f32 %v2255_v10  ;;  %2539 = vadd.xlane.f32.xlu1 %v6502_v21  ;;  %8012 = vst [vmem:[#allocation14_spill] sm:$0xff] %v6511_v4  ;;  %v6513_v29 = vpop.eup %4547  ;;  %v8015_v10 = vsub.f32 %v7826_v1, %v8014_v0 }
 0x3c9   : > { %4559 = vpow2.f32 %v2261_v56  ;;  %v2400_v39 = vpop.xlane.xlu1 %2399  ;;  %2505 = vadd.xlane.f32.xlu0 %v6504_v27  ;;  %8013 = vst [vmem:[#allocation67_spill] sm:$0xff] %v6513_v29  ;;  %v8016_v56 = vld [vmem:[#allocation75_spill] sm:$0xff]  ;;  %v6523_v57 = vpop.eup %4549 }
 0x3ca   : > { %4561 = vpow2.f32 %v2291_v49  ;;  %v2406_v3 = vpop.xlane.xlu0 %2405  ;;  %v2287_v31 = vmul.f32 1.442695, %v8015_v10  ;;  %v8018_v49 = vsub.f32 %v8016_v56, %v8017_v9  ;;  %v8023_v10 = vld [vmem:[#allocation115_spill] sm:$0xff] }
 0x3cb   : > { %4563 = vrcp.f32 %v2374_v55  ;;  %v8019_v55 = vld [vmem:[#allocation77_spill] sm:$0xff] }
 0x3cc   : > { %4565 = vrcp.f32 %v2372_v12  ;;  %2535 = vadd.xlane.f32.xlu1 %v6511_v4  ;;  %v2293_v21 = vmul.f32 1.442695, %v8018_v49  ;;  %v8021_v14 = vsub.f32 %v8019_v55, %v8020_v11  ;;  %v4552_v0 = vpop.eup %4551  ;;  %v8026_v49 = vld [vmem:[#allocation133_spill] sm:$0xff]  ;;  %v8029_v4 = vld [vmem:[#allocation36_spill] sm:$0xff] }
 0x3cd   : > { %4567 = vrcp.f32 %v2400_v39  ;;  %v2380_v58 = vpop.xlane.xlu1 %2379  ;;  %2541 = vadd.xlane.f32.xlu0 %v6513_v29  ;;  %v6528_v12 = vpop.eup %4553  ;;  %v8028_v29 = vld [vmem:[#allocation102_spill] sm:$0xff] }
 0x3ce   : > { %4569 = vpow2.f32 %v2257_v59  ;;  %v2267_v27 = vmul.f32 1.442695, %v8021_v14  ;;  %v2402_v1 = vpop.xlane.xlu0 %2401  ;;  %8022 = vst [vmem:[#allocation127_spill] sm:$0xff] %v6528_v12  ;;  %v8025_v59 = vld [vmem:[#allocation76_spill] sm:$0xff] }
 0x3cf   : > { %4571 = vrcp.f32 %v2402_v1  ;;  %v8027_v55 = vsub.f32 %v8025_v59, %v8026_v49  ;;  %v2751_v1 = vmul.f32 %v4552_v0, %v8028_v29  ;;  %v8032_v49 = vld [vmem:[#allocation79_spill] sm:$0xff]  ;;  %v8035_v0 = vld [vmem:[#allocation118_spill] sm:$0xff] }
 0x3d0   : > { %4573 = vpow2.f32 %v2287_v31  ;;  %1947 = vmax.xlane.f32.xlu1 %v8023_v10 }
 0x3d1   : > { %v4556_v56 = vpop.eup %4555  ;;  %4575 = vpow2.f32 %v2293_v21  ;;  %v2376_v39 = vpop.xlane.xlu1 %2375  ;;  %2537 = vadd.xlane.f32.xlu0 %v6528_v12  ;;  %v2289_v14 = vmul.f32 1.442695, %v8027_v55  ;;  %v8030_v21 = vsub.f32 %v7848_v28, %v6127_v37  ;;  %v8033_v55 = vld [vmem:[#allocation70_spill] sm:$0xff]  ;;  %v8036_v28 = vsub.f32 %v7857_v16, %v6147_v60 }
 0x3d2   : > { %v6532_v9 = vpop.eup %4557  ;;  %4577 = vpow2.f32 %v2267_v27  ;;  %v2382_v11 = vpop.xlane.xlu0 %2381  ;;  %v2752_v52 = vmul.f32 %v4556_v56, %v8029_v4  ;;  %v8031_v27 = vld [vmem:[#allocation120_spill] sm:$0xff]  ;;  %v8034_v53 = vsub.f32 %v8032_v49, %v8033_v55  ;;  %v8040_v49 = vld [vmem:[#allocation26_spill] sm:$0xff] }
 0x3d3   : > { %8024 = vst [vmem:[#allocation61_spill] sm:$0xff] %v6532_v9  ;;  %v6539_v31 = vpop.eup %4559  ;;  %4579 = vrcp.f32 %v2406_v3  ;;  %v2263_v12 = vmul.f32 1.442695, %v8030_v21  ;;  %v2299_v37 = vmul.f32 1.442695, %v8036_v28 }
 0x3d4   : > { %v6541_v10 = vpop.eup %4561  ;;  %4581 = vrcp.f32 %v2404_v62  ;;  %1979 = vmax.xlane.f32.xlu1 %v8031_v27  ;;  %v2879_v33 = vpack.c.bf16 %v2752_v52, %v2751_v1  ;;  %v2269_v29 = vmul.f32 1.442695, %v8034_v53  ;;  %v8037_v52 = vmov 0.0   ;;  %v8038_v53 = vld [vmem:[#allocation8_spill] sm:$0xff] }
 0x3d5   : > { %v4564_v59 = vpop.eup %4563  ;;  %4583 = vrcp.f32 %v2376_v39  ;;  %v6550_v4 = vpop.xlane.xlu1 %2411  ;;  %1949 = vmax.xlane.f32.xlu0 %v8035_v0  ;;  %v8043_v0 = vld [vmem:[#allocation7_spill] sm:$0xff] }
 0x3d6   : > { %v4566_v3 = vpop.eup %4565  ;;  %4585 = vpow2.f32 %v2289_v14  ;;  %4063 = vmatpush3.bf16.xpose.msra.mxu1 %v2879_v33  ;;  %v2378_v62 = vpop.xlane.xlu0 %2377  ;;  %v2754_v39 = vmul.f32 %v4564_v59, %v8038_v53  ;;  %v8039_v14 = vld [vmem:[#allocation81_spill] sm:$0xff]  ;;  %v8042_v33 = vld [vmem:[#allocation122_spill] sm:$0xff]  ;;  %v8046_v53 = vsub.f32 %v7866_v35, %v6167_v6  ;;  %v8048_v35 = vsub.f32 %v7872_v20, %v6187_v30 }
 0x3d7   : > { %v4568_v56 = vpop.eup %4567  ;;  %4587 = vrcp.f32 %v2378_v62  ;;  %4064 = vmatprep.subr.bf16.mxu1 %v8037_v52  ;;  %v8041_v55 = vsub.f32 %v8039_v14, %v8040_v49  ;;  %v2753_v27 = vmul.f32 %v4566_v3, %v8043_v0  ;;  %v8047_v0 = vsub.f32 %v7868_v61, %v6175_v42  ;;  %v8049_v61 = vld [vmem:[#allocation105_spill] sm:$0xff] }
 0x3d8   : > { %v6557_v1 = vpop.eup %4569  ;;  %4589 = vpow2.f32 %v2263_v12  ;;  %2511 = vadd.xlane.f32.xlu1 %v6532_v9  ;;  %v8044_v12 = vld [vmem:[#allocation9_spill] sm:$0xff]  ;;  %v8045_v9 = vld [vmem:[#allocation111_spill] sm:$0xff]  ;;  %v2295_v14 = vmul.f32 1.442695, %v8046_v53  ;;  %v2307_v6 = vmul.f32 1.442695, %v8048_v35  ;;  %v8050_v20 = vsub.f32 %v7874_v2, %v6195_v34 }
 0x3d9   : > { %v4572_v21 = vpop.eup %4571  ;;  %4591 = vpow2.f32 %v2269_v29  ;;  %v2265_v16 = vmul.f32 1.442695, %v8041_v55  ;;  %v2408_v60 = vpop.xlane.xlu1 %2407  ;;  %1981 = vmax.xlane.f32.xlu0 %v8042_v33  ;;  %v2767_v46 = vmul.f32 %v4568_v56, %v8044_v12  ;;  %v2301_v3 = vmul.f32 1.442695, %v8047_v0  ;;  %v8052_v12 = vld [vmem:[#allocation40_spill] sm:$0xff] }
 0x3da   : > { %v6565_v28 = vpop.eup %4573  ;;  %4593 = vpow2.f32 %v2299_v37  ;;  %v2414_v62 = vpop.xlane.xlu0 %2413  ;;  %v2768_v47 = vmul.f32 %v4572_v21, %v8045_v9  ;;  %v2880_v37 = vpack.c.bf16 %v2754_v39, %v2753_v27  ;;  %v2297_v30 = vmul.f32 1.442695, %v8050_v20 }
 0x3db   : > { %v6570_v59 = vpop.eup %4575  ;;  %4595 = vrcp.f32 %v2382_v11  ;;  %v8054_v34 = vsub.f32 %v7878_v23, %v6207_v51 }
 0x3dc   : > { %v6572_v29 = vpop.eup %4577  ;;  %4597 = vrcp.f32 %v2380_v58  ;;  %2543 = vadd.xlane.f32.xlu1 %v6565_v28  ;;  %v2887_v49 = vpack.c.bf16 %v2768_v47, %v2767_v46 }
 0x3dd   : > { %v4580_v55 = vpop.eup %4579  ;;  %4599 = vrcp.f32 %v2408_v60  ;;  %v6581_v9 = vpop.xlane.xlu1 %2387  ;;  %2513 = vadd.xlane.f32.xlu0 %v6557_v1  ;;  %v2303_v2 = vmul.f32 1.442695, %v8054_v34 }
 0x3de   : > { %v4582_v11 = vpop.eup %4581  ;;  %4601 = vpow2.f32 %v2265_v16  ;;  %4065 = vmatpush3.bf16.xpose.msra.mxu1 %v2880_v37  ;;  %4083 = vmatpush3.bf16.xpose.msra.mxu0 %v2887_v49  ;;  %v2410_v58 = vpop.xlane.xlu0 %2409  ;;  %v2770_v46 = vmul.f32 %v4580_v55, %v8049_v61  ;;  %v8051_v16 = vld [vmem:[#allocation38_spill] sm:$0xff] }
 0x3df   : > { %v4584_v47 = vpop.eup %4583  ;;  %4603 = vrcp.f32 %v2410_v58  ;;  %4066 = vmatprep.subr.bf16.mxu1 %v8037_v52  ;;  %4084 = vmatprep.subr.bf16.mxu0 %v8037_v52 }
 0x3e0   : > { %v6589_v42 = vpop.eup %4585  ;;  %4605 = vpow2.f32 %v2295_v14  ;;  %2515 = vadd.xlane.f32.xlu1 %v6523_v57  ;;  %v2755_v60 = vmul.f32 %v4584_v47, %v8051_v16  ;;  %v8053_v14 = vld [vmem:[#allocation107_spill] sm:$0xff] }
 0x3e1   : > { %v4588_v27 = vpop.eup %4587  ;;  %4607 = vpow2.f32 %v2301_v3  ;;  %v2384_v56 = vpop.xlane.xlu1 %2383  ;;  %2545 = vadd.xlane.f32.xlu0 %v6589_v42  ;;  %v2769_v37 = vmul.f32 %v4582_v11, %v8053_v14 }
 0x3e2   : > { %v6597_v39 = vpop.eup %4589  ;;  %4609 = vpow2.f32 %v2307_v6  ;;  %v2390_v21 = vpop.xlane.xlu0 %2389  ;;  %v2756_v53 = vmul.f32 %v4588_v27, %v8052_v12  ;;  %v8055_v6 = vsub.f32 %v7880_v8, %v6215_v32  ;;  %v8056_v32 = vld [vmem:[#allocation39_spill] sm:$0xff]  ;;  %v8057_v27 = vsub.f32 %v7884_v19, %v6227_v15 }
 0x3e3   : > { %v6602_v49 = vpop.eup %4591  ;;  %4611 = vrcp.f32 %v2414_v62  ;;  %v2888_v3 = vpack.c.bf16 %v2770_v46, %v2769_v37 }
 0x3e4   : > { %v6604_v55 = vpop.eup %4593  ;;  %4613 = vrcp.f32 %v6550_v4  ;;  %2547 = vadd.xlane.f32.xlu1 %v6541_v10  ;;  %v2881_v0 = vpack.c.bf16 %v2756_v53, %v2755_v60  ;;  %v2309_v11 = vmul.f32 1.442695, %v8055_v6  ;;  %v2339_v20 = vmul.f32 1.442695, %v8057_v27  ;;  %v8059_v60 = vld [vmem:[#allocation117_spill] sm:$0xff]  ;;  %v8060_v53 = vld [vmem:[#allocation44_spill] sm:$0xff] }
 0x3e5   : > { %v4596_v35 = vpop.eup %4595  ;;  %4615 = vrcp.f32 %v2384_v56  ;;  %v6614_v58 = vpop.xlane.xlu1 %2419  ;;  %2517 = vadd.xlane.f32.xlu0 %v6539_v31  ;;  %v8058_v56 = vld [vmem:[#allocation10_spill] sm:$0xff] }
 0x3e6   : > { %v4598_v62 = vpop.eup %4597  ;;  %4617 = vpow2.f32 %v2297_v30  ;;  %4067 = vmatpush3.bf16.xpose.msra.mxu1 %v2881_v0  ;;  %4085 = vmatpush3.bf16.xpose.msra.mxu0 %v2888_v3  ;;  %v2386_v23 = vpop.xlane.xlu0 %2385  ;;  %v2758_v8 = vmul.f32 %v4596_v35, %v8056_v32  ;;  %v8062_v35 = vsub.f32 %v7890_v40, %v6247_v18  ;;  %v8063_v40 = vld [vmem:[#allocation42_spill] sm:$0xff]  ;;  %v8064_v32 = vsub.f32 %v7898_v41, %v6275_v54 }
 0x3e7   : > { %v4600_v51 = vpop.eup %4599  ;;  %4619 = vrcp.f32 %v2386_v23  ;;  %4068 = vmatprep.subr.bf16.mxu1 %v8037_v52  ;;  %4086 = vmatprep.subr.bf16.mxu0 %v8037_v52  ;;  %v2757_v16 = vmul.f32 %v4598_v62, %v8058_v56 }
 0x3e8   : > { %v6619_v4 = vpop.eup %4601  ;;  %4621 = vpow2.f32 %v2303_v2  ;;  %2519 = vadd.xlane.f32.xlu1 %v6597_v39  ;;  %v2771_v12 = vmul.f32 %v4600_v51, %v8059_v60  ;;  %v8061_v2 = vsub.f32 %v7886_v63, %v6235_v50  ;;  %v2335_v6 = vmul.f32 1.442695, %v8062_v35 }
 0x3e9   : > { %v4604_v47 = vpop.eup %4603  ;;  %4623 = vpow2.f32 %v2309_v11  ;;  %v2416_v61 = vpop.xlane.xlu1 %2415  ;;  %2549 = vadd.xlane.f32.xlu0 %v6570_v59  ;;  %v2882_v19 = vpack.c.bf16 %v2758_v8, %v2757_v16  ;;  %v2337_v8 = vmul.f32 1.442695, %v8064_v32  ;;  %v8067_v16 = vld [vmem:[#allocation113_spill] sm:$0xff]  ;;  %v8075_v32 = vld [vmem:[#allocation126_spill] sm:$0xff] }
 0x3ea   : > { %v6624_v46 = vpop.eup %4605  ;;  %v2422_v30 = vpop.xlane.xlu0 %2421  ;;  %v2772_v14 = vmul.f32 %v4604_v47, %v8060_v53  ;;  %4625 = vrcp.f32 %v2390_v21  ;;  %v2305_v0 = vmul.f32 1.442695, %v8061_v2  ;;  %v8068_v53 = vsub.f32 %v7892_v26, %v6255_v36 }
 0x3eb   : > { %v6632_v37 = vpop.eup %4607  ;;  %4627 = vrcp.f32 %v6581_v9  ;;  %v8070_v36 = vsub.f32 %v7902_v7, %v6287_v43  ;;  %v8072_v7 = vsub.f32 %v7904_v38, %v6295_v13  ;;  %v8076_v13 = vsub.f32 %v7911_v24, %v6315_v25 }
 0x3ec   : > { %v6634_v34 = vpop.eup %4609  ;;  %2551 = vadd.xlane.f32.xlu1 %v6624_v46  ;;  %v2889_v15 = vpack.c.bf16 %v2772_v14, %v2771_v12  ;;  %4629 = vrcp.f32 %v2416_v61  ;;  %v8065_v61 = vld [vmem:[#allocation48_spill] sm:$0xff]  ;;  %v2341_v14 = vmul.f32 1.442695, %v8068_v53 }
 0x3ed   : > { %v4612_v3 = vpop.eup %4611  ;;  %v6644_v11 = vpop.xlane.xlu1 %2395  ;;  %2521 = vadd.xlane.f32.xlu0 %v6619_v4  ;;  %4631 = vpow2.f32 %v2339_v20  ;;  %v8066_v20 = vld [vmem:[#allocation52_spill] sm:$0xff]  ;;  %v2311_v26 = vmul.f32 1.442695, %v8070_v36  ;;  %v2317_v43 = vmul.f32 1.442695, %v8072_v7 }
 0x3ee   : > { %v4614_v21 = vpop.eup %4613  ;;  %4069 = vmatpush3.bf16.xpose.msra.mxu1 %v2882_v19  ;;  %4087 = vmatpush3.bf16.xpose.msra.mxu0 %v2889_v15  ;;  %v2418_v50 = vpop.xlane.xlu0 %2417  ;;  %v2774_v18 = vmul.f32 %v4612_v3, %v8063_v40  ;;  %v8073_v40 = vld [vmem:[#allocation45_spill] sm:$0xff]  ;;  %v2313_v38 = vmul.f32 1.442695, %v8076_v13  ;;  %v8083_v7 = vld [vmem:[#allocation96_spill] sm:$0xff] }
 0x3ef   : > { %v4616_v63 = vpop.eup %4615  ;;  %4633 = vrcp.f32 %v2418_v50  ;;  %4070 = vmatprep.subr.bf16.mxu1 %v8037_v52  ;;  %4088 = vmatprep.subr.bf16.mxu0 %v8037_v52  ;;  %v2773_v60 = vmul.f32 %v4614_v21, %v8067_v16  ;;  %v8077_v16 = vsub.f32 %v7915_v45, %v6327_v48  ;;  %v8078_v45 = vld [vmem:[#allocation124_spill] sm:$0xff] }
 0x3f0   : > { %v6649_v9 = vpop.eup %4617  ;;  %4635 = vpow2.f32 %v2305_v0  ;;  %2523 = vadd.xlane.f32.xlu1 %v6572_v29  ;;  %v2759_v27 = vmul.f32 %v4616_v63, %v8065_v61  ;;  %v8069_v0 = vsub.f32 %v7896_v44, %v6267_v5  ;;  %v8071_v5 = vld [vmem:[#allocation49_spill] sm:$0xff] }
 0x3f1   : > { %v4620_v62 = vpop.eup %4619  ;;  %4637 = vpow2.f32 %v2335_v6  ;;  %v2392_v23 = vpop.xlane.xlu1 %2391  ;;  %2553 = vadd.xlane.f32.xlu0 %v6649_v9  ;;  %v2890_v41 = vpack.c.bf16 %v2774_v18, %v2773_v60  ;;  %v2343_v60 = vmul.f32 1.442695, %v8077_v16 }
 0x3f2   : > { %v6654_v51 = vpop.eup %4621  ;;  %v2398_v47 = vpop.xlane.xlu0 %2397  ;;  %v2760_v56 = vmul.f32 %v4620_v62, %v8066_v20  ;;  %4639 = vrcp.f32 %v2422_v30  ;;  %v2315_v19 = vmul.f32 1.442695, %v8069_v0  ;;  %v8074_v62 = vld [vmem:[#allocation11_spill] sm:$0xff] }
 0x3f3   : > { %v6662_v12 = vpop.eup %4623  ;;  %4641 = vrcp.f32 %v6614_v58 }
 0x3f4   : > { %2555 = vadd.xlane.f32.xlu1 %v6604_v55  ;;  %v2883_v54 = vpack.c.bf16 %v2760_v56, %v2759_v27  ;;  %v4626_v2 = vpop.eup %4625  ;;  %4643 = vrcp.f32 %v2392_v23 }
 0x3f5   : > { %v6672_v15 = vpop.xlane.xlu1 %2427  ;;  %2525 = vadd.xlane.f32.xlu0 %v6602_v49  ;;  %v4628_v30 = vpop.eup %4627  ;;  %4645 = vpow2.f32 %v2337_v8  ;;  %v2762_v35 = vmul.f32 %v4626_v2, %v8071_v5  ;;  %v8079_v2 = vsub.f32 %v7927_v22, %v6355_v17 }
 0x3f6   : > { %4071 = vmatpush3.bf16.xpose.msra.mxu1 %v2883_v54  ;;  %4089 = vmatpush3.bf16.xpose.msra.mxu0 %v2890_v41  ;;  %v2394_v58 = vpop.xlane.xlu0 %2393  ;;  %v4630_v3 = vpop.eup %4629  ;;  %v2761_v18 = vmul.f32 %v4628_v30, %v8073_v40  ;;  %v8080_v30 = vld [vmem:[#allocation15_spill] sm:$0xff] }
 0x3f7   : > { %4647 = vrcp.f32 %v2394_v58  ;;  %4072 = vmatprep.subr.bf16.mxu1 %v8037_v52  ;;  %4090 = vmatprep.subr.bf16.mxu0 %v8037_v52  ;;  %v6680_v44 = vpop.eup %4631  ;;  %v2775_v23 = vmul.f32 %v4630_v3, %v8074_v62  ;;  %v2345_v0 = vmul.f32 1.442695, %v8079_v2  ;;  %v8082_v3 = vld [vmem:[#allocation53_spill] sm:$0xff]  ;;  %v8086_v62 = vld [vmem:[#allocation99_spill] sm:$0xff] }
 0x3f8   : > { %4649 = vpow2.f32 %v2341_v14  ;;  %2559 = vadd.xlane.f32.xlu1 %v6654_v51  ;;  %v2884_v27 = vpack.c.bf16 %v2762_v35, %v2761_v18 }
 0x3f9   : > { %v4634_v6 = vpop.eup %4633  ;;  %4651 = vpow2.f32 %v2315_v19  ;;  %v2424_v21 = vpop.xlane.xlu1 %2423  ;;  %2557 = vadd.xlane.f32.xlu0 %v6632_v37 }
 0x3fa   : > { %v6688_v50 = vpop.eup %4635  ;;  %4653 = vpow2.f32 %v2311_v26  ;;  %v2430_v63 = vpop.xlane.xlu0 %2429  ;;  %v2776_v8 = vmul.f32 %v4634_v6, %v8075_v32  ;;  %v8081_v26 = vld [vmem:[#allocation130_spill] sm:$0xff] }
 0x3fb   : > { %v6693_v61 = vpop.eup %4637  ;;  %4655 = vrcp.f32 %v2398_v47 }
 0x3fc   : > { %4657 = vrcp.f32 %v6644_v11  ;;  %2591 = vadd.xlane.f32.xlu1 %v6693_v61  ;;  %v2891_v20 = vpack.c.bf16 %v2776_v8, %v2775_v23  ;;  %v4640_v56 = vpop.eup %4639  ;;  %v8087_v23 = vld [vmem:[#allocation85_spill] sm:$0xff] }
 0x3fd   : > { %4659 = vrcp.f32 %v2424_v21  ;;  %v6703_v53 = vpop.xlane.xlu1 %2435  ;;  %2561 = vadd.xlane.f32.xlu0 %v6688_v50  ;;  %v4642_v47 = vpop.eup %4641  ;;  %v2778_v48 = vmul.f32 %v4640_v56, %v8078_v45  ;;  %v8088_v32 = vsub.f32 %v8086_v62, %v8087_v23  ;;  %v8093_v45 = vld [vmem:[#allocation103_spill] sm:$0xff] }
 0x3fe   : > { %4661 = vpow2.f32 %v2317_v43  ;;  %4073 = vmatpush3.bf16.xpose.msra.mxu1 %v2884_v27  ;;  %4091 = vmatpush3.bf16.xpose.msra.mxu0 %v2891_v20  ;;  %v2426_v25 = vpop.xlane.xlu0 %2425  ;;  %v4644_v24 = vpop.eup %4643  ;;  %v2777_v5 = vmul.f32 %v4642_v47, %v8082_v3  ;;  %v8084_v43 = vld [vmem:[#allocation35_spill] sm:$0xff]  ;;  %v8090_v27 = vld [vmem:[#allocation90_spill] sm:$0xff]  ;;  %v8092_v47 = vld [vmem:[#allocation128_spill] sm:$0xff] }
 0x3ff   : > { %4663 = vrcp.f32 %v2426_v25  ;;  %4074 = vmatprep.subr.bf16.mxu1 %v8037_v52  ;;  %4092 = vmatprep.subr.bf16.mxu0 %v8037_v52  ;;  %v6708_v11 = vpop.eup %4645  ;;  %v2763_v36 = vmul.f32 %v4644_v24, %v8080_v30  ;;  %v8085_v21 = vsub.f32 %v8083_v7, %v8084_v43  ;;  %v2349_v8 = vmul.f32 1.442695, %v8088_v32  ;;  %v8102_v32 = vld [vmem:[#allocation110_spill] sm:$0xff] }
 0x400   : > { %4665 = vpow2.f32 %v2313_v38  ;;  %2563 = vadd.xlane.f32.xlu1 %v6634_v34  ;;  %v2892_v22 = vpack.c.bf16 %v2778_v48, %v2777_v5  ;;  %v8089_v38 = vld [vmem:[#allocation104_spill] sm:$0xff]  ;;  %v8094_v48 = vld [vmem:[#allocation87_spill] sm:$0xff]  ;;  %v8098_v5 = vld [vmem:[#allocation21_spill] sm:$0xff] }
 0x401   : > { %v4648_v14 = vpop.eup %4647  ;;  %4667 = vpow2.f32 %v2343_v60  ;;  %v2432_v54 = vpop.xlane.xlu1 %2431  ;;  %2593 = vadd.xlane.f32.xlu0 %v6708_v11  ;;  %v2347_v40 = vmul.f32 1.442695, %v8085_v21  ;;  %v8091_v20 = vsub.f32 %v8089_v38, %v8090_v27  ;;  %v8099_v21 = vld [vmem:[#allocation108_spill] sm:$0xff] }
 0x402   : > { %v6713_v41 = vpop.eup %4649  ;;  %v2438_v19 = vpop.xlane.xlu0 %2437  ;;  %v2764_v58 = vmul.f32 %v4648_v14, %v8081_v26  ;;  %4669 = vrcp.f32 %v2430_v63  ;;  %v8095_v14 = vsub.f32 %v8093_v45, %v8094_v48  ;;  %v8106_v45 = vld [vmem:[#allocation114_spill] sm:$0xff] }
 0x403   : > { %v6721_v35 = vpop.eup %4651  ;;  %4671 = vrcp.f32 %v6672_v15  ;;  %v2319_v15 = vmul.f32 1.442695, %v8091_v20  ;;  %v8107_v48 = vld [vmem:[#allocation58_spill] sm:$0xff] }
 0x404   : > { %v6723_v6 = vpop.eup %4653  ;;  %2595 = vadd.xlane.f32.xlu1 %v6680_v44  ;;  %v2885_v17 = vpack.c.bf16 %v2764_v58, %v2763_v36  ;;  %4673 = vrcp.f32 %v2432_v54  ;;  %v2323_v54 = vmul.f32 1.442695, %v8095_v14  ;;  %v8096_v36 = vld [vmem:[#allocation13_spill] sm:$0xff]  ;;  %v8097_v58 = vld [vmem:[#allocation19_spill] sm:$0xff]  ;;  %v8108_v14 = vsub.f32 %v8106_v45, %v8107_v48 }
 0x405   : > { %v4656_v18 = vpop.eup %4655  ;;  %v6733_v13 = vpop.xlane.xlu1 %2467  ;;  %2565 = vadd.xlane.f32.xlu0 %v6662_v12  ;;  %4675 = vpow2.f32 %v2345_v0  ;;  %v8120_v45 = vld [vmem:[#allocation43_spill] sm:$0xff] }
 0x406   : > { %v4658_v63 = vpop.eup %4657  ;;  %4075 = vmatpush3.bf16.xpose.msra.mxu1 %v2885_v17  ;;  %4093 = vmatpush3.bf16.xpose.msra.mxu0 %v2892_v22  ;;  %v2434_v56 = vpop.xlane.xlu0 %2433  ;;  %v2766_v25 = vmul.f32 %v4656_v18, %v8092_v47 }
 0x407   : > { %v4660_v16 = vpop.eup %4659  ;;  %4677 = vrcp.f32 %v2434_v56  ;;  %4076 = vmatprep.subr.bf16.mxu1 %v8037_v52  ;;  %4094 = vmatprep.subr.bf16.mxu0 %v8037_v52  ;;  %v2765_v26 = vmul.f32 %v4658_v63, %v8096_v36  ;;  %v8105_v56 = vld [vmem:[#allocation17_spill] sm:$0xff]  ;;  %v8109_v36 = vld [vmem:[#allocation12_spill] sm:$0xff] }
 0x408   : > { %v6741_v60 = vpop.eup %4661  ;;  %4679 = vpow2.f32 %v2347_v40  ;;  %2567 = vadd.xlane.f32.xlu1 %v6723_v6  ;;  %v2779_v3 = vmul.f32 %v4660_v16, %v8097_v58  ;;  %v8100_v40 = vld [vmem:[#allocation95_spill] sm:$0xff] }
 0x409   : > { %v4664_v24 = vpop.eup %4663  ;;  %4681 = vpow2.f32 %v2349_v8  ;;  %v2464_v2 = vpop.xlane.xlu1 %2463  ;;  %2597 = vadd.xlane.f32.xlu0 %v6713_v41  ;;  %v8101_v17 = vsub.f32 %v8099_v21, %v8100_v40  ;;  %v2886_v18 = vpack.c.bf16 %v2766_v25, %v2765_v26  ;;  %v8103_v8 = vld [vmem:[#allocation55_spill] sm:$0xff] }
 0x40a   : > { %v6749_v0 = vpop.eup %4665  ;;  %4683 = vpow2.f32 %v2319_v15  ;;  %v2470_v30 = vpop.xlane.xlu0 %2469  ;;  %v2780_v7 = vmul.f32 %v4664_v24, %v8098_v5  ;;  %v8104_v63 = vsub.f32 %v8102_v32, %v8103_v8  ;;  %v8110_v58 = vld [vmem:[#allocation23_spill] sm:$0xff]  ;;  %v8111_v5 = vld [vmem:[#allocation24_spill] sm:$0xff] }
 0x40b   : > { %v6754_v43 = vpop.eup %4667  ;;  %4685 = vrcp.f32 %v2438_v19  ;;  %v2321_v22 = vmul.f32 1.442695, %v8101_v17  ;;  %v8112_v17 = vld [vmem:[#allocation106_spill] sm:$0xff] }
 0x40c   : > { %4687 = vrcp.f32 %v6703_v53  ;;  %2599 = vadd.xlane.f32.xlu1 %v6754_v43  ;;  %v2893_v62 = vpack.c.bf16 %v2780_v7, %v2779_v3  ;;  %v4670_v23 = vpop.eup %4669  ;;  %v2351_v38 = vmul.f32 1.442695, %v8104_v63  ;;  %v8115_v63 = vld [vmem:[#allocation109_spill] sm:$0xff] }
 0x40d   : > { %4689 = vrcp.f32 %v2464_v2  ;;  %v6764_v27 = vpop.xlane.xlu1 %2443  ;;  %2569 = vadd.xlane.f32.xlu0 %v6749_v0  ;;  %v4672_v19 = vpop.eup %4671  ;;  %v2782_v16 = vmul.f32 %v4670_v23, %v8105_v56 }
 0x40e   : > { %4691 = vpow2.f32 %v2323_v54  ;;  %4077 = vmatpush3.bf16.xpose.msra.mxu1 %v2886_v18  ;;  %4095 = vmatpush3.bf16.xpose.msra.mxu0 %v2893_v62  ;;  %v2466_v20 = vpop.xlane.xlu0 %2465  ;;  %v4674_v53 = vpop.eup %4673  ;;  %v2353_v54 = vmul.f32 1.442695, %v8108_v14  ;;  %v2781_v26 = vmul.f32 %v4672_v19, %v8109_v36  ;;  %v8122_v36 = vld [vmem:[#allocation132_spill] sm:$0xff] }
 0x40f   : > { %4693 = vrcp.f32 %v2466_v20  ;;  %4096 = vmatprep.subr.bf16.mxu0 %v8037_v52  ;;  %4102 = vmatprep.subr.bf16.mxu1 %v8037_v52  ;;  %v6769_v15 = vpop.eup %4675  ;;  %v2783_v3 = vmul.f32 %v4674_v53, %v8110_v58  ;;  %v8123_v58 = vld [vmem:[#allocation112_spill] sm:$0xff] }
 0x410   : > { %4695 = vpow2.f32 %v2321_v22  ;;  %2571 = vadd.xlane.f32.xlu1 %v6721_v35  ;;  %v8113_v22 = vld [vmem:[#allocation91_spill] sm:$0xff]  ;;  %v2894_v23 = vpack.c.bf16 %v2782_v16, %v2781_v26 }
 0x411   : > { %v4678_v47 = vpop.eup %4677  ;;  %4697 = vpow2.f32 %v2351_v38  ;;  %v2440_v25 = vpop.xlane.xlu1 %2439  ;;  %2601 = vadd.xlane.f32.xlu0 %v6769_v15  ;;  %v8114_v18 = vsub.f32 %v8112_v17, %v8113_v22  ;;  %v8116_v38 = vld [vmem:[#allocation94_spill] sm:$0xff] }
 0x412   : > { %v6774_v24 = vpop.eup %4679  ;;  %v2446_v2 = vpop.xlane.xlu0 %2445  ;;  %v2784_v7 = vmul.f32 %v4678_v47, %v8111_v5  ;;  %4699 = vrcp.f32 %v2470_v30  ;;  %v8117_v19 = vsub.f32 %v8115_v63, %v8116_v38  ;;  %v8118_v30 = vld [vmem:[#allocation3_spill] sm:$0xff]  ;;  %v8119_v47 = vld [vmem:[#allocation116_spill] sm:$0xff] }
 0x413   : > { %v6782_v21 = vpop.eup %4681  ;;  %v2325_v62 = vmul.f32 1.442695, %v8114_v18  ;;  %4701 = vrcp.f32 %v6733_v13  ;;  %v8121_v13 = vsub.f32 %v8119_v47, %v8120_v45  ;;  %v8128_v63 = vld [vmem:[#allocation28_spill] sm:$0xff]  ;;  %v8130_v47 = vld [vmem:[#allocation47_spill] sm:$0xff] }
 0x414   : > { %v6784_v40 = vpop.eup %4683  ;;  %2603 = vadd.xlane.f32.xlu1 %v6774_v24  ;;  %v2895_v32 = vpack.c.bf16 %v2784_v7, %v2783_v3  ;;  %v2355_v20 = vmul.f32 1.442695, %v8117_v19  ;;  %4703 = vrcp.f32 %v2440_v25  ;;  %v8124_v3 = vld [vmem:[#allocation41_spill] sm:$0xff] }
 0x415   : > { %v4686_v8 = vpop.eup %4685  ;;  %v6794_v53 = vpop.xlane.xlu1 %2475  ;;  %2573 = vadd.xlane.f32.xlu0 %v6741_v60  ;;  %4079 = vmatmul.mubr.bf16.vlgmr.msra.gmra.mrb[68].mxu1 %v8118_v30  ;;  %v2327_v48 = vmul.f32 1.442695, %v8121_v13  ;;  %4705 = vpow2.f32 %v2353_v54  ;;  %v8125_v5 = vsub.f32 %v8123_v58, %v8124_v3  ;;  %v8132_v58 = vld [vmem:[#allocation119_spill] sm:$0xff] }
 0x416   : > { %v4688_v56 = vpop.eup %4687  ;;  %4097 = vmatpush3.bf16.xpose.msra.mxu0 %v2894_v23  ;;  %4103 = vmatpush3.bf16.xpose.msra.mxu1 %v2895_v32  ;;  %v2442_v16 = vpop.xlane.xlu0 %2441  ;;  %v2786_v26 = vmul.f32 %v4686_v8, %v8122_v36  ;;  %v8127_v32 = vld [vmem:[#allocation134_spill] sm:$0xff] }
 0x417   : > { %v4690_v14 = vpop.eup %4689  ;;  %4707 = vrcp.f32 %v2442_v16  ;;  %4104 = vmatprep.subr.bf16.mxu1 %v8037_v52  ;;  %4122 = vmatprep.subr.bf16.mxu0 %v8037_v52  ;;  %v2357_v7 = vmul.f32 1.442695, %v8125_v5 }
 0x418   : > { %v6803_v25 = vpop.eup %4691  ;;  %4709 = vpow2.f32 %v2325_v62  ;;  %2575 = vadd.xlane.f32.xlu1 %v6784_v40  ;;  %4118 = vmatprep.mubr.msk.bf16.mxu1 %vm4918_vm0, %v8037_v52  ;;  %v8126_v62 = vld [vmem:[#allocation20_spill] sm:$0xff]  ;;  %v2799_v8 = vmul.f32 %v4690_v14, %v8127_v32 }
 0x419   : > { %v4694_v54 = vpop.eup %4693  ;;  %4711 = vpow2.f32 %v2355_v20  ;;  %v2472_v17 = vpop.xlane.xlu1 %2471  ;;  %2605 = vadd.xlane.f32.xlu0 %v6782_v21  ;;  %v2785_v23 = vmul.f32 %v4688_v56, %v8126_v62  ;;  %v8129_v20 = vld [vmem:[#allocation121_spill] sm:$0xff]  ;;  %v8133_v56 = vld [vmem:[#allocation50_spill] sm:$0xff] }
 0x41a   : > { %v6813_v22 = vpop.eup %4695  ;;  %4713 = vpow2.f32 %v2327_v48  ;;  %v2478_v18 = vpop.xlane.xlu0 %2477  ;;  %v2800_v38 = vmul.f32 %v4694_v54, %v8128_v63  ;;  %v8131_v45 = vsub.f32 %v8129_v20, %v8130_v47  ;;  %v8134_v3 = vsub.f32 %v8132_v58, %v8133_v56  ;;  %v8138_v63 = vld [vmem:[#allocation123_spill] sm:$0xff] }
 0x41b   : > { %v6818_v19 = vpop.eup %4697  ;;  %4715 = vrcp.f32 %v2446_v2  ;;  %v2896_v16 = vpack.c.bf16 %v2786_v26, %v2785_v23  ;;  %v8135_v2 = vld [vmem:[#allocation5_spill] sm:$0xff] }
 0x41c   : > { %v2359_v13 = vmul.f32 1.442695, %v8131_v45  ;;  %4717 = vrcp.f32 %v6764_v27  ;;  %2607 = vadd.xlane.f32.xlu1 %v6818_v19  ;;  %v2903_v48 = vpack.c.bf16 %v2800_v38, %v2799_v8  ;;  %v4700_v36 = vpop.eup %4699  ;;  %v2329_v14 = vmul.f32 1.442695, %v8134_v3  ;;  %v8139_v38 = vld [vmem:[#allocation62_spill] sm:$0xff] }
 0x41d   : > { %4719 = vrcp.f32 %v2472_v17  ;;  %v2452_v54 = vpop.xlane.xlu1 %2451  ;;  %2577 = vadd.xlane.f32.xlu0 %v6813_v22  ;;  %4099 = vmatmul.mubr.bf16.vlgmr.msra.gmra.mrb[72].mxu0 %v8135_v2  ;;  %v4702_v5 = vpop.eup %4701  ;;  %v8136_v17 = vld [vmem:[#allocation27_spill] sm:$0xff]  ;;  %v8140_v20 = vsub.f32 %v8138_v63, %v8139_v38 }
 0x41e   : > { %4721 = vpow2.f32 %v2357_v7  ;;  %4105 = vmatpush3.bf16.xpose.msra.mxu1 %v2896_v16  ;;  %4123 = vmatpush3.bf16.xpose.msra.mxu0 %v2903_v48  ;;  %v2474_v27 = vpop.xlane.xlu0 %2473  ;;  %v4704_v62 = vpop.eup %4703  ;;  %v2802_v23 = vmul.f32 %v4700_v36, %v8136_v17  ;;  %v8142_v48 = vld [vmem:[#allocation31_spill] sm:$0xff]  ;;  %v8143_v36 = vld [vmem:[#allocation25_spill] sm:$0xff] }
 0x41f   : > { %4723 = vrcp.f32 %v2474_v27  ;;  %4106 = vmatprep.subr.bf16.mxu1 %v8037_v52  ;;  %4124 = vmatprep.subr.bf16.mxu0 %v8037_v52  ;;  %v6832_v26 = vpop.eup %4705  ;;  %v2361_v47 = vmul.f32 1.442695, %v8140_v20  ;;  %v2801_v56 = vmul.f32 %v4702_v5, %v8143_v36 }
 0x420   : > { %4725 = vpow2.f32 %v2359_v13  ;;  %2579 = vadd.xlane.f32.xlu1 %v6803_v25  ;;  %4138 = vmatprep.mubr.msk.bf16.mxu0 %vm4918_vm0, %v8037_v52  ;;  %v8141_v13 = vld [vmem:[#allocation29_spill] sm:$0xff] }
 0x421   : > { %v4708_v7 = vpop.eup %4707  ;;  %4727 = vpow2.f32 %v2329_v14  ;;  %v2448_v32 = vpop.xlane.xlu1 %2447  ;;  %2609 = vadd.xlane.f32.xlu0 %v6832_v26  ;;  %v2787_v16 = vmul.f32 %v4704_v62, %v8141_v13  ;;  %v2904_v17 = vpack.c.bf16 %v2802_v23, %v2801_v56  ;;  %v8151_v56 = vld [vmem:[#allocation33_spill] sm:$0xff] }
 0x422   : > { %v6839_v8 = vpop.eup %4709  ;;  %v2454_v45 = vpop.xlane.xlu0 %2453  ;;  %v2788_v58 = vmul.f32 %v4708_v7, %v8142_v48  ;;  %4729 = vrcp.f32 %v2478_v18  ;;  %v8147_v18 = vld [vmem:[#allocation74_spill] sm:$0xff] }
 0x423   : > { %8137 = vst [vmem:[#allocation68_spill] sm:$0xff] %v6839_v8  ;;  %v6847_v3 = vpop.eup %4711  ;;  %4731 = vrcp.f32 %v6794_v53 }
 0x424   : > { %8144 = vst [vmem:[#allocation16_spill] sm:$0xff] %v6847_v3  ;;  %v6849_v14 = vpop.eup %4713  ;;  %2611 = vadd.xlane.f32.xlu1 %v6847_v3  ;;  %v2897_v27 = vpack.c.bf16 %v2788_v58, %v2787_v16  ;;  %4733 = vrcp.f32 %v2448_v32  ;;  %v8149_v16 = vld [vmem:[#allocation72_spill] sm:$0xff]  ;;  %v8150_v58 = vld [vmem:[#allocation30_spill] sm:$0xff] }
 0x425   : > { %8145 = vst [vmem:[#allocation18_spill] sm:$0xff] %v6849_v14  ;;  %v4716_v63 = vpop.eup %4715  ;;  %v2484_v38 = vpop.xlane.xlu1 %2483  ;;  %2581 = vadd.xlane.f32.xlu0 %v6839_v8  ;;  %4735 = vpow2.f32 %v2361_v47 }
 0x426   : > { %v4718_v62 = vpop.eup %4717  ;;  %4107 = vmatpush3.bf16.xpose.msra.mxu1 %v2897_v27  ;;  %4125 = vmatpush3.bf16.xpose.msra.mxu0 %v2904_v17  ;;  %v2450_v5 = vpop.xlane.xlu0 %2449  ;;  %v2790_v23 = vmul.f32 %v4716_v63, %v8147_v18 }
 0x427   : > { %v4720_v7 = vpop.eup %4719  ;;  %4737 = vrcp.f32 %v2450_v5  ;;  %4108 = vmatprep.subr.bf16.mxu1 %v8037_v52  ;;  %4126 = vmatprep.subr.bf16.mxu0 %v8037_v52  ;;  %v2789_v48 = vmul.f32 %v4718_v62, %v8149_v16 }
 0x428   : > { %v6856_v53 = vpop.eup %4721  ;;  %2583 = vadd.xlane.f32.xlu1 %v6849_v14  ;;  %v2803_v36 = vmul.f32 %v4720_v7, %v8150_v58  ;;  %4739 = vrcp.f32 %v2454_v45  ;;  %v8154_v45 = vld [vmem:[#allocation32_spill] sm:$0xff] }
 0x429   : > { %8146 = vst [vmem:[#allocation71_spill] sm:$0xff] %v6856_v53  ;;  %v4724_v32 = vpop.eup %4723  ;;  %v2480_v20 = vpop.xlane.xlu1 %2479  ;;  %2613 = vadd.xlane.f32.xlu0 %v6856_v53  ;;  %4741 = vrcp.f32 %v2452_v54  ;;  %v2898_v63 = vpack.c.bf16 %v2790_v23, %v2789_v48  ;;  %v8155_v48 = vld [vmem:[#allocation137_spill] sm:$0xff] }
 0x42a   : > { %v6861_v47 = vpop.eup %4725  ;;  %v2486_v13 = vpop.xlane.xlu0 %2485  ;;  %v2804_v27 = vmul.f32 %v4724_v32, %v8151_v56  ;;  %4743 = vrcp.f32 %v2480_v20 }
 0x42b   : > { %8148 = vst [vmem:[#allocation129_spill] sm:$0xff] %v6861_v47  ;;  %v6866_v17 = vpop.eup %4727 }
 0x42c   : > { %8152 = vst [vmem:[#allocation73_spill] sm:$0xff] %v6866_v17  ;;  %2615 = vadd.xlane.f32.xlu1 %v6861_v47  ;;  %v2905_v5 = vpack.c.bf16 %v2804_v27, %v2803_v36  ;;  %v4730_v18 = vpop.eup %4729  ;;  %v8156_v36 = vld [vmem:[#allocation101_spill] sm:$0xff]  ;;  %v8157_v27 = vld [vmem:[#allocation135_spill] sm:$0xff] }
 0x42d   : > { %v2460_v14 = vpop.xlane.xlu1 %2459  ;;  %2585 = vadd.xlane.f32.xlu0 %v6866_v17  ;;  %v4732_v53 = vpop.eup %4731  ;;  %v2806_v23 = vmul.f32 %v4730_v18, %v8154_v45 }
 0x42e   : > { %4109 = vmatpush3.bf16.xpose.msra.mxu1 %v2898_v63  ;;  %4127 = vmatpush3.bf16.xpose.msra.mxu0 %v2905_v5  ;;  %v2482_v62 = vpop.xlane.xlu0 %2481  ;;  %v4734_v7 = vpop.eup %4733  ;;  %v2805_v63 = vmul.f32 %v4732_v53, %v8157_v27 }
 0x42f   : > { %4745 = vrcp.f32 %v2482_v62  ;;  %4110 = vmatprep.subr.bf16.mxu1 %v8037_v52  ;;  %4128 = vmatprep.subr.bf16.mxu0 %v8037_v52  ;;  %v6872_v54 = vpop.eup %4735  ;;  %v2791_v58 = vmul.f32 %v4734_v7, %v8155_v48  ;;  %v8158_v7 = vld [vmem:[#allocation78_spill] sm:$0xff]  ;;  %v8159_v48 = vld [vmem:[#allocation136_spill] sm:$0xff] }
 0x430   : > { %8153 = vst [vmem:[#allocation64_spill] sm:$0xff] %v6872_v54  ;;  %4747 = vrcp.f32 %v2486_v13  ;;  %v2906_v62 = vpack.c.bf16 %v2806_v23, %v2805_v63 }
 0x431   : > { %v4738_v32 = vpop.eup %4737  ;;  %v2456_v16 = vpop.xlane.xlu1 %2455  ;;  %2617 = vadd.xlane.f32.xlu0 %v6872_v54  ;;  %4749 = vrcp.f32 %v2484_v38 }
 0x432   : > { %v2462_v20 = vpop.xlane.xlu0 %2461  ;;  %v2792_v56 = vmul.f32 %v4738_v32, %v8156_v36  ;;  %v4740_v47 = vpop.eup %4739  ;;  %4751 = vrcp.f32 %v2456_v16  ;;  %v8161_v36 = vld [vmem:[#allocation83_spill] sm:$0xff] }
 0x433   : > { %v4742_v3 = vpop.eup %4741  ;;  %v2794_v32 = vmul.f32 %v4740_v47, %v8158_v7 }
 0x434   : > { %v2899_v5 = vpack.c.bf16 %v2792_v56, %v2791_v58  ;;  %v4744_v45 = vpop.eup %4743  ;;  %v2793_v23 = vmul.f32 %v4742_v3, %v8159_v48  ;;  %v8160_v58 = vld [vmem:[#allocation80_spill] sm:$0xff]  ;;  %v8162_v3 = vld [vmem:[#allocation37_spill] sm:$0xff] }
 0x435   : > { %v2492_v17 = vpop.xlane.xlu1 %2491  ;;  %v2807_v16 = vmul.f32 %v4744_v45, %v8160_v58  ;;  %v8165_v58 = vld [vmem:[#allocation34_spill] sm:$0xff] }
 0x436   : > { %4111 = vmatpush3.bf16.xpose.msra.mxu1 %v2899_v5  ;;  %4129 = vmatpush3.bf16.xpose.msra.mxu0 %v2906_v62  ;;  %v2458_v18 = vpop.xlane.xlu0 %2457  ;;  %v2900_v27 = vpack.c.bf16 %v2794_v32, %v2793_v23  ;;  %v8163_v32 = vld [vmem:[#allocation84_spill] sm:$0xff]  ;;  %v8164_v23 = vld [vmem:[#allocation89_spill] sm:$0xff] }
 0x437   : > { %4753 = vrcp.f32 %v2458_v18  ;;  %4112 = vmatprep.subr.bf16.mxu1 %v8037_v52  ;;  %4130 = vmatprep.subr.bf16.mxu0 %v8037_v52 }
 0x438   : > { %4755 = vrcp.f32 %v2462_v20 }
 0x439   : > { %v4746_v53 = vpop.eup %4745  ;;  %v2488_v13 = vpop.xlane.xlu1 %2487  ;;  %4757 = vrcp.f32 %v2460_v14 }
 0x43a   : > { %v2494_v38 = vpop.xlane.xlu0 %2493  ;;  %v2808_v56 = vmul.f32 %v4746_v53, %v8161_v36  ;;  %v4748_v5 = vpop.eup %4747  ;;  %4759 = vrcp.f32 %v2488_v13 }
 0x43b   : > { %v4750_v18 = vpop.eup %4749  ;;  %v2810_v45 = vmul.f32 %v4748_v5, %v8162_v3 }
 0x43c   : > { %v2907_v63 = vpack.c.bf16 %v2808_v56, %v2807_v16  ;;  %v4752_v7 = vpop.eup %4751  ;;  %v2809_v16 = vmul.f32 %v4750_v18, %v8165_v58 }
 0x43d   : > { %v2500_v62 = vpop.xlane.xlu1 %2499  ;;  %v2795_v48 = vmul.f32 %v4752_v7, %v8163_v32  ;;  %v8166_v7 = vld [vmem:[#allocation86_spill] sm:$0xff] }
 0x43e   : > { %4113 = vmatpush3.bf16.xpose.msra.mxu1 %v2900_v27  ;;  %4131 = vmatpush3.bf16.xpose.msra.mxu0 %v2907_v63  ;;  %v2490_v47 = vpop.xlane.xlu0 %2489  ;;  %v2908_v56 = vpack.c.bf16 %v2810_v45, %v2809_v16  ;;  %v8167_v32 = vld [vmem:[#allocation82_spill] sm:$0xff] }
 0x43f   : > { %4761 = vrcp.f32 %v2490_v47  ;;  %4114 = vmatprep.subr.bf16.mxu1 %v8037_v52  ;;  %4132 = vmatprep.subr.bf16.mxu0 %v8037_v52 }
 0x440   : > { %4763 = vrcp.f32 %v2494_v38 }
 0x441   : > { %v4754_v53 = vpop.eup %4753  ;;  %v2496_v20 = vpop.xlane.xlu1 %2495  ;;  %4765 = vrcp.f32 %v2492_v17 }
 0x442   : > { %v2502_v14 = vpop.xlane.xlu0 %2501  ;;  %v2796_v13 = vmul.f32 %v4754_v53, %v8164_v23  ;;  %v4756_v27 = vpop.eup %4755  ;;  %4767 = vrcp.f32 %v2496_v20  ;;  %v8169_v23 = vld [vmem:[#allocation98_spill] sm:$0xff] }
 0x443   : > { %v4758_v47 = vpop.eup %4757  ;;  %v2798_v53 = vmul.f32 %v4756_v27, %v8166_v7 }
 0x444   : > { %v2901_v36 = vpack.c.bf16 %v2796_v13, %v2795_v48  ;;  %v4760_v3 = vpop.eup %4759  ;;  %v2797_v45 = vmul.f32 %v4758_v47, %v8167_v32  ;;  %v8168_v48 = vld [vmem:[#allocation93_spill] sm:$0xff]  ;;  %v8170_v47 = vld [vmem:[#allocation92_spill] sm:$0xff] }
 0x445   : > { %v2532_v63 = vpop.xlane.xlu1 %2531  ;;  %v2811_v20 = vmul.f32 %v4760_v3, %v8168_v48  ;;  %v8173_v48 = vld [vmem:[#allocation59_spill] sm:$0xff] }
 0x446   : > { %4115 = vmatpush3.bf16.xpose.msra.mxu1 %v2901_v36  ;;  %4133 = vmatpush3.bf16.xpose.msra.mxu0 %v2908_v56  ;;  %v2498_v5 = vpop.xlane.xlu0 %2497  ;;  %v2902_v58 = vpack.c.bf16 %v2798_v53, %v2797_v45  ;;  %v8171_v53 = vld [vmem:[#allocation88_spill] sm:$0xff] }
 0x447   : > { %4769 = vrcp.f32 %v2498_v5  ;;  %4116 = vmatprep.subr.bf16.mxu1 %v8037_v52  ;;  %4134 = vmatprep.subr.bf16.mxu0 %v8037_v52  ;;  %v8172_v45 = vld [vmem:[#allocation100_spill] sm:$0xff] }
 0x448   : > { %4771 = vrcp.f32 %v2502_v14 }
 0x449   : > { %v4762_v18 = vpop.eup %4761  ;;  %v2528_v38 = vpop.xlane.xlu1 %2527  ;;  %4773 = vrcp.f32 %v2500_v62 }
 0x44a   : > { %v2534_v17 = vpop.xlane.xlu0 %2533  ;;  %v2812_v13 = vmul.f32 %v4762_v18, %v8169_v23  ;;  %v4764_v36 = vpop.eup %4763  ;;  %4775 = vrcp.f32 %v2528_v38  ;;  %v593_v23 = vcombine.high %v8118_v30, %v8118_v30 }
 0x44b   : > { %v4766_v5 = vpop.eup %4765  ;;  %v2814_v3 = vmul.f32 %v4764_v36, %v8170_v47 }
 0x44c   : > { %v2909_v16 = vpack.c.bf16 %v2812_v13, %v2811_v20  ;;  %v4768_v7 = vpop.eup %4767  ;;  %v2813_v32 = vmul.f32 %v4766_v5, %v8171_v53  ;;  %v8176_v53 = vld [vmem:[#allocation60_spill] sm:$0xff] }
 0x44d   : > { %v2508_v56 = vpop.xlane.xlu1 %2507  ;;  %v2815_v38 = vmul.f32 %v4768_v7, %v8172_v45  ;;  %v8177_v45 = vld [vmem:[#allocation63_spill] sm:$0xff] }
 0x44e   : > { %4117 = vmatpush3.bf16.xpose.msra.mxu1 %v2902_v58  ;;  %4135 = vmatpush3.bf16.xpose.msra.mxu0 %v2909_v16  ;;  %v2530_v27 = vpop.xlane.xlu0 %2529  ;;  %v2910_v13 = vpack.c.bf16 %v2814_v3, %v2813_v32 }
 0x44f   : > { %4777 = vrcp.f32 %v2530_v27  ;;  %4136 = vmatprep.subr.bf16.mxu0 %v8037_v52  ;;  %4142 = vmatprep.subr.bf16.mxu1 %v8037_v52 }
 0x450   : > { %4779 = vrcp.f32 %v2534_v17  ;;  %v8174_v17 = vld [vmem:[#allocation57_spill] sm:$0xff] }
 0x451   : > { %v4770_v18 = vpop.eup %4769  ;;  %v2504_v14 = vpop.xlane.xlu1 %2503  ;;  %4781 = vrcp.f32 %v2532_v63 }
 0x452   : > { %v2510_v62 = vpop.xlane.xlu0 %2509  ;;  %v2816_v20 = vmul.f32 %v4770_v18, %v8173_v48  ;;  %v4772_v16 = vpop.eup %4771  ;;  %4783 = vrcp.f32 %v2504_v14  ;;  %v8175_v18 = vld [vmem:[#allocation97_spill] sm:$0xff]  ;;  %v595_v48 = vcombine.high %v8135_v2, %v8135_v2 }
 0x453   : > { %v4774_v36 = vpop.eup %4773  ;;  %v2818_v7 = vmul.f32 %v4772_v16, %v8174_v17 }
 0x454   : > { %v2911_v58 = vpack.c.bf16 %v2816_v20, %v2815_v38  ;;  %v4776_v5 = vpop.eup %4775  ;;  %v2817_v14 = vmul.f32 %v4774_v36, %v8175_v18 }
 0x455   : > { %v2540_v27 = vpop.xlane.xlu1 %2539  ;;  %4119 = vmatmul.mubr.bf16.vlgmr.msra.gmra.mrb[72].mxu1 %v593_v23  ;;  %v2831_v32 = vmul.f32 %v4776_v5, %v8176_v53 }
 0x456   : > { %4137 = vmatpush3.bf16.xpose.msra.mxu0 %v2910_v13  ;;  %4143 = vmatpush3.bf16.xpose.msra.mxu1 %v2911_v58  ;;  %v2506_v47 = vpop.xlane.xlu0 %2505  ;;  %v2912_v20 = vpack.c.bf16 %v2818_v7, %v2817_v14  ;;  %v8181_v14 = vld [vmem:[#allocation120_spill] sm:$0xff] }
 0x457   : > { %4785 = vrcp.f32 %v2506_v47  ;;  %4144 = vmatprep.subr.bf16.mxu1 %v8037_v52  ;;  %4162 = vmatprep.subr.bf16.mxu0 %v8037_v52  ;;  %v8178_v47 = vld [vmem:[#allocation115_spill] sm:$0xff] }
 0x458   : > { %4158 = vmatprep.mubr.msk.bf16.mxu1 %vm4918_vm0, %v8037_v52  ;;  %4787 = vrcp.f32 %v2510_v62 }
 0x459   : > { %v4778_v30 = vpop.eup %4777  ;;  %v2536_v63 = vpop.xlane.xlu1 %2535  ;;  %4789 = vrcp.f32 %v2508_v56  ;;  %v8179_v56 = vld [vmem:[#allocation51_spill] sm:$0xff] }
 0x45a   : > { %v2542_v3 = vpop.xlane.xlu0 %2541  ;;  %v2832_v38 = vmul.f32 %v4778_v30, %v8177_v45  ;;  %v4780_v13 = vpop.eup %4779  ;;  %4791 = vrcp.f32 %v2536_v63  ;;  %v8180_v63 = vld [vmem:[#allocation46_spill] sm:$0xff] }
 0x45b   : > { %v4782_v16 = vpop.eup %4781  ;;  %v2834_v62 = vmul.f32 %v4780_v13, %v8179_v56  ;;  %v8182_v45 = vld [vmem:[#allocation54_spill] sm:$0xff] }
 0x45c   : > { %v2919_v23 = vpack.c.bf16 %v2832_v38, %v2831_v32  ;;  %v4784_v5 = vpop.eup %4783  ;;  %v2833_v18 = vmul.f32 %v4782_v16, %v8180_v63 }
 0x45d   : > { %v1948_v58 = vpop.xlane.xlu1 %1947  ;;  %4139 = vmatmul.mubr.bf16.vlgmr.msra.gmra.mrb[76].mxu0 %v595_v48  ;;  %v2819_v38 = vmul.f32 %v4784_v5, %v8182_v45  ;;  %v8183_v48 = vld [vmem:[#allocation66_spill] sm:$0xff]  ;;  %v8188_v45 = vld [vmem:[#allocation127_spill] sm:$0xff] }
 0x45e   : > { %v2093_v17 = vsub.f32 %v8178_v47, %v1948_v58  ;;  %4145 = vmatpush3.bf16.xpose.msra.mxu1 %v2912_v20  ;;  %4163 = vmatpush3.bf16.xpose.msra.mxu0 %v2919_v23  ;;  %v2538_v36 = vpop.xlane.xlu0 %2537  ;;  %v8184_v23 = vld [vmem:[#allocation118_spill] sm:$0xff] }
 0x45f   : > { %4793 = vrcp.f32 %v2538_v36  ;;  %4146 = vmatprep.subr.bf16.mxu1 %v8037_v52  ;;  %4164 = vmatprep.subr.bf16.mxu0 %v8037_v52 }
 0x460   : > { %v2331_v2 = vmul.f32 1.442695, %v2093_v17  ;;  %4178 = vmatprep.mubr.msk.bf16.mxu0 %vm4918_vm0, %v8037_v52  ;;  %v2920_v17 = vpack.c.bf16 %v2834_v62, %v2833_v18  ;;  %v8186_v18 = vld [vmem:[#allocation125_spill] sm:$0xff] }
 0x461   : > { %v4786_v7 = vpop.eup %4785  ;;  %v1980_v30 = vpop.xlane.xlu1 %1979 }
 0x462   : > { %4795 = vpow2.f32 %v2331_v2  ;;  %v2109_v53 = vsub.f32 %v8181_v14, %v1980_v30  ;;  %v1950_v32 = vpop.xlane.xlu0 %1949  ;;  %v2820_v20 = vmul.f32 %v4786_v7, %v8183_v48  ;;  %v4788_v36 = vpop.eup %4787 }
 0x463   : > { %4797 = vrcp.f32 %v2542_v3  ;;  %v2094_v58 = vsub.f32 %v8184_v23, %v1950_v32  ;;  %v4790_v8 = vpop.eup %4789  ;;  %v8185_v3 = vld [vmem:[#allocation65_spill] sm:$0xff] }
 0x464   : > { %v2363_v47 = vmul.f32 1.442695, %v2109_v53  ;;  %v2913_v13 = vpack.c.bf16 %v2820_v20, %v2819_v38  ;;  %4799 = vrcp.f32 %v2540_v27  ;;  %v4792_v2 = vpop.eup %4791  ;;  %v2822_v7 = vmul.f32 %v4788_v36, %v8185_v3  ;;  %v8187_v53 = vld [vmem:[#allocation14_spill] sm:$0xff] }
 0x465   : > { %v2333_v56 = vmul.f32 1.442695, %v2094_v58  ;;  %v2512_v54 = vpop.xlane.xlu1 %2511  ;;  %v2821_v14 = vmul.f32 %v4790_v8, %v8186_v18  ;;  %v2835_v32 = vmul.f32 %v4792_v2, %v8187_v53  ;;  %v8190_v2 = vld [vmem:[#allocation56_spill] sm:$0xff] }
 0x466   : > { %4801 = vpow2.f32 %v2363_v47  ;;  %4147 = vmatpush3.bf16.xpose.msra.mxu1 %v2913_v13  ;;  %4165 = vmatpush3.bf16.xpose.msra.mxu0 %v2920_v17  ;;  %v1982_v16 = vpop.xlane.xlu0 %1981  ;;  %v8189_v13 = vld [vmem:[#allocation67_spill] sm:$0xff] }
 0x467   : > { %4803 = vpow2.f32 %v2333_v56  ;;  %v2110_v5 = vsub.f32 %v8042_v33, %v1982_v16  ;;  %4148 = vmatprep.subr.bf16.mxu1 %v8037_v52  ;;  %4166 = vmatprep.subr.bf16.mxu0 %v8037_v52  ;;  %v2914_v33 = vpack.c.bf16 %v2822_v7, %v2821_v14  ;;  %v8191_v14 = vld [vmem:[#allocation61_spill] sm:$0xff] }
 0x468   : > { %4805 = vrcp.f32 %v2512_v54 }
 0x469   : > { %v4794_v62 = vpop.eup %4793  ;;  %v2365_v30 = vmul.f32 1.442695, %v2110_v5  ;;  %v2544_v27 = vpop.xlane.xlu1 %2543 }
 0x46a   : > { %v2514_v63 = vpop.xlane.xlu0 %2513  ;;  %v2836_v38 = vmul.f32 %v4794_v62, %v8188_v45 }
 0x46b   : > { %4807 = vpow2.f32 %v2365_v30 }
 0x46c   : > { %v6933_v48 = vpop.eup %4795  ;;  %4809 = vrcp.f32 %v2514_v63  ;;  %v2921_v20 = vpack.c.bf16 %v2836_v38, %v2835_v32 }
 0x46d   : > { %v4798_v23 = vpop.eup %4797  ;;  %4811 = vrcp.f32 %v2544_v27  ;;  %2587 = vadd.xlane.f32.xlu1 %v6933_v48  ;;  %v2516_v58 = vpop.xlane.xlu1 %2515 }
 0x46e   : > { %4149 = vmatpush3.bf16.xpose.msra.mxu1 %v2914_v33  ;;  %4167 = vmatpush3.bf16.xpose.msra.mxu0 %v2921_v20  ;;  %v2546_v54 = vpop.xlane.xlu0 %2545  ;;  %v4800_v47 = vpop.eup %4799  ;;  %v2838_v17 = vmul.f32 %v4798_v23, %v8189_v13 }
 0x46f   : > { %4813 = vrcp.f32 %v2546_v54  ;;  %4168 = vmatprep.subr.bf16.mxu0 %v8037_v52  ;;  %4150 = vmatprep.subr.bf16.mxu1 %v8037_v52  ;;  %v2837_v5 = vmul.f32 %v4800_v47, %v8190_v2 }
 0x470   : > { %v6938_v8 = vpop.eup %4801  ;;  %4815 = vrcp.f32 %v2516_v58 }
 0x471   : > { %v6941_v36 = vpop.eup %4803  ;;  %2619 = vadd.xlane.f32.xlu1 %v6938_v8  ;;  %v2548_v56 = vpop.xlane.xlu1 %2547  ;;  %v2922_v7 = vpack.c.bf16 %v2838_v17, %v2837_v5 }
 0x472   : > { %2589 = vadd.xlane.f32.xlu0 %v6941_v36  ;;  %v2518_v16 = vpop.xlane.xlu0 %2517  ;;  %v4806_v3 = vpop.eup %4805 }
 0x473   : > { %4817 = vrcp.f32 %v2518_v16  ;;  %v2823_v53 = vmul.f32 %v4806_v3, %v8191_v14 }
 0x474   : > { %4819 = vrcp.f32 %v2548_v56 }
 0x475   : > { %v6946_v62 = vpop.eup %4807  ;;  %v2520_v30 = vpop.xlane.xlu1 %2519 }
 0x476   : > { %v4810_v27 = vpop.eup %4809  ;;  %4169 = vmatpush3.bf16.xpose.msra.mxu0 %v2922_v7  ;;  %2621 = vadd.xlane.f32.xlu0 %v6946_v62  ;;  %v2550_v63 = vpop.xlane.xlu0 %2549 }
 0x477   : > { %v4812_v18 = vpop.eup %4811  ;;  %4821 = vrcp.f32 %v2550_v63  ;;  %v2824_v32 = vmul.f32 %v4810_v27, %v6557_v1  ;;  %4170 = vmatprep.subr.bf16.mxu0 %v8037_v52 }
 0x478   : > { %4823 = vrcp.f32 %v2520_v30  ;;  %v2839_v23 = vmul.f32 %v4812_v18, %v6565_v28  ;;  %v3310_v28 = vld [vmem:[%s7112_s4] sm:$0xff] }
 0x479   : > { %v4814_v45 = vpop.eup %4813  ;;  %v2552_v38 = vpop.xlane.xlu1 %2551  ;;  %v2915_v33 = vpack.c.bf16 %v2824_v32, %v2823_v53 }
 0x47a   : > { %v2522_v20 = vpop.xlane.xlu0 %2521  ;;  %v2840_v58 = vmul.f32 %v4814_v45, %v6589_v42  ;;  %v4816_v54 = vpop.eup %4815 }
 0x47b   : > { %4151 = vmatpush3.bf16.xpose.msra.mxu1 %v2915_v33  ;;  %4825 = vrcp.f32 %v2522_v20  ;;  %v2825_v56 = vmul.f32 %v4816_v54, %v6523_v57  ;;  %v3311_v33 = vld [vmem:[%s7112_s4 + $0x8] sm:$0xff] }
 0x47c   : > { %v2923_v47 = vpack.c.bf16 %v2840_v58, %v2839_v23  ;;  %4152 = vmatprep.subr.bf16.mxu1 %v8037_v52  ;;  %4827 = vrcp.f32 %v2552_v38 }
 0x47d   : > { %v4818_v13 = vpop.eup %4817  ;;  %v2524_v1 = vpop.xlane.xlu1 %2523 }
 0x47e   : > { %4171 = vmatpush3.bf16.xpose.msra.mxu0 %v2923_v47  ;;  %v2554_v17 = vpop.xlane.xlu0 %2553  ;;  %v2826_v16 = vmul.f32 %v4818_v13, %v6539_v31  ;;  %v4820_v2 = vpop.eup %4819 }
 0x47f   : > { %4829 = vrcp.f32 %v2554_v17  ;;  %4172 = vmatprep.subr.bf16.mxu0 %v8037_v52  ;;  %v2841_v30 = vmul.f32 %v4820_v2, %v6541_v10 }
 0x480   : > { %v2916_v42 = vpack.c.bf16 %v2826_v16, %v2825_v56  ;;  %4831 = vrcp.f32 %v2524_v1 }
 0x481   : > { %v4822_v5 = vpop.eup %4821  ;;  %v2556_v3 = vpop.xlane.xlu1 %2555 }
 0x482   : > { %3314 = vperm.xlu1 %4386, %v3310_v28   ;;  %v2526_v7 = vpop.xlane.xlu0 %2525  ;;  %v2842_v57 = vmul.f32 %v4822_v5, %v6570_v59  ;;  %v4824_v27 = vpop.eup %4823 }
 0x483   : > { %4153 = vmatpush3.bf16.xpose.msra.mxu1 %v2916_v42  ;;  %4833 = vrcp.f32 %v2526_v7  ;;  %v2827_v53 = vmul.f32 %v4824_v27, %v6597_v39 }
 0x484   : > { %v2924_v31 = vpack.c.bf16 %v2842_v57, %v2841_v30  ;;  %4154 = vmatprep.subr.bf16.mxu1 %v8037_v52  ;;  %4835 = vrcp.f32 %v2556_v3 }
 0x485   : > { %v4826_v63 = vpop.eup %4825  ;;  %v2560_v18 = vpop.xlane.xlu1 %2559 }
 0x486   : > { %4173 = vmatpush3.bf16.xpose.msra.mxu0 %v2924_v31  ;;  %v2558_v14 = vpop.xlane.xlu0 %2557  ;;  %v2828_v32 = vmul.f32 %v4826_v63, %v6619_v4  ;;  %v4828_v45 = vpop.eup %4827  ;;  %v8192_v63 = vld [vmem:[#allocation4_spill] sm:$0xff] }
 0x487   : > { %4837 = vrcp.f32 %v2558_v14  ;;  %4174 = vmatprep.subr.bf16.mxu0 %v8037_v52  ;;  %v2843_v23 = vmul.f32 %v4828_v45, %v6624_v46 }
 0x488   : > { %v2917_v10 = vpack.c.bf16 %v2828_v32, %v2827_v53  ;;  %4839 = vrcp.f32 %v2560_v18 }
 0x489   : > { %v4830_v59 = vpop.eup %4829  ;;  %v2592_v38 = vpop.xlane.xlu1 %2591 }
 0x48a   : > { %v2562_v20 = vpop.xlane.xlu0 %2561  ;;  %v2844_v58 = vmul.f32 %v4830_v59, %v6649_v9  ;;  %v4832_v39 = vpop.eup %4831 }
 0x48b   : > { %4155 = vmatpush3.bf16.xpose.msra.mxu1 %v2917_v10  ;;  %4841 = vrcp.f32 %v2562_v20  ;;  %v2829_v1 = vmul.f32 %v4832_v39, %v6572_v29  ;;  %v8193_v10 = vld [vmem:[#allocation6_spill] sm:$0xff] }
 0x48c   : > { %3319 = vperm.xlu0 %4385, %v3311_v33   ;;  %v2925_v4 = vpack.c.bf16 %v2844_v58, %v2843_v23  ;;  %4156 = vmatprep.subr.bf16.mxu1 %v8037_v52  ;;  %4843 = vrcp.f32 %v2592_v38 }
 0x48d   : > { %v4834_v54 = vpop.eup %4833  ;;  %v2564_v47 = vpop.xlane.xlu1 %2563 }
 0x48e   : > { %4175 = vmatpush3.bf16.xpose.msra.mxu0 %v2925_v4  ;;  %v2594_v13 = vpop.xlane.xlu0 %2593  ;;  %v2830_v17 = vmul.f32 %v4834_v54, %v6602_v49  ;;  %v4836_v56 = vpop.eup %4835 }
 0x48f   : > { %4845 = vrcp.f32 %v2594_v13  ;;  %4176 = vmatprep.subr.bf16.mxu0 %v8037_v52  ;;  %v2845_v28 = vmul.f32 %v4836_v56, %v6604_v55 }
 0x490   : > { %v2918_v46 = vpack.c.bf16 %v2830_v17, %v2829_v1  ;;  %4847 = vrcp.f32 %v2564_v47 }
 0x491   : > { %v4838_v9 = vpop.eup %4837  ;;  %v2596_v16 = vpop.xlane.xlu1 %2595 }
 0x492   : > { %v2566_v2 = vpop.xlane.xlu0 %2565  ;;  %v2846_v42 = vmul.f32 %v4838_v9, %v6632_v37  ;;  %v4840_v5 = vpop.eup %4839 }
 0x493   : > { %4157 = vmatpush3.bf16.xpose.msra.mxu1 %v2918_v46  ;;  %4849 = vrcp.f32 %v2566_v2  ;;  %v2847_v30 = vmul.f32 %v4840_v5, %v6654_v51 }
 0x494   : > { %v2926_v3 = vpack.c.bf16 %v2846_v42, %v2845_v28  ;;  %4182 = vmatprep.subr.bf16.mxu1 %v8037_v52  ;;  %4851 = vrcp.f32 %v2596_v16 }
 0x495   : > { %v4842_v29 = vpop.eup %4841  ;;  %v2568_v49 = vpop.xlane.xlu1 %2567 }
 0x496   : > { %4177 = vmatpush3.bf16.xpose.msra.mxu0 %v2926_v3  ;;  %v2598_v7 = vpop.xlane.xlu0 %2597  ;;  %v2848_v57 = vmul.f32 %v4842_v29, %v6688_v50  ;;  %v4844_v27 = vpop.eup %4843 }
 0x497   : > { %4853 = vrcp.f32 %v2598_v7  ;;  %4202 = vmatprep.subr.bf16.mxu0 %v8037_v52  ;;  %v2863_v14 = vmul.f32 %v4844_v27, %v6693_v61 }
 0x498   : > { %v2927_v55 = vpack.c.bf16 %v2848_v57, %v2847_v30  ;;  %4855 = vrcp.f32 %v2568_v49 }
 0x499   : > { %v4846_v37 = vpop.eup %4845  ;;  %v2600_v31 = vpop.xlane.xlu1 %2599 }
 0x49a   : > { %4159 = vmatmul.mubr.bf16.vlgmr.msra.gmra.mrb[76].mxu1 %v8192_v63  ;;  %v2570_v18 = vpop.xlane.xlu0 %2569  ;;  %v2864_v53 = vmul.f32 %v4846_v37, %v6708_v11  ;;  %v4848_v32 = vpop.eup %4847 }
 0x49b   : > { %4183 = vmatpush3.bf16.xpose.msra.mxu1 %v2927_v55  ;;  %4857 = vrcp.f32 %v2570_v18  ;;  %4198 = vmatprep.mubr.msk.bf16.mxu1 %vm4918_vm0, %v8037_v52  ;;  %v2849_v61 = vmul.f32 %v4848_v32, %v6634_v34 }
 0x49c   : > { %v2935_v51 = vpack.c.bf16 %v2864_v53, %v2863_v14  ;;  %4184 = vmatprep.subr.bf16.mxu1 %v8037_v52  ;;  %4859 = vrcp.f32 %v2600_v31 }
 0x49d   : > { %v4850_v50 = vpop.eup %4849  ;;  %v2572_v45 = vpop.xlane.xlu1 %2571  ;;  %4179 = vmatmul.mubr.bf16.vlgmr.msra.gmra.mrb[80].mxu0 %v8193_v10 }
 0x49e   : > { %4203 = vmatpush3.bf16.xpose.msra.mxu0 %v2935_v51  ;;  %v2602_v59 = vpop.xlane.xlu0 %2601  ;;  %v2850_v11 = vmul.f32 %v4850_v50, %v6662_v12  ;;  %4218 = vmatprep.mubr.msk.bf16.mxu0 %vm4918_vm0, %v8037_v52  ;;  %v4852_v38 = vpop.eup %4851 }
 0x49f   : > { %4861 = vrcp.f32 %v2602_v59  ;;  %4204 = vmatprep.subr.bf16.mxu0 %v8037_v52  ;;  %v2865_v39 = vmul.f32 %v4852_v38, %v6680_v44  ;;  %v8194_v38 = vld [vmem:[#allocation68_spill] sm:$0xff] }
 0x4a0   : > { %v2928_v33 = vpack.c.bf16 %v2850_v11, %v2849_v61  ;;  %4863 = vrcp.f32 %v2572_v45 }
 0x4a1   : > { %v4854_v20 = vpop.eup %4853  ;;  %v2604_v23 = vpop.xlane.xlu1 %2603 }
 0x4a2   : > { %v2574_v58 = vpop.xlane.xlu0 %2573  ;;  %v2866_v4 = vmul.f32 %v4854_v20, %v6713_v41  ;;  %v4856_v54 = vpop.eup %4855 }
 0x4a3   : > { %4185 = vmatpush3.bf16.xpose.msra.mxu1 %v2928_v33  ;;  %4865 = vrcp.f32 %v2574_v58  ;;  %v2851_v1 = vmul.f32 %v4856_v54, %v6723_v6 }
 0x4a4   : > { %v2936_v34 = vpack.c.bf16 %v2866_v4, %v2865_v39  ;;  %4186 = vmatprep.subr.bf16.mxu1 %v8037_v52  ;;  %4867 = vrcp.f32 %v2604_v23  ;;  %v8195_v23 = vld [vmem:[#allocation16_spill] sm:$0xff]  ;;  %v8196_v39 = vld [vmem:[#allocation71_spill] sm:$0xff] }
 0x4a5   : > { %v4858_v12 = vpop.eup %4857  ;;  %v2576_v47 = vpop.xlane.xlu1 %2575 }
 0x4a6   : > { %4205 = vmatpush3.bf16.xpose.msra.mxu0 %v2936_v34  ;;  %v2606_v13 = vpop.xlane.xlu0 %2605  ;;  %v2852_v17 = vmul.f32 %v4858_v12, %v6749_v0  ;;  %v4860_v56 = vpop.eup %4859 }
 0x4a7   : > { %4869 = vrcp.f32 %v2606_v13  ;;  %4206 = vmatprep.subr.bf16.mxu0 %v8037_v52  ;;  %v2867_v16 = vmul.f32 %v4860_v56, %v6754_v43  ;;  %v8198_v13 = vld [vmem:[#allocation73_spill] sm:$0xff] }
 0x4a8   : > { %v2929_v44 = vpack.c.bf16 %v2852_v17, %v2851_v1  ;;  %4871 = vrcp.f32 %v2576_v47 }
 0x4a9   : > { %v4862_v41 = vpop.eup %4861  ;;  %v2608_v46 = vpop.xlane.xlu1 %2607 }
 0x4aa   : > { %v2578_v9 = vpop.xlane.xlu0 %2577  ;;  %v2868_v2 = vmul.f32 %v4862_v41, %v6769_v15  ;;  %v4864_v28 = vpop.eup %4863  ;;  %v8199_v41 = vld [vmem:[#allocation129_spill] sm:$0xff] }
 0x4ab   : > { %4187 = vmatpush3.bf16.xpose.msra.mxu1 %v2929_v44  ;;  %4873 = vrcp.f32 %v2578_v9  ;;  %v2853_v3 = vmul.f32 %v4864_v28, %v6721_v35  ;;  %v8200_v9 = vld [vmem:[#allocation64_spill] sm:$0xff] }
 0x4ac   : > { %v2937_v42 = vpack.c.bf16 %v2868_v2, %v2867_v16  ;;  %4188 = vmatprep.subr.bf16.mxu1 %v8037_v52  ;;  %4875 = vrcp.f32 %v2608_v46 }
 0x4ad   : > { %v4866_v6 = vpop.eup %4865  ;;  %v2580_v0 = vpop.xlane.xlu1 %2579 }
 0x4ae   : > { %4207 = vmatpush3.bf16.xpose.msra.mxu0 %v2937_v42  ;;  %v2610_v5 = vpop.xlane.xlu0 %2609  ;;  %v2854_v29 = vmul.f32 %v4866_v6, %v6741_v60  ;;  %v4868_v49 = vpop.eup %4867 }
 0x4af   : > { %4877 = vrcp.f32 %v2610_v5  ;;  %4208 = vmatprep.subr.bf16.mxu0 %v8037_v52  ;;  %v2869_v57 = vmul.f32 %v4868_v49, %v6774_v24 }
 0x4b0   : > { %v2930_v43 = vpack.c.bf16 %v2854_v29, %v2853_v3  ;;  %4879 = vrcp.f32 %v2580_v0 }
 0x4b1   : > { %v4870_v15 = vpop.eup %4869  ;;  %v2612_v7 = vpop.xlane.xlu1 %2611 }
 0x4b2   : > { %v2582_v30 = vpop.xlane.xlu0 %2581  ;;  %v2870_v27 = vmul.f32 %v4870_v15, %v6782_v21  ;;  %v4872_v55 = vpop.eup %4871 }
 0x4b3   : > { %4189 = vmatpush3.bf16.xpose.msra.mxu1 %v2930_v43  ;;  %4881 = vrcp.f32 %v2582_v30  ;;  %v2855_v18 = vmul.f32 %v4872_v55, %v6784_v40 }
 0x4b4   : > { %v2938_v37 = vpack.c.bf16 %v2870_v27, %v2869_v57  ;;  %4190 = vmatprep.subr.bf16.mxu1 %v8037_v52  ;;  %4883 = vrcp.f32 %v2612_v7 }
 0x4b5   : > { %v4874_v35 = vpop.eup %4873  ;;  %v2584_v60 = vpop.xlane.xlu1 %2583 }
 0x4b6   : > { %4209 = vmatpush3.bf16.xpose.msra.mxu0 %v2938_v37  ;;  %v2614_v31 = vpop.xlane.xlu0 %2613  ;;  %v2856_v14 = vmul.f32 %v4874_v35, %v6813_v22  ;;  %v4876_v53 = vpop.eup %4875 }
 0x4b7   : > { %4885 = vrcp.f32 %v2614_v31  ;;  %4210 = vmatprep.subr.bf16.mxu0 %v8037_v52  ;;  %v2871_v50 = vmul.f32 %v4876_v53, %v6818_v19 }
 0x4b8   : > { %v2931_v24 = vpack.c.bf16 %v2856_v14, %v2855_v18  ;;  %4887 = vrcp.f32 %v2584_v60 }
 0x4b9   : > { %v4878_v21 = vpop.eup %4877  ;;  %v2616_v32 = vpop.xlane.xlu1 %2615 }
 0x4ba   : > { %v2586_v51 = vpop.xlane.xlu0 %2585  ;;  %v2872_v45 = vmul.f32 %v4878_v21, %v6832_v26  ;;  %v4880_v59 = vpop.eup %4879  ;;  %v594_v21 = vcombine.high %v8192_v63, %v8192_v63 }
 0x4bb   : > { %4191 = vmatpush3.bf16.xpose.msra.mxu1 %v2931_v24  ;;  %4889 = vrcp.f32 %v2586_v51  ;;  %v2857_v11 = vmul.f32 %v4880_v59, %v6803_v25  ;;  %v8197_v25 = vld [vmem:[#allocation18_spill] sm:$0xff] }
 0x4bc   : > { %v2939_v61 = vpack.c.bf16 %v2872_v45, %v2871_v50  ;;  %4192 = vmatprep.subr.bf16.mxu1 %v8037_v52  ;;  %4891 = vrcp.f32 %v2616_v32  ;;  %v8201_v59 = vld [vmem:[#allocation2_spill] sm:$0xff] }
 0x4bd   : > { %v4882_v40 = vpop.eup %4881 }
 0x4be   : > { %4211 = vmatpush3.bf16.xpose.msra.mxu0 %v2939_v61  ;;  %v2618_v22 = vpop.xlane.xlu0 %2617  ;;  %v2858_v33 = vmul.f32 %v4882_v40, %v8194_v38  ;;  %v4884_v20 = vpop.eup %4883 }
 0x4bf   : > { %4893 = vrcp.f32 %v2618_v22  ;;  %4212 = vmatprep.subr.bf16.mxu0 %v8037_v52  ;;  %v2873_v58 = vmul.f32 %v4884_v20, %v8195_v23 }
 0x4c0   : > { %v2932_v19 = vpack.c.bf16 %v2858_v33, %v2857_v11 }
 0x4c1   : > { %v4886_v26 = vpop.eup %4885 }
 0x4c2   : > { %v2874_v4 = vmul.f32 %v4886_v26, %v8196_v39  ;;  %v4888_v54 = vpop.eup %4887 }
 0x4c3   : > { %4193 = vmatpush3.bf16.xpose.msra.mxu1 %v2932_v19  ;;  %v2859_v47 = vmul.f32 %v4888_v54, %v8197_v25  ;;  %v3374_v25 = vld [vmem:[%s7115_s7 + $0x8] sm:$0xff] }
 0x4c4   : > { %v2940_v34 = vpack.c.bf16 %v2874_v4, %v2873_v58  ;;  %4194 = vmatprep.subr.bf16.mxu1 %v8037_v52 }
 0x4c5   : > { %v4890_v12 = vpop.eup %4889 }
 0x4c6   : > { %4213 = vmatpush3.bf16.xpose.msra.mxu0 %v2940_v34  ;;  %v2860_v1 = vmul.f32 %v4890_v12, %v8198_v13  ;;  %v4892_v17 = vpop.eup %4891  ;;  %v3373_v12 = vld [vmem:[%s7115_s7] sm:$0xff]  ;;  %v3375_v13 = vld [vmem:[%s7115_s7 + $0x10] sm:$0xff] }
 0x4c7   : > { %4214 = vmatprep.subr.bf16.mxu0 %v8037_v52  ;;  %v2875_v46 = vmul.f32 %v4892_v17, %v8199_v41 }
 0x4c8   : > { %v2933_v56 = vpack.c.bf16 %v2860_v1, %v2859_v47  ;;  %v4298_v47 = vpack.c.bf16 %v3374_v25, %v3373_v12  ;;  %v3376_v1 = vld [vmem:[%s7115_s7 + $0x18] sm:$0xff]  ;;  %v3712_v25 = vld [vmem:[%s7113_s5] ss:$0 sm:$0xff] }
 0x4c9   : > { %v4894_v44 = vpop.eup %4893  ;;  %v4302_v17 = vpack.c.bf16 %v3376_v1, %v3375_v13  ;;  %v3713_v1 = vld [vmem:[%s7114_s6] ss:$0 sm:$0xff] }
 0x4ca   : > { %v2876_v16 = vmul.f32 %v4894_v44, %v8200_v9  ;;  %v3378_v44 = vld [vmem:[%s7115_s7 + $0x28] sm:$0xff]  ;;  %v3380_v9 = vld [vmem:[%s7115_s7 + $0x38] sm:$0xff] }
 0x4cb   : > { %4195 = vmatpush3.bf16.xpose.msra.mxu1 %v2933_v56  ;;  %v3377_v56 = vld [vmem:[%s7115_s7 + $0x20] sm:$0xff] }
 0x4cc   : > { %v2941_v2 = vpack.c.bf16 %v2876_v16, %v2875_v46  ;;  %4196 = vmatprep.subr.bf16.mxu1 %v8037_v52  ;;  %v4306_v41 = vpack.c.bf16 %v3378_v44, %v3377_v56  ;;  %v3379_v46 = vld [vmem:[%s7115_s7 + $0x30] sm:$0xff] }
 0x4cd   : > { %v4310_v16 = vpack.c.bf16 %v3380_v9, %v3379_v46 }
 0x4ce   : > { %4215 = vmatpush3.bf16.xpose.msra.mxu0 %v2941_v2  ;;  %v3381_v2 = vld [vmem:[%s7115_s7 + $0x40] sm:$0xff] }
 0x4cf   : > { %4216 = vmatprep.subr.bf16.mxu0 %v8037_v52 }
 0x4e8   : > { %v2977_v28 = vpop.f32.mrb[68].mxu1 }
 0x4e9   : > { %v4080_v42 = vpop.f32.mrb[69].mxu1 }
 0x4ea   : > { %v2980_v6 = vpop.f32.mrb[70].mxu1 }
 0x4eb   : > { %v4081_v0 = vpop.f32.mrb[71].mxu1  ;;  %v3383_v6 = vld [vmem:[%s7115_s7 + $0x50] sm:$0xff] }
 0x4ec   : > { %v3384_v0 = vld [vmem:[%s7115_s7 + $0x58] sm:$0xff] }
 0x4f0   : > { %v3017_v5 = vpop.f32.mrb[72].mxu0 }
 0x4f1   : > { %v3271_v3 = vcombine.low %v2977_v28, %v3017_v5  ;;  %v4100_v29 = vpop.f32.mrb[73].mxu0  ;;  %v3382_v28 = vld [vmem:[%s7115_s7 + $0x48] sm:$0xff]  ;;  %v4318_v5 = vpack.c.bf16 %v3384_v0, %v3383_v6 }
 0x4f2   : > { %v3020_v49 = vpop.f32.mrb[74].mxu0  ;;  %v4314_v42 = vpack.c.bf16 %v3382_v28, %v3381_v2  ;;  %v3386_v29 = vld [vmem:[%s7115_s7 + $0x68] sm:$0xff] }
 0x4f3   : > { %v4101_v43 = vpop.f32.mrb[75].mxu0 }
 0x4fa   : > { %v2588_v15 = vpop.xlane.xlu1 %2587 }
 0x4fb   : > { %4895 = vrcp.f32 %v2588_v15 }
 0x4fe   : > { %v2620_v7 = vpop.xlane.xlu1 %2619 }
 0x4ff   : > { %v2590_v30 = vpop.xlane.xlu0 %2589 }
 0x500   : > { %4897 = vrcp.f32 %v2590_v30 }
 0x501   : > { %4899 = vrcp.f32 %v2620_v7 }
 0x503   : > { %v2622_v57 = vpop.xlane.xlu0 %2621 }
 0x504   : > { %4901 = vrcp.f32 %v2622_v57 }
 0x505   : > { %v4896_v27 = vpop.eup %4895 }
 0x506   : > { %v2861_v37 = vmul.f32 %v4896_v27, %v6933_v48  ;;  %v596_v48 = vcombine.high %v8193_v10, %v8193_v10 }
 0x50a   : > { %v4898_v55 = vpop.eup %4897 }
 0x50b   : > { %v2862_v35 = vmul.f32 %v4898_v55, %v6941_v36  ;;  %v4900_v60 = vpop.eup %4899  ;;  %v4921_v36 = vmov 1983009808  }
 0x50c   : > { %v2877_v14 = vmul.f32 %v4900_v60, %v6938_v8  ;;  %v3274_v32 = vunpack.c.l.s4 %v4921_v36  ;;  %v3315_v36 = vpop.permute.xlu1 %3314 }
 0x50d   : > { %v2934_v31 = vpack.c.bf16 %v2862_v35, %v2861_v37 }
 0x50e   : > { %v4902_v18 = vpop.eup %4901  ;;  %v3275_v50 = vunpack.c.0.s8 %v3274_v32 }
 0x50f   : > { %4197 = vmatpush3.bf16.xpose.msra.mxu1 %v2934_v31  ;;  %v2878_v53 = vmul.f32 %v4902_v18, %v6946_v62 }
 0x510   : > { %4222 = vmatprep.subr.bf16.mxu1 %v8037_v52  ;;  %v3278_v61 = vsub.s32 %v3275_v50, %v8201_v59 }
 0x511   : > { %v2942_v24 = vpack.c.bf16 %v2878_v53, %v2877_v14  ;;  %v4390_v53 = vld [vmem:[%s7111_s3] sm:$0xff]  }
 0x512   : > { %v3279_v38 = vrot.slane %v3271_v3, %v3278_v61  ;;  %v3385_v3 = vld [vmem:[%s7115_s7 + $0x60] sm:$0xff] }
 0x513   : > { %4217 = vmatpush3.bf16.xpose.msra.mxu0 %v2942_v24  ;;  %v4322_v49 = vpack.c.bf16 %v3386_v29, %v3385_v3  ;;  %v3387_v24 = vld [vmem:[%s7115_s7 + $0x70] sm:$0xff] }
 0x514   : > { %4331 = vmatprep.subr.bf16.mxu0 %v4298_v47 }
 0x516   : > { %4199 = vmatmul.mubr.bf16.vlgmr.msra.gmra.mrb[80].mxu1 %v594_v21  ;;  %v3388_v21 = vld [vmem:[%s7115_s7 + $0x78] sm:$0xff] }
 0x517   : > { %4224 = vmatprep.mubr.msk.bf16.mxu1 %vm4918_vm0, %v8037_v52 }
 0x51a   : > { %4219 = vmatmul.mubr.bf16.vlgmr.msra.gmra.mrb[84].mxu0 %v596_v48  ;;  %v4326_v48 = vpack.c.bf16 %v3388_v21, %v3387_v24 }
 0x51b   : > { %4333 = vmatpush3.bf16.msra.mxu0 %v4298_v47 }
 0x51c   : > { %4335 = vmatprep.subr.bf16.mxu0 %v4302_v17 }
 0x51f   : > { %4337 = vmatpush3.bf16.msra.mxu0 %v4302_v17 }
 0x520   : > { %4339 = vmatprep.subr.bf16.mxu0 %v4306_v41 }
 0x523   : > { %4341 = vmatpush3.bf16.msra.mxu0 %v4306_v41 }
 0x524   : > { %4343 = vmatprep.subr.bf16.mxu0 %v4310_v16 }
 0x527   : > { %4345 = vmatpush3.bf16.msra.mxu0 %v4310_v16 }
 0x528   : > { %v3057_v8 = vpop.f32.mrb[72].mxu1  ;;  %4347 = vmatprep.subr.bf16.mxu0 %v4314_v42 }
 0x529   : > { %v4120_v51 = vpop.f32.mrb[73].mxu1 }
 0x52a   : > { %v3060_v62 = vpop.f32.mrb[74].mxu1 }
 0x52b   : > { %v4121_v45 = vpop.f32.mrb[75].mxu1  ;;  %4349 = vmatpush3.bf16.msra.mxu0 %v4314_v42  ;;  %v3320_v62 = vpop.permute.xlu0 %3319 }
 0x52c   : > { %4351 = vmatprep.subr.bf16.mxu0 %v4318_v5  ;;  %v4907_v45 = vld [vmem:[%s4998_s16] sm:$0xff] }
 0x52f   : > { %4353 = vmatpush3.bf16.msra.mxu0 %v4318_v5 }
 0x530   : > { %v3097_v40 = vpop.f32.mrb[76].mxu0  ;;  %4355 = vmatprep.subr.bf16.mxu0 %v4322_v49 }
 0x531   : > { %v3272_v22 = vcombine.low %v3057_v8, %v3097_v40  ;;  %v4140_v63 = vpop.f32.mrb[77].mxu0 }
 0x532   : > { %v3100_v11 = vpop.f32.mrb[78].mxu0 }
 0x533   : > { %v3286_v33 = vrot.slane %v3272_v22, %v3278_v61  ;;  %v4141_v52 = vpop.f32.mrb[79].mxu0  ;;  %4357 = vmatpush3.bf16.msra.mxu0 %v4322_v49  ;;  %v4908_v22 = vld [vmem:[%s4998_s16 + $0x8] sm:$0xff] }
 0x534   : > { %4359 = vmatprep.subr.bf16.mxu0 %v4326_v48 }
 0x535   : > { %v3287_v20 = vcombine.low %v3279_v38, %v3286_v33 }
 0x537   : > { %4361 = vmatpush3.bf16.msra.mxu0 %v4326_v48 }
 0x56d   : > { %v3137_v19 = vpop.f32.mrb[76].mxu1 }
 0x56e   : > { %v4160_v10 = vpop.f32.mrb[77].mxu1 }
 0x56f   : > { %v3140_v26 = vpop.f32.mrb[78].mxu1 }
 0x570   : > { %v4161_v23 = vpop.f32.mrb[79].mxu1  ;;  %v3177_v58 = vpop.f32.mrb[80].mxu0 }
 0x571   : > { %v3288_v39 = vcombine.low %v3137_v19, %v3177_v58  ;;  %v4180_v4 = vpop.f32.mrb[81].mxu0 }
 0x572   : > { %v3180_v54 = vpop.f32.mrb[82].mxu0 }
 0x573   : > { %v4181_v34 = vpop.f32.mrb[83].mxu0  ;;  %v3296_v35 = vrot.slane %v3288_v39, %v3278_v61 }
 0x5e9   : > { %v3217_v43 = vpop.f32.mrb[80].mxu1 }
 0x5ea   : > { %v4200_v15 = vpop.f32.mrb[81].mxu1 }
 0x5eb   : > { %v3220_v7 = vpop.f32.mrb[82].mxu1 }
 0x5ec   : > { %v4201_v30 = vpop.f32.mrb[83].mxu1 }
 0x5ed   : > { %v3257_v57 = vpop.f32.mrb[84].mxu0 }
 0x5ee   : > { %v3289_v27 = vcombine.low %v3217_v43, %v3257_v57  ;;  %v4220_v55 = vpop.f32.mrb[85].mxu0 }
 0x5ef   : > { %v3260_v37 = vpop.f32.mrb[86].mxu0 }
 0x5f0   : > { %v3303_v60 = vrot.slane %v3289_v27, %v3278_v61  ;;  %v4221_v31 = vpop.f32.mrb[87].mxu0 }
 0x5f2   : > { %v3304_v18 = vcombine.low %v3296_v35, %v3303_v60 }
 0x5f4   : > { %v3307_v14 = vpack.c.bf16 %v3304_v18, %v3287_v20 }
 0x5f6   : > { %4223 = vmatpush3.bf16.msra.mxu1 %v3307_v14 }
 0x5f7   : > { %4299 = vmatprep.subr.bf16.mxu1 %v4298_v47 }
 0x5f9   : > { %4225 = vmatmul.mubr.msk.bf16.vlgmr.msra.gmra.mrb[84].mxu1 %vm367_vm1, %v4390_v53 }
 0x5fa   : > { %4301 = vmatpush3.bf16.msra.mxu1 %v4298_v47 }
 0x5fb   : > { %4303 = vmatprep.subr.bf16.mxu1 %v4302_v17 }
 0x5fe   : > { %4305 = vmatpush3.bf16.msra.mxu1 %v4302_v17 }
 0x5ff   : > { %4307 = vmatprep.subr.bf16.mxu1 %v4306_v41 }
 0x602   : > { %4309 = vmatpush3.bf16.msra.mxu1 %v4306_v41 }
 0x603   : > { %4311 = vmatprep.subr.bf16.mxu1 %v4310_v16 }
 0x606   : > { %4313 = vmatpush3.bf16.msra.mxu1 %v4310_v16 }
 0x607   : > { %4315 = vmatprep.subr.bf16.mxu1 %v4314_v42 }
 0x60a   : > { %4317 = vmatpush3.bf16.msra.mxu1 %v4314_v42 }
 0x60b   : > { %4319 = vmatprep.subr.bf16.mxu1 %v4318_v5 }
 0x60e   : > { %4321 = vmatpush3.bf16.msra.mxu1 %v4318_v5 }
 0x60f   : > { %4323 = vmatprep.subr.bf16.mxu1 %v4322_v49 }
 0x612   : > { %4325 = vmatpush3.bf16.msra.mxu1 %v4322_v49 }
 0x613   : > { %4327 = vmatprep.subr.bf16.mxu1 %v4326_v48 }
 0x616   : > { %4329 = vmatpush3.bf16.msra.mxu1 %v4326_v48 }
 0x6cc   : > { %v3364_v32 = vpop.f32.mrb[84].mxu1 }
 0x6cd   : > { %v3365_v8 = vadd.f32 %v3364_v32, %v3315_v36  ;;  %v4226_v51 = vpop.f32.mrb[85].mxu1 }
 0x6ce   : > { %v3367_v50 = vpop.f32.mrb[86].mxu1 }
 0x6cf   : > { %v3371_v59 = vadd.f32 %v4907_v45, %v3365_v8  ;;  %v3368_v61 = vadd.f32 %v3367_v50, %v3320_v62  ;;  %v4227_v40 = vpop.f32.mrb[87].mxu1 }
 0x6d1   : > { %v3372_v63 = vadd.f32 %v4908_v22, %v3368_v61  ;;  %4260 = vmatprep.mubr.f32.mxu1 %v3371_v59  ;;  %v3464_v11 = vmul.f32 %v3371_v59, %v3371_v59 }
 0x6d3   : > { %v3465_v38 = vmul.f32 %v3372_v63, %v3372_v63  ;;  %4261 = vmatmul.mubr.f32.vlgmr.msra.gmra.mrb[88].mxu1 %v3372_v63  ;;  %4295 = vmatprep.mubr.f32.mxu0 %v3464_v11 }
 0x6d5   : > { %4296 = vmatmul.mubr.f32.vlgmr.msra.gmra.mrb[88].mxu0 %v3465_v38 }
 0x7a6   : > { %v4262_v33 = vpop.f32.mrb[88].mxu1 }
 0x7a7   : > { %v3542_v52 = vmul.f32 %v4262_v33, %v4262_v33  ;;  %v3455_v20 = vpop.f32.mrb[89].mxu1  ;;  %v3550_v54 = vsub.f32 %v3372_v63, %v4262_v33 }
 0x7a8   : > { %v3541_v19 = vmul.f32 %v3455_v20, %v3455_v20  ;;  %v4297_v10 = vpop.f32.mrb[88].mxu0  ;;  %v3549_v12 = vsub.f32 %v3371_v59, %v3455_v20 }
 0x7a9   : > { %v3544_v26 = vsub.f32 %v4297_v10, %v3542_v52  ;;  %v3532_v23 = vpop.f32.mrb[89].mxu0 }
 0x7aa   : > { %v3543_v58 = vsub.f32 %v3532_v23, %v3541_v19 }
 0x7ab   : > { %v3546_v39 = vadd.f32 1e-05, %v3544_v26 }
 0x7ac   : > { %v3545_v4 = vadd.f32 1e-05, %v3543_v58 }
 0x7ad   : > { %4903 = vrsqrt.f32 %v3546_v39 }
 0x7ae   : > { %4905 = vrsqrt.f32 %v3545_v4 }
 0x7b7   : > { %v4904_v34 = vpop.eup %4903 }
 0x7b8   : > { %v4906_v47 = vpop.eup %4905  ;;  %v3552_v13 = vmul.f32 %v4904_v34, %v3550_v54 }
 0x7b9   : > { %v3551_v17 = vmul.f32 %v4906_v47, %v3549_v12 }
 0x7ba   : > { %v3561_v56 = vmul.f32 %v3712_v25, %v3552_v13 }
 0x7bb   : > { %v3560_v44 = vmul.f32 %v3712_v25, %v3551_v17 }
 0x7bc   : > { %v3570_v41 = vadd.f32 %v3713_v1, %v3561_v56 }
 0x7bd   : > { %v3569_v46 = vadd.f32 %v3713_v1, %v3560_v44 }
 0x7be   : > { %3572 = vst [vmem:[%s305_s18 + $0x8] sm:$0xff] %v3570_v41 }
 0x7bf   : > { %3571 = vst [vmem:[%s305_s18] sm:$0xff] %v3569_v46 }
 0x7c0 PF: > { %s18_s27 = sadd.s32 1, %s4915_s27  }
 0x7c1   : > { %p15_p4 = scmp.ge.s32.totalorder %s18_s27, 4  }
 0x7c3   :  { %17 = sbr.rel (!%p15_p4) target bundleno = 1 (0x1), region = 82 }

</bundles_post_ra>
